<compile_context>
chip_gen: v7x
topology: tpu7x:2x2x1
jax: 0.10.0
libtpu: 0.0.40
codegen_flags: <defaults>
</compile_context>

<pallas_src>
import functools

import jax
import jax.numpy as jnp
from jax.experimental import pallas as pl
from jax.experimental.pallas import tpu as pltpu


def _round_up(a, b):
    return ((a + b - 1) // b) * b


# ---------------------------------------------------------------------------
# Fused kernel: conv1(+bias,+lrelu) -> nearest x2 upsample + reflect pad ->
#               conv2(+bias,+lrelu), expressed as sub-pixel phase convs.
# ---------------------------------------------------------------------------
def _up_conv_block_kernel(x1a_ref, x1b_ref, w1_ref, b1_ref, w2_ref, b2_ref,
                          o_ref, *, slope):
    # x1a_ref: (TH,   W+2, K1p)   bf16  im2col'd conv1 input (main rows)
    # x1b_ref: (2,    W+2, K1p)   bf16  2-row bottom halo of the same array
    # w1_ref : (K1p,  C1p)        bf16  conv1 weights, 3x3 window folded into K
    # b1_ref : (1, C1p)           f32
    # w2_ref : (2, 6*C1p, 2*C2p)  bf16  per row-phase: K=(row tap, col tap, cin),
    #                                   N=(col phase, cout)
    # b2_ref : (1, 2*C2p)         f32
    # o_ref  : (TH, 2, W, 2*C2p)        out[y, p, x, q*C2p + c] = O[2y+p, 2x+q, c]
    th, _, w_out, _ = o_ref.shape

    def lrelu(v):
        return jnp.where(v >= 0.0, v, slope * v)

    # ---- conv1: one dot (3x3 window folded into K) + bias + LeakyReLU -----
    h_main = jnp.dot(x1a_ref[...], w1_ref[...],
                     preferred_element_type=jnp.float32)          # (TH,  W+2, C1p)
    h_halo = jnp.dot(x1b_ref[...], w1_ref[...],
                     preferred_element_type=jnp.float32)          # (2,   W+2, C1p)
    h_main = lrelu(h_main + b1_ref[...]).astype(jnp.bfloat16)
    h_halo = lrelu(h_halo + b1_ref[...]).astype(jnp.bfloat16)
    hs = jnp.concatenate([h_main, h_halo], axis=0)                # (TH+2, W+2, C1p)

    # ---- upsample(x2) + reflect pad + conv2, sub-pixel form ----------------
    # Pre-shift the three column taps once (sublane-offset views).
    cols = [hs[:, u:u + w_out, :] for u in range(3)]              # each (TH+2, W, C1p)
    for p in range(2):                                            # output row phase
        lhs = jnp.concatenate(
            [cols[u][p + i:p + i + th] for i in range(2) for u in range(3)],
            axis=-1)                                              # (TH, W, 6*C1p)
        acc = jnp.dot(lhs, w2_ref[p],
                      preferred_element_type=jnp.float32)         # (TH, W, 2*C2p)
        y = lrelu(acc + b2_ref[...])
        o_ref[:, p, :, :] = y.astype(o_ref.dtype)


# ---------------------------------------------------------------------------
# Spectral norm (weight preprocessing, plain JAX — tiny per-weight cost)
# ---------------------------------------------------------------------------
# TODO(synk): PyTorch spectral_norm keeps a persistent `u` buffer updated by one
# power iteration per training forward; here we run a converged power iteration
# as stateless weight preprocessing (same forward semantics with converged u/v).
def spectral_normalize(w, u0, n_iter=30, eps=1e-12):
    wm = w.reshape(w.shape[0], -1)
    u = u0 / (jnp.linalg.norm(u0) + eps)
    v = jnp.zeros((wm.shape[1],), w.dtype)
    for _ in range(n_iter):
        v = wm.T @ u
        v = v / (jnp.linalg.norm(v) + eps)
        u = wm @ v
        u = u / (jnp.linalg.norm(u) + eps)
    sigma = u @ (wm @ v)
    return w / sigma


# ---------------------------------------------------------------------------
# Up_ConvBlock forward (single fused pallas_call)
# ---------------------------------------------------------------------------
def up_conv_block(x, params, relu_slope=0.2, *, row_tile=32, out_dtype=jnp.float32):
    """x: (N, H, W, dim_in) NHWC  ->  (N, 2H, 2W, dim_out)."""
    w1 = spectral_normalize(params["w1"], params["u1"])
    w2 = spectral_normalize(params["w2"], params["u2"])
    b1, b2 = params["b1"], params["b2"]

    N, H, W, Cin = x.shape
    C1out = w1.shape[0]
    C2out = w2.shape[0]
    assert w1.shape == (C1out, Cin, 3, 3) and w2.shape == (C2out, C1out, 3, 3)

    K1 = 9 * Cin
    K1p = _round_up(K1, 128)          # conv1 contraction dim (window folded)
    C1p = _round_up(C1out, 128)
    C2p = _round_up(C2out, 128)

    TH = int(min(_round_up(row_tile, 2), _round_up(H, 2)))   # even row tile
    n_rb = int(pl.cdiv(H, TH))
    H_pad = n_rb * TH

    # ---- conv1 input: reflection pad + im2col (fold 3x3 window into K) ----
    # TODO(synk): for very large dim_in (>~128) a per-tap path would avoid the
    # 9x im2col inflation of the (low-res) conv1 input.
    xp = jnp.pad(x, ((0, 0), (1, 1), (1, 1), (0, 0)), mode="reflect")
    x1 = jnp.concatenate(
        [xp[:, a:a + H, b:b + W, :] for a in range(3) for b in range(3)], axis=-1)
    # Edge-duplicating the im2col rows/cols by 1 makes conv1's output edge-clamped,
    # which is exactly what (nearest-upsample -> ReflectionPad2d(1) -> 3x3 conv)
    # needs at the borders.
    x1 = jnp.pad(x1, ((0, 0), (1, 1), (1, 1), (0, 0)), mode="edge")
    x1 = jnp.pad(x1, ((0, 0), (0, H_pad - H), (0, 0), (0, K1p - K1)))
    x1 = x1.astype(jnp.bfloat16)                  # (N, H_pad+2, W+2, K1p)

    # ---- conv1 weights / bias ---------------------------------------------
    w1k = jnp.transpose(w1, (2, 3, 1, 0)).reshape(K1, C1out)
    w1k = jnp.pad(w1k, ((0, K1p - K1), (0, C1p - C1out))).astype(jnp.bfloat16)
    b1p = jnp.pad(b1, (0, C1p - C1out)).reshape(1, C1p).astype(jnp.float32)

    # ---- conv2 weights: fold upsample + reflect pad into 4 sub-pixel phases
    #      of a 2x2 conv; pack K=(row tap i, col u, cin), N=(col phase q, cout).
    wt = jnp.transpose(w2, (2, 3, 1, 0))                       # (a, b, cin, cout)
    sel = jnp.array([[[1., 0., 0.], [0., 1., 1.]],             # phase 0: {a0}, {a1+a2}
                     [[1., 1., 0.], [0., 0., 1.]]],            # phase 1: {a0+a1}, {a2}
                    wt.dtype)                                  # (phase, tap, 3)
    g = jnp.einsum("pia,qjb,abcd->piqjcd", sel, sel, wt)       # (p, i, q, j, cin, cout)
    w2k = jnp.zeros((2, 2, 3, C1p, 2, C2p), wt.dtype)
    for q in range(2):
        for j in range(2):
            u = q + j                                          # column tap offset
            w2k = w2k.at[:, :, u, :C1out, q, :C2out].set(g[:, :, q, j])
    w2k = w2k.reshape(2, 6 * C1p, 2 * C2p).astype(jnp.bfloat16)
    b2p = jnp.pad(b2, (0, C2p - C2out))
    b2p = jnp.concatenate([b2p, b2p]).reshape(1, 2 * C2p).astype(jnp.float32)

    out_lanes = 2 * C2p
    out_isize = jnp.dtype(out_dtype).itemsize

    block_bytes = ((TH + 2) * (W + 2) * K1p * 2                 # conv1 input blocks
                   + K1p * C1p * 2                              # w1
                   + 2 * 6 * C1p * 2 * C2p * 2                  # w2
                   + TH * 2 * W * out_lanes * out_isize)        # output block
    vmem_limit = int(min(64 * 1024 * 1024, max(32 * 1024 * 1024, 6 * block_bytes)))

    flops = (2 * N * n_rb * (TH + 2) * (W + 2) * K1p * C1p
             + 2 * N * n_rb * 2 * TH * W * (6 * C1p) * (2 * C2p))
    bytes_accessed = (N * n_rb * (TH + 2) * (W + 2) * K1p * 2
                      + K1p * C1p * 2 + 2 * 6 * C1p * 2 * C2p * 2 + C1p * 4 + 2 * C2p * 4
                      + N * H_pad * 2 * W * out_lanes * out_isize)

    y = pl.pallas_call(
        functools.partial(_up_conv_block_kernel, slope=relu_slope),
        out_shape=jax.ShapeDtypeStruct((N, H_pad, 2, W, out_lanes), out_dtype),
        grid=(N, n_rb),
        in_specs=[
            # main TH-row strip of the im2col'd input
            pl.BlockSpec((None, TH, W + 2, K1p), lambda n, i: (n, i, 0, 0)),
            # 2-row bottom halo: same array, element rows [(i+1)*TH, (i+1)*TH+2)
            pl.BlockSpec((None, 2, W + 2, K1p),
                         lambda n, i: (n, (i + 1) * (TH // 2), 0, 0)),
            pl.BlockSpec((K1p, C1p), lambda n, i: (0, 0)),
            pl.BlockSpec((1, C1p), lambda n, i: (0, 0)),
            pl.BlockSpec((2, 6 * C1p, 2 * C2p), lambda n, i: (0, 0, 0)),
            pl.BlockSpec((1, 2 * C2p), lambda n, i: (0, 0)),
        ],
        out_specs=pl.BlockSpec((None, TH, 2, W, out_lanes),
                               lambda n, i: (n, i, 0, 0, 0)),
        compiler_params=pltpu.CompilerParams(
            dimension_semantics=("parallel", "parallel"),
            vmem_limit_bytes=vmem_limit),
        cost_estimate=pl.CostEstimate(flops=flops, transcendentals=0,
                                      bytes_accessed=bytes_accessed),
    )(x1, x1, w1k, b1p, w2k, b2p)

    # (N, H_pad, 2, W, 2*C2p) -> (N, 2*H_pad, 2*W, C2p): pure-metadata reshape,
    # then one fused row/channel slice to the real output extent.
    y = y.reshape(N, 2 * H_pad, 2 * W, C2p)
    return y[:, :2 * H, :, :C2out]
    # TODO(synk): add a W grid axis for very wide images so the per-block footprint
    # stays within v7x's 64 MiB VMEM.


# ---------------------------------------------------------------------------
# Pure-JAX reference (f32 end to end)
# ---------------------------------------------------------------------------
def _ref_reflect_conv3x3(z, w, b):
    n, h, ww, _ = z.shape
    zp = jnp.pad(z, ((0, 0), (1, 1), (1, 1), (0, 0)), mode="reflect")
    out = jnp.zeros((n, h, ww, w.shape[0]), jnp.float32) + b
    for dh in range(3):
        for dw in range(3):
            out = out + jnp.einsum("nhwc,oc->nhwo",
                                   zp[:, dh:dh + h, dw:dw + ww, :], w[:, :, dh, dw])
    return out


def ref_forward(x, params, slope):
    w1 = spectral_normalize(params["w1"], params["u1"])
    w2 = spectral_normalize(params["w2"], params["u2"])
    lrelu = lambda t: jnp.where(t >= 0, t, slope * t)
    h = lrelu(_ref_reflect_conv3x3(x, w1, params["b1"]))
    h = jnp.repeat(jnp.repeat(h, 2, axis=1), 2, axis=2)          # nearest x2
    return lrelu(_ref_reflect_conv3x3(h, w2, params["b2"]))


# ---------------------------------------------------------------------------
if __name__ == "__main__":
    N, dim_in, dim_out, H, W = 2, 8, 4, 16, 16
    relu_slope = 0.2

    key = jax.random.PRNGKey(0)
    kx, k1, k2, k3, k4, ku1, ku2 = jax.random.split(key, 7)
    x = jax.random.normal(kx, (N, H, W, dim_in), jnp.float32)    # NHWC
    params = {
        "w1": 0.1 * jax.random.normal(k1, (dim_out, dim_in, 3, 3), jnp.float32),
        "b1": 0.1 * jax.random.normal(k2, (dim_out,), jnp.float32),
        "w2": 0.1 * jax.random.normal(k3, (dim_out, dim_out, 3, 3), jnp.float32),
        "b2": 0.1 * jax.random.normal(k4, (dim_out,), jnp.float32),
        "u1": jax.random.normal(ku1, (dim_out,), jnp.float32),
        "u2": jax.random.normal(ku2, (dim_out,), jnp.float32),
    }

    fwd = jax.jit(functools.partial(up_conv_block, relu_slope=relu_slope))
    out = jax.block_until_ready(fwd(x, params))
    assert out.shape == (N, 2 * H, 2 * W, dim_out), out.shape

    ref = ref_forward(x, params, relu_slope)
    if not jnp.allclose(out, ref, atol=3e-2, rtol=3e-2):
        max_err = float(jnp.max(jnp.abs(out - ref)))
        raise AssertionError(f"Pallas result does not match reference (max err {max_err})")
    print("KERNEL_OK")
</pallas_src>

<mosaic_0001>
module attributes {stable_mosaic.version = 11 : i64} {
  func.func @_up_conv_block_kernel(%arg0: i32, %arg1: i32, %arg2: memref<1x16x18x128xbf16, #tpu.memory_space<vmem>>, %arg3: memref<1x2x18x128xbf16, #tpu.memory_space<vmem>>, %arg4: memref<128x128xbf16, #tpu.memory_space<vmem>>, %arg5: memref<1x128xf32, #tpu.memory_space<vmem>>, %arg6: memref<2x768x256xbf16, #tpu.memory_space<vmem>>, %arg7: memref<1x256xf32, #tpu.memory_space<vmem>>, %arg8: memref<1x16x2x16x256xf32, #tpu.memory_space<vmem>>) attributes {dimension_semantics = [#tpu.dimension_semantics<parallel>, #tpu.dimension_semantics<parallel>], iteration_bounds = array<i64: 2, 1>, scalar_prefetch = 0 : i64, scratch_operands = 0 : i64, tpu.core_type = #tpu.core_type<tc>, window_params = [{transform_indices = @transform_0, window_bounds = array<i64: 1, 16, 18, 128>}, {transform_indices = @transform_1, window_bounds = array<i64: 1, 2, 18, 128>}, {pipeline_mode = #tpu.pipeline_mode<synchronous>, transform_indices = @transform_2, window_bounds = array<i64: 128, 128>}, {pipeline_mode = #tpu.pipeline_mode<synchronous>, transform_indices = @transform_3, window_bounds = array<i64: 1, 128>}, {pipeline_mode = #tpu.pipeline_mode<synchronous>, transform_indices = @transform_4, window_bounds = array<i64: 2, 768, 256>}, {pipeline_mode = #tpu.pipeline_mode<synchronous>, transform_indices = @transform_5, window_bounds = array<i64: 1, 256>}, {transform_indices = @transform_6, window_bounds = array<i64: 1, 16, 2, 16, 256>}]} {
    %c0 = arith.constant 0 : index
    %c0_0 = arith.constant 0 : index
    %c0_1 = arith.constant 0 : index
    %c0_2 = arith.constant 0 : index
    %0 = vector.load %arg2[%c0, %c0_0, %c0_1, %c0_2] : memref<1x16x18x128xbf16, #tpu.memory_space<vmem>>, vector<1x16x18x128xbf16>
    %1 = vector.shape_cast %0 : vector<1x16x18x128xbf16> to vector<16x18x128xbf16>
    %c0_3 = arith.constant 0 : index
    %c0_4 = arith.constant 0 : index
    %2 = vector.load %arg4[%c0_3, %c0_4] : memref<128x128xbf16, #tpu.memory_space<vmem>>, vector<128x128xbf16>
    %cst = arith.constant dense<0.000000e+00> : vector<16x18x128xf32>
    %3 = tpu.matmul %1, %2, %cst {dimension_numbers = #tpu.dot_dimension_numbers<[2], [0], [0, 1], [1], [0, 0, 0, 1, 1, 1], [], []>} : vector<16x18x128xbf16>, vector<128x128xbf16>, vector<16x18x128xf32> -> vector<16x18x128xf32>
    %c0_5 = arith.constant 0 : index
    %c0_6 = arith.constant 0 : index
    %c0_7 = arith.constant 0 : index
    %c0_8 = arith.constant 0 : index
    %4 = vector.load %arg3[%c0_5, %c0_6, %c0_7, %c0_8] : memref<1x2x18x128xbf16, #tpu.memory_space<vmem>>, vector<1x2x18x128xbf16>
    %5 = vector.shape_cast %4 : vector<1x2x18x128xbf16> to vector<2x18x128xbf16>
    %c0_9 = arith.constant 0 : index
    %c0_10 = arith.constant 0 : index
    %6 = vector.load %arg4[%c0_9, %c0_10] : memref<128x128xbf16, #tpu.memory_space<vmem>>, vector<128x128xbf16>
    %cst_11 = arith.constant dense<0.000000e+00> : vector<2x18x128xf32>
    %7 = tpu.matmul %5, %6, %cst_11 {dimension_numbers = #tpu.dot_dimension_numbers<[2], [0], [0, 1], [1], [0, 0, 0, 1, 1, 1], [], []>} : vector<2x18x128xbf16>, vector<128x128xbf16>, vector<2x18x128xf32> -> vector<2x18x128xf32>
    %c0_12 = arith.constant 0 : index
    %c0_13 = arith.constant 0 : index
    %8 = vector.load %arg5[%c0_12, %c0_13] : memref<1x128xf32, #tpu.memory_space<vmem>>, vector<1x128xf32>
    %9 = vector.shape_cast %8 : vector<1x128xf32> to vector<1x1x128xf32>
    %10 = vector.broadcast %9 : vector<1x1x128xf32> to vector<16x18x128xf32>
    %11 = arith.addf %3, %10 : vector<16x18x128xf32>
    %cst_14 = arith.constant 0.000000e+00 : f32
    %12 = vector.broadcast %cst_14 : f32 to vector<16x18x128xf32>
    %13 = arith.cmpf oge, %11, %12 : vector<16x18x128xf32>
    %cst_15 = arith.constant 2.000000e-01 : f32
    %14 = vector.broadcast %cst_15 : f32 to vector<16x18x128xf32>
    %15 = arith.mulf %14, %11 : vector<16x18x128xf32>
    %16 = arith.select %13, %11, %15 : vector<16x18x128xi1>, vector<16x18x128xf32>
    %17 = arith.truncf %16 : vector<16x18x128xf32> to vector<16x18x128xbf16>
    %c0_16 = arith.constant 0 : index
    %c0_17 = arith.constant 0 : index
    %18 = vector.load %arg5[%c0_16, %c0_17] : memref<1x128xf32, #tpu.memory_space<vmem>>, vector<1x128xf32>
    %19 = vector.shape_cast %18 : vector<1x128xf32> to vector<1x1x128xf32>
    %20 = vector.broadcast %19 : vector<1x1x128xf32> to vector<2x18x128xf32>
    %21 = arith.addf %7, %20 : vector<2x18x128xf32>
    %cst_18 = arith.constant 0.000000e+00 : f32
    %22 = vector.broadcast %cst_18 : f32 to vector<2x18x128xf32>
    %23 = arith.cmpf oge, %21, %22 : vector<2x18x128xf32>
    %cst_19 = arith.constant 2.000000e-01 : f32
    %24 = vector.broadcast %cst_19 : f32 to vector<2x18x128xf32>
    %25 = arith.mulf %24, %21 : vector<2x18x128xf32>
    %26 = arith.select %23, %21, %25 : vector<2x18x128xi1>, vector<2x18x128xf32>
    %27 = arith.truncf %26 : vector<2x18x128xf32> to vector<2x18x128xbf16>
    %28 = tpu.concatenate %17, %27 in 0 : vector<16x18x128xbf16>, vector<2x18x128xbf16> -> vector<18x18x128xbf16>
    %29 = vector.extract_strided_slice %28 {offsets = [0, 0, 0], sizes = [18, 16, 128], strides = [1, 1, 1]} : vector<18x18x128xbf16> to vector<18x16x128xbf16>
    %30 = vector.extract_strided_slice %28 {offsets = [0, 1, 0], sizes = [18, 16, 128], strides = [1, 1, 1]} : vector<18x18x128xbf16> to vector<18x16x128xbf16>
    %31 = vector.extract_strided_slice %28 {offsets = [0, 2, 0], sizes = [18, 16, 128], strides = [1, 1, 1]} : vector<18x18x128xbf16> to vector<18x16x128xbf16>
    %32 = vector.extract_strided_slice %29 {offsets = [0, 0, 0], sizes = [16, 16, 128], strides = [1, 1, 1]} : vector<18x16x128xbf16> to vector<16x16x128xbf16>
    %33 = vector.extract_strided_slice %30 {offsets = [0, 0, 0], sizes = [16, 16, 128], strides = [1, 1, 1]} : vector<18x16x128xbf16> to vector<16x16x128xbf16>
    %34 = vector.extract_strided_slice %31 {offsets = [0, 0, 0], sizes = [16, 16, 128], strides = [1, 1, 1]} : vector<18x16x128xbf16> to vector<16x16x128xbf16>
    %35 = vector.extract_strided_slice %29 {offsets = [1, 0, 0], sizes = [16, 16, 128], strides = [1, 1, 1]} : vector<18x16x128xbf16> to vector<16x16x128xbf16>
    %36 = vector.extract_strided_slice %30 {offsets = [1, 0, 0], sizes = [16, 16, 128], strides = [1, 1, 1]} : vector<18x16x128xbf16> to vector<16x16x128xbf16>
    %37 = vector.extract_strided_slice %31 {offsets = [1, 0, 0], sizes = [16, 16, 128], strides = [1, 1, 1]} : vector<18x16x128xbf16> to vector<16x16x128xbf16>
    %38 = tpu.concatenate %32, %33, %34, %35, %36, %37 in 2 : vector<16x16x128xbf16>, vector<16x16x128xbf16>, vector<16x16x128xbf16>, vector<16x16x128xbf16>, vector<16x16x128xbf16>, vector<16x16x128xbf16> -> vector<16x16x768xbf16>
    %c0_20 = arith.constant 0 : index
    %c0_21 = arith.constant 0 : index
    %c0_22 = arith.constant 0 : index
    %39 = vector.load %arg6[%c0_20, %c0_21, %c0_22] : memref<2x768x256xbf16, #tpu.memory_space<vmem>>, vector<1x768x256xbf16>
    %40 = vector.shape_cast %39 : vector<1x768x256xbf16> to vector<768x256xbf16>
    %cst_23 = arith.constant dense<0.000000e+00> : vector<16x16x256xf32>
    %41 = tpu.matmul %38, %40, %cst_23 {dimension_numbers = #tpu.dot_dimension_numbers<[2], [0], [0, 1], [1], [0, 0, 0, 1, 1, 1], [], []>} : vector<16x16x768xbf16>, vector<768x256xbf16>, vector<16x16x256xf32> -> vector<16x16x256xf32>
    %c0_24 = arith.constant 0 : index
    %c0_25 = arith.constant 0 : index
    %42 = vector.load %arg7[%c0_24, %c0_25] : memref<1x256xf32, #tpu.memory_space<vmem>>, vector<1x256xf32>
    %43 = vector.shape_cast %42 : vector<1x256xf32> to vector<1x1x256xf32>
    %44 = vector.broadcast %43 : vector<1x1x256xf32> to vector<16x16x256xf32>
    %45 = arith.addf %41, %44 : vector<16x16x256xf32>
    %cst_26 = arith.constant 0.000000e+00 : f32
    %46 = vector.broadcast %cst_26 : f32 to vector<16x16x256xf32>
    %47 = arith.cmpf oge, %45, %46 : vector<16x16x256xf32>
    %cst_27 = arith.constant 2.000000e-01 : f32
    %48 = vector.broadcast %cst_27 : f32 to vector<16x16x256xf32>
    %49 = arith.mulf %48, %45 : vector<16x16x256xf32>
    %50 = arith.select %47, %45, %49 : vector<16x16x256xi1>, vector<16x16x256xf32>
    %c0_28 = arith.constant 0 : index
    %c0_29 = arith.constant 0 : index
    %c0_30 = arith.constant 0 : index
    %c0_31 = arith.constant 0 : index
    %c0_32 = arith.constant 0 : index
    %51 = vector.load %arg8[%c0_28, %c0_29, %c0_30, %c0_31, %c0_32] : memref<1x16x2x16x256xf32, #tpu.memory_space<vmem>>, vector<1x16x1x16x256xf32>
    %52 = vector.shape_cast %51 : vector<1x16x1x16x256xf32> to vector<16x16x256xf32>
    %53 = vector.shape_cast %50 : vector<16x16x256xf32> to vector<1x16x1x16x256xf32>
    tpu.vector_store %arg8[%c0_28, %c0_29, %c0_30, %c0_31, %c0_32], %53 {strides = array<i32>} : memref<1x16x2x16x256xf32, #tpu.memory_space<vmem>>, vector<1x16x1x16x256xf32>,
    %54 = vector.extract_strided_slice %29 {offsets = [1, 0, 0], sizes = [16, 16, 128], strides = [1, 1, 1]} : vector<18x16x128xbf16> to vector<16x16x128xbf16>
    %55 = vector.extract_strided_slice %30 {offsets = [1, 0, 0], sizes = [16, 16, 128], strides = [1, 1, 1]} : vector<18x16x128xbf16> to vector<16x16x128xbf16>
    %56 = vector.extract_strided_slice %31 {offsets = [1, 0, 0], sizes = [16, 16, 128], strides = [1, 1, 1]} : vector<18x16x128xbf16> to vector<16x16x128xbf16>
    %57 = vector.extract_strided_slice %29 {offsets = [2, 0, 0], sizes = [16, 16, 128], strides = [1, 1, 1]} : vector<18x16x128xbf16> to vector<16x16x128xbf16>
    %58 = vector.extract_strided_slice %30 {offsets = [2, 0, 0], sizes = [16, 16, 128], strides = [1, 1, 1]} : vector<18x16x128xbf16> to vector<16x16x128xbf16>
    %59 = vector.extract_strided_slice %31 {offsets = [2, 0, 0], sizes = [16, 16, 128], strides = [1, 1, 1]} : vector<18x16x128xbf16> to vector<16x16x128xbf16>
    %60 = tpu.concatenate %54, %55, %56, %57, %58, %59 in 2 : vector<16x16x128xbf16>, vector<16x16x128xbf16>, vector<16x16x128xbf16>, vector<16x16x128xbf16>, vector<16x16x128xbf16>, vector<16x16x128xbf16> -> vector<16x16x768xbf16>
    %c1 = arith.constant 1 : index
    %c0_33 = arith.constant 0 : index
    %c0_34 = arith.constant 0 : index
    %61 = vector.load %arg6[%c1, %c0_33, %c0_34] : memref<2x768x256xbf16, #tpu.memory_space<vmem>>, vector<1x768x256xbf16>
    %62 = vector.shape_cast %61 : vector<1x768x256xbf16> to vector<768x256xbf16>
    %cst_35 = arith.constant dense<0.000000e+00> : vector<16x16x256xf32>
    %63 = tpu.matmul %60, %62, %cst_35 {dimension_numbers = #tpu.dot_dimension_numbers<[2], [0], [0, 1], [1], [0, 0, 0, 1, 1, 1], [], []>} : vector<16x16x768xbf16>, vector<768x256xbf16>, vector<16x16x256xf32> -> vector<16x16x256xf32>
    %c0_36 = arith.constant 0 : index
    %c0_37 = arith.constant 0 : index
    %64 = vector.load %arg7[%c0_36, %c0_37] : memref<1x256xf32, #tpu.memory_space<vmem>>, vector<1x256xf32>
    %65 = vector.shape_cast %64 : vector<1x256xf32> to vector<1x1x256xf32>
    %66 = vector.broadcast %65 : vector<1x1x256xf32> to vector<16x16x256xf32>
    %67 = arith.addf %63, %66 : vector<16x16x256xf32>
    %cst_38 = arith.constant 0.000000e+00 : f32
    %68 = vector.broadcast %cst_38 : f32 to vector<16x16x256xf32>
    %69 = arith.cmpf oge, %67, %68 : vector<16x16x256xf32>
    %cst_39 = arith.constant 2.000000e-01 : f32
    %70 = vector.broadcast %cst_39 : f32 to vector<16x16x256xf32>
    %71 = arith.mulf %70, %67 : vector<16x16x256xf32>
    %72 = arith.select %69, %67, %71 : vector<16x16x256xi1>, vector<16x16x256xf32>
    %c0_40 = arith.constant 0 : index
    %c0_41 = arith.constant 0 : index
    %c1_42 = arith.constant 1 : index
    %c0_43 = arith.constant 0 : index
    %c0_44 = arith.constant 0 : index
    %73 = vector.load %arg8[%c0_40, %c0_41, %c1_42, %c0_43, %c0_44] : memref<1x16x2x16x256xf32, #tpu.memory_space<vmem>>, vector<1x16x1x16x256xf32>
    %74 = vector.shape_cast %73 : vector<1x16x1x16x256xf32> to vector<16x16x256xf32>
    %75 = vector.shape_cast %72 : vector<16x16x256xf32> to vector<1x16x1x16x256xf32>
    tpu.vector_store %arg8[%c0_40, %c0_41, %c1_42, %c0_43, %c0_44], %75 {strides = array<i32>} : memref<1x16x2x16x256xf32, #tpu.memory_space<vmem>>, vector<1x16x1x16x256xf32>,
    return
  }
  func.func @transform_0(%arg0: i32, %arg1: i32) -> (i32, i32, i32, i32) {
    %c0_i32 = arith.constant 0 : i32
    %c0_i32_0 = arith.constant 0 : i32
    %c0_i32_1 = arith.constant 0 : i32
    return %arg0, %arg1, %c0_i32, %c0_i32_0 : i32, i32, i32, i32
  }
  func.func @transform_1(%arg0: i32, %arg1: i32) -> (i32, i32, i32, i32) {
    %c1_i32 = arith.constant 1 : i32
    %0 = arith.addi %arg1, %c1_i32 : i32
    %c8_i32 = arith.constant 8 : i32
    %1 = arith.muli %0, %c8_i32 : i32
    %c0_i32 = arith.constant 0 : i32
    %c0_i32_0 = arith.constant 0 : i32
    %c0_i32_1 = arith.constant 0 : i32
    return %arg0, %1, %c0_i32, %c0_i32_0 : i32, i32, i32, i32
  }
  func.func @transform_2(%arg0: i32, %arg1: i32) -> (i32, i32) {
    %c0_i32 = arith.constant 0 : i32
    %c0_i32_0 = arith.constant 0 : i32
    %c0_i32_1 = arith.constant 0 : i32
    return %c0_i32, %c0_i32_0 : i32, i32
  }
  func.func @transform_3(%arg0: i32, %arg1: i32) -> (i32, i32) {
    %c0_i32 = arith.constant 0 : i32
    %c0_i32_0 = arith.constant 0 : i32
    %c0_i32_1 = arith.constant 0 : i32
    return %c0_i32, %c0_i32_0 : i32, i32
  }
  func.func @transform_4(%arg0: i32, %arg1: i32) -> (i32, i32, i32) {
    %c0_i32 = arith.constant 0 : i32
    %c0_i32_0 = arith.constant 0 : i32
    %c0_i32_1 = arith.constant 0 : i32
    %c0_i32_2 = arith.constant 0 : i32
    return %c0_i32, %c0_i32_0, %c0_i32_1 : i32, i32, i32
  }
  func.func @transform_5(%arg0: i32, %arg1: i32) -> (i32, i32) {
    %c0_i32 = arith.constant 0 : i32
    %c0_i32_0 = arith.constant 0 : i32
    %c0_i32_1 = arith.constant 0 : i32
    return %c0_i32, %c0_i32_0 : i32, i32
  }
  func.func @transform_6(%arg0: i32, %arg1: i32) -> (i32, i32, i32, i32, i32) {
    %c0_i32 = arith.constant 0 : i32
    %c0_i32_0 = arith.constant 0 : i32
    %c0_i32_1 = arith.constant 0 : i32
    %c0_i32_2 = arith.constant 0 : i32
    return %arg0, %arg1, %c0_i32, %c0_i32_0, %c0_i32_1 : i32, i32, i32, i32, i32
  }
}

</mosaic_0001>

<bundles_post_ra>
// kernel: up_conv_block.1
= control target key start
LH: loop header
LB: loop body
LE: loop exit
PB: predicated region body
PF: predicated region fallthrough
CT: control target
= control target key end

     0   :  { %s10004_s21 = smov 0   ;;  %s10006_s22 = smov 0   ;;  %s12425_s0 = inlined_call_operand.vmem [shape: bf16[2,18,18,128], index: 0, kind: input, shape index: {}, may-alias: {0,1}]   ;;  %s12426_s1 = inlined_call_operand.vmem [shape: bf16[2,18,18,128], index: 1, kind: input, shape index: {}, may-alias: {0,1}]   ;;  %s12427_s2 = inlined_call_operand.vmem [shape: bf16[128,128], index: 2, kind: input, shape index: {}]   ;;  %s12428_s3 = inlined_call_operand.vmem [shape: f32[1,128], index: 3, kind: input, shape index: {}]   ;;  %s12429_s4 = inlined_call_operand.vmem [shape: bf16[2,768,256], index: 4, kind: input, shape index: {}]   ;;  %s12430_s5 = inlined_call_operand.vmem [shape: f32[1,256], index: 5, kind: input, shape index: {}]   ;;  %s12431_s6 = inlined_call_operand.vmem [shape: f32[2,16,2,16,256], index: 6, kind: output, shape index: {}]  }
   0x1   :  { %s10008_s23 = smov 0  }
   0x2 LB: > { %s28_s24 = sadd.s32 1, %s9959_s22  ;;  %p8670_p0 = scmp.ge.s32.totalorder %s9963_s23, 1  ;;  %s9963_s23 = sphi %s10008_s23, %s16_s23   ;;  %s9959_s22 = sphi %s10006_s22, %s12500_s22   ;;  %s9955_s21 = sphi %s10004_s21, %s12499_s21  }
   0x3   : > { %p30_p1 = scmp.ge.s32.totalorder %s28_s24, 2  ;;  %p270_p2 = scmp.lt.s32.totalorder %s9963_s23, 3 }
   0x5   : > { %s12502_s24 = smov (%p30_p1, %s28_s24), 0  ;;  %p271_p3 = pnand %p8670_p0, %p270_p2 }
   0x7   : > { %274 = sbr.rel (%p271_p3) target bundleno = 1026 (0x402), region = 44 }
   0xe   : > { %v9645_v0 = vld [vmem:[%s12427_s2] sm:$0xff]   ;;  %p333_p4 = scmp.lt.s32.totalorder %s9955_s21, 1  ;;  %v9646_v1 = vld [vmem:[%s12427_s2 + $0x8] sm:$0xff]   ;;  %v9965_v2 = vmov 0.0   ;;  %v510_v3 = vlaneseq  ;;  %v9647_v4 = vld [vmem:[%s12427_s2 + $0x10] sm:$0xff]   ;;  %vm9966_vm0 = vmmov 0  }
   0xf   : > { %9150 = vmatprep.subr.bf16.mxu0 %v9645_v0  ;;  %9202 = vmatprep.subr.bf16.mxu1 %v9965_v2  ;;  %v9648_v5 = vld [vmem:[%s12427_s2 + $0x18] sm:$0xff]   ;;  %v9967_v9 = vmov 1966171168   ;;  %v9649_v11 = vld [vmem:[%s12427_s2 + $0x20] sm:$0xff]   ;;  %v9650_v25 = vld [vmem:[%s12427_s2 + $0x28] sm:$0xff]  }
  0x10   : > { %s12504_s21 = smov (!%p333_p4, %s9955_s21), 1  ;;  %9151 = vmatpush3.bf16.msra.mxu0 %v9645_v0  ;;  %9203 = vmatpush3.bf16.msra.mxu1 %v9645_v0  ;;  %v10048_v6 = vshrl.u32 %v510_v3, 7  ;;  %v508_v10 = vunpack.c.l.s4 %v9967_v9  ;;  %v9651_v43 = vld [vmem:[%s12427_s2 + $0x30] sm:$0xff]   ;;  %v9652_v0 = vld [vmem:[%s12427_s2 + $0x38] sm:$0xff]  }
  0x11   : > { %9152 = vmatprep.subr.bf16.mxu0 %v9646_v1  ;;  %s9614_s7 = smul.u32 216, %s12504_s21  ;;  %9204 = vmatprep.subr.bf16.mxu1 %v9965_v2  ;;  %s9112_s17 = sshll.u32 %s12504_s21, 10 }
  0x12   : > { %9218 = vmatprep.mubr.msk.bf16.mxu1 %vm9966_vm0, %v9965_v2  ;;  %12456 = vst [vmem:[#allocation2_spill] sm:$0xff] %v10048_v6  ;;  %v509_v13 = vunpack.c.0.s8 %v508_v10  ;;  %s12153_s26 = scalar_lea.vmem %s12431_s6, %s9112_s17 }
  0x13   : > { %s10044_s12 = scalar_lea.vmem %s12425_s0, %s9614_s7  ;;  %s9111_s27 = sadd.s32 192, %s9614_s7 }
  0x14   : > { %9153 = vmatpush3.bf16.msra.mxu0 %v9646_v1  ;;  %9205 = vmatpush3.bf16.msra.mxu1 %v9646_v1  ;;  %v8676_v7 = vld.sshfl [vmem:[%s10044_s12] sm:$0x33 pattern:$0x75316420]  ;;  %v10060_v18 = vsub.s32 %v509_v13, %v10048_v6  ;;  %s10348_s29 = scalar_lea.vmem %s12426_s1, %s9111_s27 }
  0x15   : > { %9154 = vmatprep.subr.bf16.mxu0 %v9647_v4  ;;  %9206 = vmatprep.subr.bf16.mxu1 %v9965_v2  ;;  %v8677_v8 = vld.sshfl [vmem:[%s10044_s12 + $0x4] sm:$0x33 pattern:$0x75316420]  ;;  %v506_v12 = vcombine.high %v8676_v7, %v8676_v7 }
  0x16   : > { %v530_v14 = vcombine.high %v8677_v8, %v8677_v8  ;;  %v8679_v15 = vld.sshfl [vmem:[%s10044_s12 + $0xc] sm:$0x33 pattern:$0x75316420]  ;;  %v513_v21 = vrot.slane %v8676_v7, %v10060_v18  ;;  %v537_v23 = vrot.slane %v8677_v8, %v10060_v18 }
  0x17   : > { %v8680_v16 = vld.sshfl [vmem:[%s10044_s12 + $0x10] sm:$0x33 pattern:$0x75316420]  ;;  %v568_v17 = vcombine.high %v8679_v15, %v8679_v15  ;;  %v520_v22 = vrot.slane %v506_v12, %v10060_v18  ;;  %v575_v27 = vrot.slane %v8679_v15, %v10060_v18 }
  0x18   : > { %9155 = vmatpush3.bf16.msra.mxu0 %v9647_v4  ;;  %9207 = vmatpush3.bf16.msra.mxu1 %v9647_v4  ;;  %v8678_v19 = vld.sshfl [vmem:[%s10044_s12 + $0x8] sm:$0x1 pattern:$0x75316420]  ;;  %v592_v20 = vcombine.high %v8680_v16, %v8680_v16  ;;  %v544_v24 = vrot.slane %v530_v14, %v10060_v18  ;;  %v599_v29 = vrot.slane %v8680_v16, %v10060_v18 }
  0x19   : > { %9156 = vmatprep.subr.bf16.mxu0 %v9648_v5  ;;  %9208 = vmatprep.subr.bf16.mxu1 %v9965_v2  ;;  %v560_v26 = vrot.slane %v8678_v19, %v10060_v18  ;;  %v582_v28 = vrot.slane %v568_v17, %v10060_v18  ;;  %v1508_v30 = vcombine.low %v513_v21, %v520_v22  ;;  %v8681_v38 = vld.sshfl [vmem:[%s10044_s12 + $0x14] sm:$0x1 pattern:$0x75316420] }
  0x1a   : > { %v8724_v31 = vcombine.high %v513_v21, %v520_v22  ;;  %v1510_v32 = vcombine.low %v537_v23, %v544_v24  ;;  %v8725_v33 = vcombine.high %v537_v23, %v544_v24  ;;  %v583_v34 = vcombine.high %v575_v27, %v575_v27  ;;  %v8682_v48 = vld.sshfl [vmem:[%s10044_s12 + $0x18] sm:$0x33 pattern:$0x75316420]  ;;  %v9655_v24 = vld [vmem:[%s12429_s4 + $0x304] ss:$8 sps:$4 sm:$0xff]  }
  0x1b   : > { %v584_v35 = vcombine.high %v582_v28, %v582_v28  ;;  %v606_v36 = vrot.slane %v592_v20, %v10060_v18  ;;  %v607_v37 = vcombine.high %v599_v29, %v599_v29  ;;  %v1518_v39 = vrot.slane %v1508_v30, %v10060_v18  ;;  %v8683_v51 = vld.sshfl [vmem:[%s10044_s12 + $0x1c] sm:$0x33 pattern:$0x75316420] }
  0x1c   : > { %9157 = vmatpush3.bf16.msra.mxu0 %v9648_v5  ;;  %9209 = vmatpush3.bf16.msra.mxu1 %v9648_v5  ;;  %v1525_v40 = vrot.slane %v8724_v31, %v10060_v18  ;;  %v1532_v41 = vrot.slane %v1510_v32, %v10060_v18  ;;  %v1539_v42 = vrot.slane %v8725_v33, %v10060_v18  ;;  %v8684_v58 = vld.sshfl [vmem:[%s10044_s12 + $0x20] sm:$0x1 pattern:$0x75316420] }
  0x1d   : > { %9158 = vmatprep.subr.bf16.mxu0 %v9649_v11  ;;  %9210 = vmatprep.subr.bf16.mxu1 %v9965_v2  ;;  %v1557_v44 = vcombine.low %v560_v26, %v575_v27  ;;  %v1558_v45 = vcombine.low %v582_v28, %v583_v34  ;;  %v1559_v46 = vcombine.low %v584_v35, %v599_v29  ;;  %v8685_v63 = vld.sshfl [vmem:[%s10044_s12 + $0x24] sm:$0x33 pattern:$0x75316420] }
  0x1e   : > { %v1560_v47 = vcombine.low %v606_v36, %v607_v37  ;;  %v1540_v49 = vcombine.low %v1518_v39, %v1525_v40  ;;  %v1541_v50 = vcombine.low %v1532_v41, %v1539_v42  ;;  %v608_v52 = vcombine.high %v606_v36, %v606_v36  ;;  %v8686_v14 = vld.sshfl [vmem:[%s10044_s12 + $0x28] sm:$0x33 pattern:$0x75316420] }
  0x1f   : > { %v622_v53 = vrot.slane %v8681_v38, %v10060_v18  ;;  %v1567_v54 = vrot.slane %v1557_v44, %v10060_v18  ;;  %v1574_v55 = vrot.slane %v1558_v45, %v10060_v18  ;;  %v1581_v56 = vrot.slane %v1559_v46, %v10060_v18  ;;  %v8687_v29 = vld.sshfl [vmem:[%s10044_s12 + $0x2c] sm:$0x1 pattern:$0x75316420]  ;;  %v9653_v39 = vld [vmem:[%s12429_s4 + $0x300] ss:$8 sps:$4 sm:$0xff]  }
  0x20   : > { %9159 = vmatpush3.bf16.msra.mxu0 %v9649_v11  ;;  %9211 = vmatpush3.bf16.msra.mxu1 %v9649_v11  ;;  %v1588_v57 = vrot.slane %v1560_v47, %v10060_v18  ;;  %v1548_v59 = vrot.slane %v1540_v49, %v10060_v18  ;;  %v1555_v60 = vrot.slane %v1541_v50, %v10060_v18  ;;  %v8688_v34 = vld.sshfl [vmem:[%s10044_s12 + $0x30] sm:$0x33 pattern:$0x75316420]  ;;  %v9658_v44 = vld [vmem:[%s12429_s4 + $0x314] ss:$8 sps:$4 sm:$0xff]  }
  0x21   : > { %9160 = vmatprep.subr.bf16.mxu0 %v9650_v25  ;;  %9212 = vmatprep.subr.bf16.mxu1 %v9965_v2  ;;  %v630_v61 = vcombine.high %v8682_v48, %v8682_v48  ;;  %v637_v62 = vrot.slane %v8682_v48, %v10060_v18  ;;  %v1589_v1 = vcombine.low %v1567_v54, %v1574_v55  ;;  %v9661_v45 = vld [vmem:[%s12429_s4 + $0x4] ss:$8 sps:$4 sm:$0xff]   ;;  %v8689_v50 = vld.sshfl [vmem:[%s10044_s12 + $0x34] sm:$0x33 pattern:$0x75316420] }
  0x22   : > { %v1590_v3 = vcombine.low %v1581_v56, %v1588_v57  ;;  %v654_v4 = vcombine.high %v8683_v51, %v8683_v51  ;;  %v661_v5 = vrot.slane %v8683_v51, %v10060_v18  ;;  %v1556_v7 = vcombine.low %v1548_v59, %v1555_v60  ;;  %v9656_v55 = vld [vmem:[%s12429_s4 + $0x310] ss:$8 sps:$4 sm:$0xff]  }
  0x23   : > { %v644_v8 = vrot.slane %v630_v61, %v10060_v18  ;;  %v1606_v9 = vcombine.low %v608_v52, %v622_v53  ;;  %v684_v10 = vrot.slane %v8684_v58, %v10060_v18  ;;  %v1597_v11 = vrot.slane %v1589_v1, %v10060_v18  ;;  %v8690_v60 = vld.sshfl [vmem:[%s10044_s12 + $0x38] sm:$0x1 pattern:$0x75316420]  ;;  %v9664_v61 = vld [vmem:[%s12429_s4 + $0x324] ss:$8 sps:$4 sm:$0xff]  }
  0x24   : > { %9161 = vmatpush3.bf16.msra.mxu0 %v9650_v25  ;;  %9213 = vmatpush3.bf16.msra.mxu1 %v9650_v25  ;;  %v1604_v12 = vrot.slane %v1590_v3, %v10060_v18  ;;  %v668_v13 = vrot.slane %v654_v4, %v10060_v18  ;;  %v692_v15 = vcombine.high %v8685_v63, %v8685_v63  ;;  %v8691_v1 = vld.sshfl [vmem:[%s10044_s12 + $0x3c] sm:$0x33 pattern:$0x75316420] }
  0x25   : > { %9162 = vmatprep.subr.bf16.mxu0 %v9651_v43  ;;  %9214 = vmatprep.subr.bf16.mxu1 %v9965_v2  ;;  %v1607_v16 = vcombine.low %v637_v62, %v644_v8  ;;  %v8726_v17 = vcombine.high %v637_v62, %v644_v8  ;;  %v1616_v19 = vrot.slane %v1606_v9, %v10060_v18 }
  0x26   : > { %9166 = vmatprep.mubr.bf16.mxu0 %v1556_v7  ;;  %v1605_v20 = vcombine.low %v1597_v11, %v1604_v12  ;;  %v1609_v21 = vcombine.low %v661_v5, %v668_v13  ;;  %v699_v22 = vrot.slane %v8685_v63, %v10060_v18  ;;  %v706_v23 = vrot.slane %v692_v15, %v10060_v18 }
  0x27   : > { %v1623_v25 = vrot.slane %v1607_v16, %v10060_v18  ;;  %v1630_v26 = vrot.slane %v8726_v17, %v10060_v18  ;;  %v723_v27 = vrot.slane %v8686_v14, %v10060_v18  ;;  %v8727_v28 = vcombine.high %v661_v5, %v668_v13  ;;  %v8692_v13 = vld.sshfl [vmem:[%s10044_s12 + $0x40] sm:$0x33 pattern:$0x75316420] }
  0x28   : > { %9163 = vmatpush3.bf16.msra.mxu0 %v9651_v43  ;;  %9215 = vmatpush3.bf16.msra.mxu1 %v9651_v43  ;;  %v1637_v30 = vrot.slane %v1609_v21, %v10060_v18  ;;  %v707_v31 = vcombine.high %v699_v22, %v699_v22  ;;  %v708_v32 = vcombine.high %v706_v23, %v706_v23 }
  0x29   : > { %9164 = vmatprep.subr.bf16.mxu0 %v9652_v0  ;;  %v1656_v33 = vcombine.low %v684_v10, %v699_v22  ;;  %9216 = vmatprep.subr.bf16.mxu1 %v9965_v2  ;;  %v1638_v35 = vcombine.low %v1616_v19, %v1623_v25  ;;  %v1665_v36 = vrot.slane %v8727_v28, %v10060_v18  ;;  %v9662_v19 = vld [vmem:[%s12429_s4 + $0x320] ss:$8 sps:$4 sm:$0xff]   ;;  %v8693_v28 = vld.sshfl [vmem:[%s10044_s12 + $0x44] sm:$0x1 pattern:$0x75316420] }
  0x2a   : > { %v716_v37 = vcombine.high %v8686_v14, %v8686_v14  ;;  %v731_v38 = vcombine.high %v723_v27, %v723_v27  ;;  %v1639_v40 = vcombine.low %v1630_v26, %v1637_v30  ;;  %v1657_v41 = vcombine.low %v706_v23, %v707_v31 }
  0x2b   : > { %v1658_v42 = vcombine.low %v708_v32, %v723_v27  ;;  %v1672_v43 = vrot.slane %v1656_v33, %v10060_v18  ;;  %v1646_v46 = vrot.slane %v1638_v35, %v10060_v18  ;;  %v746_v48 = vrot.slane %v8687_v29, %v10060_v18 }
  0x2c   : > { %9165 = vmatpush3.bf16.msra.mxu0 %v9652_v0  ;;  %v730_v47 = vrot.slane %v716_v37, %v10060_v18  ;;  %v754_v49 = vcombine.high %v8688_v34, %v8688_v34  ;;  %9217 = vmatpush3.bf16.msra.mxu1 %v9652_v0  ;;  %v1653_v51 = vrot.slane %v1639_v40, %v10060_v18 }
  0x2d   : > { %7713 = vmatprep.subr.bf16.mxu0 %v9655_v24  ;;  %v1679_v52 = vrot.slane %v1657_v41, %v10060_v18  ;;  %v1686_v53 = vrot.slane %v1658_v42, %v10060_v18  ;;  %v1687_v54 = vcombine.low %v1665_v36, %v1672_v43  ;;  %v761_v57 = vrot.slane %v8688_v34, %v10060_v18  ;;  %v9670_v24 = vld [vmem:[%s12429_s4 + $0x334] ss:$8 sps:$4 sm:$0xff]   ;;  %v8694_v34 = vld.sshfl [vmem:[%s10044_s12 + $0x48] sm:$0x33 pattern:$0x75316420] }
  0x2e   : > { %v732_v56 = vcombine.high %v730_v47, %v730_v47  ;;  %v768_v58 = vrot.slane %v754_v49, %v10060_v18  ;;  %v1704_v59 = vcombine.low %v730_v47, %v731_v38  ;;  %v1654_v62 = vcombine.low %v1646_v46, %v1653_v51  ;;  %6270 = vmatprep.subr.bf16.mxu1 %v9661_v45  ;;  %v9668_v45 = vld [vmem:[%s12429_s4 + $0x330] ss:$8 sps:$4 sm:$0xff]  }
  0x2f   : > { %9167 = vmatmul.mubr.bf16.vlgmr.msra.gmra.mrb[0].mxu0 %v1605_v20  ;;  %v1688_v63 = vcombine.low %v1679_v52, %v1686_v53  ;;  %v1695_v0 = vrot.slane %v1687_v54, %v10060_v18  ;;  %v778_v3 = vcombine.high %v8689_v50, %v8689_v50  ;;  %v785_v10 = vrot.slane %v8689_v50, %v10060_v18  ;;  %v9676_v50 = vld [vmem:[%s12429_s4 + $0x344] ss:$8 sps:$4 sm:$0xff]  }
  0x30   : > { %7714 = vmatpush1.bf16.msra.mxu0 %v9653_v39  ;;  %v1705_v4 = vcombine.low %v732_v56, %v746_v48  ;;  %v1706_v5 = vcombine.low %v761_v57, %v768_v58  ;;  %v8728_v7 = vcombine.high %v761_v57, %v768_v58  ;;  %v1714_v8 = vrot.slane %v1704_v59, %v10060_v18  ;;  %v8695_v39 = vld.sshfl [vmem:[%s10044_s12 + $0x4c] sm:$0x33 pattern:$0x75316420] }
  0x31   : > { %7715 = vmatprep.subr.bf16.mxu0 %v9658_v44  ;;  %9170 = vmatprep.mubr.bf16.mxu0 %v1654_v62  ;;  %v1702_v9 = vrot.slane %v1688_v63, %v10060_v18  ;;  %v792_v11 = vrot.slane %v778_v3, %v10060_v18  ;;  %v808_v12 = vrot.slane %v8690_v60, %v10060_v18  ;;  %v8696_v44 = vld.sshfl [vmem:[%s10044_s12 + $0x50] sm:$0x1 pattern:$0x75316420] }
  0x32   : > { %v1721_v14 = vrot.slane %v1705_v4, %v10060_v18  ;;  %v1728_v15 = vrot.slane %v1706_v5, %v10060_v18  ;;  %v1735_v16 = vrot.slane %v8728_v7, %v10060_v18  ;;  %v816_v17 = vcombine.high %v8691_v1, %v8691_v1  ;;  %v8697_v58 = vld.sshfl [vmem:[%s10044_s12 + $0x54] sm:$0x33 pattern:$0x75316420] }
  0x33   : > { %v1703_v20 = vcombine.low %v1695_v0, %v1702_v9  ;;  %v823_v21 = vrot.slane %v8691_v1, %v10060_v18  ;;  %v1753_v22 = vcombine.low %v785_v10, %v792_v11  ;;  %v8729_v23 = vcombine.high %v785_v10, %v792_v11  ;;  %v9674_v0 = vld [vmem:[%s12429_s4 + $0x340] ss:$8 sps:$4 sm:$0xff]   ;;  %v9685_v7 = vld [vmem:[%s12429_s4 + $0x354] ss:$8 sps:$4 sm:$0xff]  }
  0x34   : > { %7716 = vmatpush1.bf16.msra.mxu0 %v9656_v55  ;;  %v1736_v25 = vcombine.low %v1714_v8, %v1721_v14  ;;  %v1737_v26 = vcombine.low %v1728_v15, %v1735_v16  ;;  %v830_v27 = vrot.slane %v816_v17, %v10060_v18  ;;  %v840_v29 = vcombine.high %v8692_v13, %v8692_v13  ;;  %v8698_v16 = vld.sshfl [vmem:[%s10044_s12 + $0x58] sm:$0x33 pattern:$0x75316420] }
  0x35   : > { %7717 = vmatprep.subr.bf16.mxu0 %v9664_v61  ;;  %v831_v30 = vcombine.high %v823_v21, %v823_v21  ;;  %v1755_v31 = vcombine.low %v808_v12, %v823_v21  ;;  %v1763_v32 = vrot.slane %v1753_v22, %v10060_v18  ;;  %v1770_v33 = vrot.slane %v8729_v23, %v10060_v18  ;;  %v8699_v21 = vld.sshfl [vmem:[%s10044_s12 + $0x5c] sm:$0x1 pattern:$0x75316420]  ;;  %v9683_v23 = vld [vmem:[%s12429_s4 + $0x350] ss:$8 sps:$4 sm:$0xff]  }
  0x36   : > { %v1744_v35 = vrot.slane %v1736_v25, %v10060_v18  ;;  %v1751_v36 = vrot.slane %v1737_v26, %v10060_v18  ;;  %v832_v37 = vcombine.high %v830_v27, %v830_v27  ;;  %v847_v38 = vrot.slane %v8692_v13, %v10060_v18 }
  0x37   : > { %9171 = vmatmul.mubr.bf16.gmra.mrb[4].mxu0 %v1703_v20  ;;  %v1756_v40 = vcombine.low %v830_v27, %v831_v30  ;;  %v1777_v41 = vrot.slane %v1755_v31, %v10060_v18  ;;  %v1785_v42 = vcombine.low %v1763_v32, %v1770_v33  ;;  %v854_v43 = vrot.slane %v840_v29, %v10060_v18  ;;  %v8700_v33 = vld.sshfl [vmem:[%s10044_s12 + $0x60] sm:$0x33 pattern:$0x75316420] }
  0x38   : > { %7718 = vmatpush1.bf16.msra.mxu0 %v9662_v19  ;;  %v1752_v46 = vcombine.low %v1744_v35, %v1751_v36  ;;  %v855_v47 = vcombine.high %v847_v38, %v847_v38  ;;  %v870_v48 = vrot.slane %v8693_v28, %v10060_v18  ;;  %v878_v49 = vcombine.high %v8694_v34, %v8694_v34  ;;  %v9691_v28 = vld [vmem:[%s12429_s4 + $0x364] ss:$8 sps:$4 sm:$0xff]  }
  0x39   : > { %7719 = vmatprep.subr.bf16.mxu0 %v9670_v24  ;;  %v1784_v51 = vrot.slane %v1756_v40, %v10060_v18  ;;  %v1793_v52 = vrot.slane %v1785_v42, %v10060_v18  ;;  %v856_v53 = vcombine.high %v854_v43, %v854_v43  ;;  %v885_v54 = vrot.slane %v8694_v34, %v10060_v18  ;;  %v8701_v42 = vld.sshfl [vmem:[%s10044_s12 + $0x64] sm:$0x33 pattern:$0x75316420] }
  0x3a   : > { %9174 = vmatprep.mubr.bf16.mxu0 %v1752_v46  ;;  %v892_v55 = vrot.slane %v878_v49, %v10060_v18  ;;  %v1802_v56 = vcombine.low %v832_v37, %v847_v38  ;;  %v1803_v57 = vcombine.low %v854_v43, %v855_v47  ;;  %v902_v59 = vcombine.high %v8695_v39, %v8695_v39  ;;  %v9689_v43 = vld [vmem:[%s12429_s4 + $0x360] ss:$8 sps:$4 sm:$0xff]  }
  0x3b   : > { %v1786_v60 = vcombine.low %v1777_v41, %v1784_v51  ;;  %v1804_v61 = vcombine.low %v856_v53, %v870_v48  ;;  %v909_v62 = vrot.slane %v8695_v39, %v10060_v18  ;;  %v932_v63 = vrot.slane %v8696_v44, %v10060_v18  ;;  %v9697_v48 = vld [vmem:[%s12429_s4 + $0x374] ss:$8 sps:$4 sm:$0xff]   ;;  %v8702_v53 = vld.sshfl [vmem:[%s10044_s12 + $0x68] sm:$0x1 pattern:$0x75316420] }
  0x3c   : > { %7720 = vmatpush1.bf16.msra.mxu0 %v9668_v45  ;;  %v1805_v1 = vcombine.low %v885_v54, %v892_v55  ;;  %v1812_v3 = vrot.slane %v1802_v56, %v10060_v18  ;;  %v1819_v4 = vrot.slane %v1803_v57, %v10060_v18  ;;  %v916_v5 = vrot.slane %v902_v59, %v10060_v18 }
  0x3d   : > { %7721 = vmatprep.subr.bf16.mxu0 %v9676_v50  ;;  %v1800_v8 = vrot.slane %v1786_v60, %v10060_v18  ;;  %v1826_v9 = vrot.slane %v1804_v61, %v10060_v18  ;;  %v947_v10 = vrot.slane %v8697_v58, %v10060_v18  ;;  %v8730_v11 = vcombine.high %v885_v54, %v892_v55 }
  0x3e   : > { %v1833_v12 = vrot.slane %v1805_v1, %v10060_v18  ;;  %v1834_v13 = vcombine.low %v1812_v3, %v1819_v4  ;;  %v1852_v14 = vcombine.low %v909_v62, %v916_v5  ;;  %v8731_v15 = vcombine.high %v909_v62, %v916_v5  ;;  %v8704_v5 = vld.sshfl [vmem:[%s10044_s12 + $0x70] sm:$0x33 pattern:$0x75316420] }
  0x3f   : > { %v1801_v17 = vcombine.low %v1793_v52, %v1800_v8  ;;  %v1854_v19 = vcombine.low %v932_v63, %v947_v10  ;;  %v1861_v20 = vrot.slane %v8730_v11, %v10060_v18  ;;  %v940_v22 = vcombine.high %v8697_v58, %v8697_v58  ;;  %v8703_v58 = vld.sshfl [vmem:[%s10044_s12 + $0x6c] sm:$0x33 pattern:$0x75316420]  ;;  %v9695_v63 = vld [vmem:[%s12429_s4 + $0x370] ss:$8 sps:$4 sm:$0xff]  }
  0x40   : > { %7722 = vmatpush1.bf16.msra.mxu0 %v9674_v0  ;;  %v1835_v24 = vcombine.low %v1826_v9, %v1833_v12  ;;  %v1842_v25 = vrot.slane %v1834_v13, %v10060_v18  ;;  %v1868_v26 = vrot.slane %v1852_v14, %v10060_v18  ;;  %v1875_v27 = vrot.slane %v8731_v15, %v10060_v18  ;;  %v9701_v12 = vld [vmem:[%s12429_s4 + $0x380] ss:$8 sps:$4 sm:$0xff]  }
  0x41   : > { %7723 = vmatprep.subr.bf16.mxu0 %v9685_v7  ;;  %9175 = vmatmul.mubr.bf16.gmra.mrb[8].mxu0 %v1801_v17  ;;  %v1882_v29 = vrot.slane %v1854_v19, %v10060_v18  ;;  %v954_v30 = vrot.slane %v940_v22, %v10060_v18  ;;  %v955_v31 = vcombine.high %v947_v10, %v947_v10  ;;  %v9703_v7 = vld [vmem:[%s12429_s4 + $0x384] ss:$8 sps:$4 sm:$0xff]   ;;  %v8705_v22 = vld.sshfl [vmem:[%s10044_s12 + $0x74] sm:$0x1 pattern:$0x75316420] }
  0x42   : > { %v964_v32 = vcombine.high %v8698_v16, %v8698_v16  ;;  %v1849_v34 = vrot.slane %v1835_v24, %v10060_v18  ;;  %v1883_v35 = vcombine.low %v1861_v20, %v1868_v26  ;;  %v971_v36 = vrot.slane %v8698_v16, %v10060_v18 }
  0x43   : > { %v994_v37 = vrot.slane %v8699_v21, %v10060_v18  ;;  %v1884_v38 = vcombine.low %v1875_v27, %v1882_v29  ;;  %v956_v39 = vcombine.high %v954_v30, %v954_v30  ;;  %v1900_v41 = vcombine.low %v954_v30, %v955_v31  ;;  %v8706_v27 = vld.sshfl [vmem:[%s10044_s12 + $0x78] sm:$0x33 pattern:$0x75316420] }
  0x44   : > { %v978_v40 = vrot.slane %v964_v32, %v10060_v18  ;;  %7724 = vmatpush1.bf16.msra.mxu0 %v9683_v23  ;;  %v1850_v44 = vcombine.low %v1842_v25, %v1849_v34  ;;  %v1891_v45 = vrot.slane %v1883_v35, %v10060_v18  ;;  %v979_v46 = vcombine.high %v971_v36, %v971_v36  ;;  %v8707_v32 = vld.sshfl [vmem:[%s10044_s12 + $0x7c] sm:$0x33 pattern:$0x75316420] }
  0x45   : > { %v1002_v47 = vcombine.high %v8700_v33, %v8700_v33  ;;  %7725 = vmatprep.subr.bf16.mxu0 %v9691_v28  ;;  %v1898_v49 = vrot.slane %v1884_v38, %v10060_v18  ;;  %v1901_v51 = vcombine.low %v956_v39, %v971_v36  ;;  %v1910_v52 = vrot.slane %v1900_v41, %v10060_v18  ;;  %v8708_v41 = vld.sshfl [vmem:[%s10044_s12 + $0x80] sm:$0x1 pattern:$0x75316420] }
  0x46   : > { %v980_v50 = vcombine.high %v978_v40, %v978_v40  ;;  %9178 = vmatprep.mubr.bf16.mxu0 %v1850_v44  ;;  %v1902_v54 = vcombine.low %v978_v40, %v979_v46  ;;  %v1009_v55 = vrot.slane %v8700_v33, %v10060_v18  ;;  %v1026_v57 = vcombine.high %v8701_v42, %v8701_v42 }
  0x47   : > { %v1016_v56 = vrot.slane %v1002_v47, %v10060_v18  ;;  %v1899_v59 = vcombine.low %v1891_v45, %v1898_v49  ;;  %v1917_v61 = vrot.slane %v1901_v51, %v10060_v18  ;;  %v1033_v62 = vrot.slane %v8701_v42, %v10060_v18  ;;  %v8709_v42 = vld.sshfl [vmem:[%s10044_s12 + $0x84] sm:$0x33 pattern:$0x75316420] }
  0x48   : > { %v1903_v60 = vcombine.low %v980_v50, %v994_v37  ;;  %7726 = vmatpush1.bf16.msra.mxu0 %v9689_v43  ;;  %v1924_v0 = vrot.slane %v1902_v54, %v10060_v18  ;;  %v1040_v1 = vrot.slane %v1026_v57, %v10060_v18  ;;  %v1056_v10 = vrot.slane %v8702_v53, %v10060_v18 }
  0x49   : > { %v1949_v3 = vcombine.low %v1009_v55, %v1016_v56  ;;  %v8732_v4 = vcombine.high %v1009_v55, %v1016_v56  ;;  %7727 = vmatprep.subr.bf16.mxu0 %v9697_v48  ;;  %9179 = vmatmul.mubr.bf16.gmra.mrb[12].mxu0 %v1899_v59  ;;  %v1932_v9 = vcombine.low %v1910_v52, %v1917_v61 }
  0x4a   : > { %v1931_v8 = vrot.slane %v1903_v60, %v10060_v18  ;;  %v1064_v11 = vcombine.high %v8703_v58, %v8703_v58  ;;  %v1951_v13 = vcombine.low %v1033_v62, %v1040_v1  ;;  %v8733_v14 = vcombine.high %v1033_v62, %v1040_v1  ;;  %v8710_v60 = vld.sshfl [vmem:[%s10044_s12 + $0x88] sm:$0x33 pattern:$0x75316420] }
  0x4b   : > { %v1959_v15 = vrot.slane %v1949_v3, %v10060_v18  ;;  %v1966_v16 = vrot.slane %v8732_v4, %v10060_v18  ;;  %v1940_v19 = vrot.slane %v1932_v9, %v10060_v18  ;;  %v1071_v20 = vrot.slane %v8703_v58, %v10060_v18 }
  0x4c   : > { %v1933_v17 = vcombine.low %v1924_v0, %v1931_v8  ;;  %v1078_v21 = vrot.slane %v1064_v11, %v10060_v18  ;;  %7728 = vmatpush1.bf16.msra.mxu0 %v9695_v63  ;;  %v1973_v23 = vrot.slane %v1951_v13, %v10060_v18  ;;  %v1980_v24 = vrot.slane %v8733_v14, %v10060_v18  ;;  %v8711_v14 = vld.sshfl [vmem:[%s10044_s12 + $0x8c] sm:$0x1 pattern:$0x75316420] }
  0x4d   : > { %v1981_v25 = vcombine.low %v1959_v15, %v1966_v16  ;;  %v1088_v26 = vcombine.high %v8704_v5, %v8704_v5  ;;  %7729 = vmatprep.subr.bf16.mxu0 %v9703_v7  ;;  %v1079_v29 = vcombine.high %v1071_v20, %v1071_v20  ;;  %v1095_v31 = vrot.slane %v8704_v5, %v10060_v18 }
  0x4e   : > { %v1947_v28 = vrot.slane %v1933_v17, %v10060_v18  ;;  %v1080_v30 = vcombine.high %v1078_v21, %v1078_v21  ;;  %v1982_v33 = vcombine.low %v1973_v23, %v1980_v24  ;;  %v1998_v36 = vcombine.low %v1056_v10, %v1071_v20  ;;  %v8712_v20 = vld.sshfl [vmem:[%s10044_s12 + $0x90] sm:$0x33 pattern:$0x75316420] }
  0x4f   : > { %v1989_v34 = vrot.slane %v1981_v25, %v10060_v18  ;;  %v1102_v35 = vrot.slane %v1088_v26, %v10060_v18  ;;  %v1103_v38 = vcombine.high %v1095_v31, %v1095_v31  ;;  %v1999_v39 = vcombine.low %v1078_v21, %v1079_v29  ;;  %v8713_v25 = vld.sshfl [vmem:[%s10044_s12 + $0x94] sm:$0x33 pattern:$0x75316420] }
  0x50   : > { %v1948_v37 = vcombine.low %v1940_v19, %v1947_v28  ;;  %v2000_v40 = vcombine.low %v1080_v30, %v1095_v31  ;;  %7730 = vmatpush1.bf16.msra.mxu0 %v9701_v12  ;;  %v1996_v43 = vrot.slane %v1982_v33, %v10060_v18  ;;  %v2008_v44 = vrot.slane %v1998_v36, %v10060_v18 }
  0x51   : > { %v1104_v45 = vcombine.high %v1102_v35, %v1102_v35  ;;  %v1118_v46 = vrot.slane %v8705_v22, %v10060_v18  ;;  %v2001_v47 = vcombine.low %v1102_v35, %v1103_v38  ;;  %v2015_v48 = vrot.slane %v1999_v39, %v10060_v18  ;;  %v8715_v35 = vld.sshfl [vmem:[%s10044_s12 + $0x9c] sm:$0x33 pattern:$0x75316420] }
  0x52   : > { %9182 = vmatprep.mubr.bf16.mxu0 %v1948_v37  ;;  %v2022_v49 = vrot.slane %v2000_v40, %v10060_v18  ;;  %v1126_v50 = vcombine.high %v8706_v27, %v8706_v27  ;;  %v1997_v51 = vcombine.low %v1989_v34, %v1996_v43  ;;  %v1133_v52 = vrot.slane %v8706_v27, %v10060_v18  ;;  %v8714_v34 = vld.sshfl [vmem:[%s10044_s12 + $0x98] sm:$0x1 pattern:$0x75316420] }
  0x53   : > { %v1150_v53 = vcombine.high %v8707_v32, %v8707_v32  ;;  %v1157_v54 = vrot.slane %v8707_v32, %v10060_v18  ;;  %v2029_v55 = vrot.slane %v2001_v47, %v10060_v18  ;;  %v2030_v56 = vcombine.low %v2008_v44, %v2015_v48 }
  0x54   : > { %v1140_v57 = vrot.slane %v1126_v50, %v10060_v18  ;;  %v2047_v58 = vcombine.low %v1104_v45, %v1118_v46  ;;  %9183 = vmatmul.mubr.bf16.gmra.mrb[16].mxu0 %v1997_v51  ;;  %v1180_v61 = vrot.slane %v8708_v41, %v10060_v18  ;;  %v1188_v62 = vcombine.high %v8709_v42, %v8709_v42 }
  0x55   : > { %v1164_v59 = vrot.slane %v1150_v53, %v10060_v18  ;;  %v1195_v63 = vrot.slane %v8709_v42, %v10060_v18  ;;  %v2031_v0 = vcombine.low %v2022_v49, %v2029_v55  ;;  %v2038_v1 = vrot.slane %v2030_v56, %v10060_v18  ;;  %v8716_v56 = vld.sshfl [vmem:[%s10044_s12 + $0xa0] sm:$0x33 pattern:$0x75316420] }
  0x56   : > { %v2048_v3 = vcombine.low %v1133_v52, %v1140_v57  ;;  %v8734_v4 = vcombine.high %v1133_v52, %v1140_v57  ;;  %v2057_v7 = vrot.slane %v2047_v58, %v10060_v18  ;;  %v1202_v8 = vrot.slane %v1188_v62, %v10060_v18 }
  0x57   : > { %v2050_v5 = vcombine.low %v1157_v54, %v1164_v59  ;;  %v1203_v9 = vcombine.high %v1195_v63, %v1195_v63  ;;  %v2045_v10 = vrot.slane %v2031_v0, %v10060_v18  ;;  %v1219_v13 = vrot.slane %v8710_v60, %v10060_v18 }
  0x58   : > { %v2064_v11 = vrot.slane %v2048_v3, %v10060_v18  ;;  %v2071_v12 = vrot.slane %v8734_v4, %v10060_v18  ;;  %v1204_v16 = vcombine.high %v1202_v8, %v1202_v8  ;;  %v8735_v17 = vcombine.high %v1157_v54, %v1164_v59  ;;  %v8718_v3 = vld.sshfl [vmem:[%s10044_s12 + $0xa8] sm:$0x33 pattern:$0x75316420] }
  0x59   : > { %v2078_v15 = vrot.slane %v2050_v5, %v10060_v18  ;;  %v2097_v19 = vcombine.low %v1180_v61, %v1195_v63  ;;  %v2046_v21 = vcombine.low %v2038_v1, %v2045_v10  ;;  %v2098_v23 = vcombine.low %v1202_v8, %v1203_v9  ;;  %v8717_v61 = vld.sshfl [vmem:[%s10044_s12 + $0xa4] sm:$0x1 pattern:$0x75316420] }
  0x5a   : > { %v2079_v22 = vcombine.low %v2057_v7, %v2064_v11  ;;  %v1212_v24 = vcombine.high %v8710_v60, %v8710_v60  ;;  %v2099_v27 = vcombine.low %v1204_v16, %v1219_v13  ;;  %v2106_v28 = vrot.slane %v8735_v17, %v10060_v18  ;;  %v8719_v17 = vld.sshfl [vmem:[%s10044_s12 + $0xac] sm:$0x33 pattern:$0x75316420] }
  0x5b   : > { %v2080_v26 = vcombine.low %v2071_v12, %v2078_v15  ;;  %v2113_v29 = vrot.slane %v2097_v19, %v10060_v18  ;;  %9186 = vmatprep.mubr.bf16.mxu0 %v2046_v21  ;;  %v2120_v31 = vrot.slane %v2098_v23, %v10060_v18  ;;  %v1227_v33 = vcombine.high %v1219_v13, %v1219_v13  ;;  %v8720_v23 = vld.sshfl [vmem:[%s10044_s12 + $0xb0] sm:$0x1 pattern:$0x75316420] }
  0x5c   : > { %v2087_v30 = vrot.slane %v2079_v22, %v10060_v18  ;;  %v1226_v32 = vrot.slane %v1212_v24, %v10060_v18  ;;  %v2127_v37 = vrot.slane %v2099_v27, %v10060_v18  ;;  %v1242_v39 = vrot.slane %v8711_v14, %v10060_v18 }
  0x5d   : > { %v2094_v36 = vrot.slane %v2080_v26, %v10060_v18  ;;  %v2128_v38 = vcombine.low %v2106_v28, %v2113_v29  ;;  %v1250_v41 = vcombine.high %v8712_v20, %v8712_v20  ;;  %v1257_v42 = vrot.slane %v8712_v20, %v10060_v18 }
  0x5e   : > { %v1228_v40 = vcombine.high %v1226_v32, %v1226_v32  ;;  %v2145_v43 = vcombine.low %v1226_v32, %v1227_v33  ;;  %v2129_v45 = vcombine.low %v2120_v31, %v2127_v37  ;;  %v1274_v47 = vcombine.high %v8713_v25, %v8713_v25  ;;  %v8721_v32 = vld.sshfl [vmem:[%s10044_s12 + $0xb4] sm:$0x33 pattern:$0x75316420] }
  0x5f   : > { %v2095_v44 = vcombine.low %v2087_v30, %v2094_v36  ;;  %v2136_v46 = vrot.slane %v2128_v38, %v10060_v18  ;;  %v1264_v48 = vrot.slane %v1250_v41, %v10060_v18  ;;  %v1281_v51 = vrot.slane %v8713_v25, %v10060_v18 }
  0x60   : > { %v2146_v49 = vcombine.low %v1228_v40, %v1242_v39  ;;  %v2155_v50 = vrot.slane %v2145_v43, %v10060_v18  ;;  %v2143_v52 = vrot.slane %v2129_v45, %v10060_v18  ;;  %v1288_v53 = vrot.slane %v1274_v47, %v10060_v18 }
  0x61   : > { %9187 = vmatmul.mubr.bf16.gmra.mrb[20].mxu0 %v2095_v44  ;;  %v1304_v54 = vrot.slane %v8714_v34, %v10060_v18  ;;  %v1312_v55 = vcombine.high %v8715_v35, %v8715_v35  ;;  %v2147_v57 = vcombine.low %v1257_v42, %v1264_v48  ;;  %v8736_v58 = vcombine.high %v1257_v42, %v1264_v48 }
  0x62   : > { %v2162_v59 = vrot.slane %v2146_v49, %v10060_v18  ;;  %v1319_v60 = vrot.slane %v8715_v35, %v10060_v18  ;;  %v2144_v62 = vcombine.low %v2136_v46, %v2143_v52  ;;  %v2194_v0 = vcombine.low %v1281_v51, %v1288_v53  ;;  %v8722_v49 = vld.sshfl [vmem:[%s10044_s12 + $0xb8] sm:$0x33 pattern:$0x75316420] }
  0x63   : > { %v1326_v63 = vrot.slane %v1312_v55, %v10060_v18  ;;  %v8737_v1 = vcombine.high %v1281_v51, %v1288_v53  ;;  %v2169_v4 = vrot.slane %v2147_v57, %v10060_v18  ;;  %v2176_v5 = vrot.slane %v8736_v58, %v10060_v18  ;;  %v8723_v53 = vld.sshfl [vmem:[%s10044_s12 + $0xbc] sm:$0x1 pattern:$0x75316420] }
  0x64   : > { %v2177_v7 = vcombine.low %v2155_v50, %v2162_v59  ;;  %v1327_v8 = vcombine.high %v1319_v60, %v1319_v60  ;;  %9190 = vmatprep.mubr.bf16.mxu0 %v2144_v62  ;;  %v2196_v9 = vcombine.low %v1304_v54, %v1319_v60  ;;  %v2204_v10 = vrot.slane %v2194_v0, %v10060_v18 }
  0x65   : > { %v2211_v11 = vrot.slane %v8737_v1, %v10060_v18  ;;  %v1328_v12 = vcombine.high %v1326_v63, %v1326_v63  ;;  %v2178_v13 = vcombine.low %v2169_v4, %v2176_v5  ;;  %v1336_v16 = vcombine.high %v8716_v56, %v8716_v56 }
  0x66   : > { %v2185_v14 = vrot.slane %v2177_v7, %v10060_v18  ;;  %v2197_v15 = vcombine.low %v1326_v63, %v1327_v8  ;;  %v2218_v19 = vrot.slane %v2196_v9, %v10060_v18  ;;  %v1343_v21 = vrot.slane %v8716_v56, %v10060_v18  ;;  %v8748_v63 = vld.sshfl [vmem:[%s10348_s29] sm:$0x33 pattern:$0x75316420] }
  0x67   : > { %v2226_v20 = vcombine.low %v2204_v10, %v2211_v11  ;;  %v1366_v22 = vrot.slane %v8717_v61, %v10060_v18  ;;  %v2192_v24 = vrot.slane %v2178_v13, %v10060_v18  ;;  %v1350_v26 = vrot.slane %v1336_v16, %v10060_v18  ;;  %v8749_v10 = vld.sshfl [vmem:[%s10348_s29 + $0x4] sm:$0x33 pattern:$0x75316420] }
  0x68   : > { %v2225_v25 = vrot.slane %v2197_v15, %v10060_v18  ;;  %v1374_v27 = vcombine.high %v8718_v3, %v8718_v3  ;;  %v1351_v29 = vcombine.high %v1343_v21, %v1343_v21  ;;  %v1381_v30 = vrot.slane %v8718_v3, %v10060_v18  ;;  %v8750_v15 = vld.sshfl [vmem:[%s10348_s29 + $0x8] sm:$0x1 pattern:$0x75316420] }
  0x69   : > { %v2234_v28 = vrot.slane %v2226_v20, %v10060_v18  ;;  %v2243_v31 = vcombine.low %v1328_v12, %v1343_v21  ;;  %v2193_v33 = vcombine.low %v2185_v14, %v2192_v24  ;;  %v1352_v35 = vcombine.high %v1350_v26, %v1350_v26  ;;  %v8751_v21 = vld.sshfl [vmem:[%s10348_s29 + $0xc] sm:$0x33 pattern:$0x75316420] }
  0x6a   : > { %v2227_v34 = vcombine.low %v2218_v19, %v2225_v25  ;;  %v1388_v36 = vrot.slane %v1374_v27, %v10060_v18  ;;  %v2244_v37 = vcombine.low %v1350_v26, %v1351_v29  ;;  %v1398_v39 = vcombine.high %v8719_v17, %v8719_v17  ;;  %v8752_v26 = vld.sshfl [vmem:[%s10348_s29 + $0x10] sm:$0x33 pattern:$0x75316420] }
  0x6b   : > { %v2253_v38 = vrot.slane %v2243_v31, %v10060_v18  ;;  %v1405_v40 = vrot.slane %v8719_v17, %v10060_v18  ;;  %9191 = vmatmul.mubr.bf16.gmra.mrb[24].mxu0 %v2193_v33  ;;  %v2245_v42 = vcombine.low %v1352_v35, %v1366_v22  ;;  %v1428_v44 = vrot.slane %v8720_v23, %v10060_v18 }
  0x6c   : > { %v2241_v41 = vrot.slane %v2227_v34, %v10060_v18  ;;  %v2246_v43 = vcombine.low %v1381_v30, %v1388_v36  ;;  %v2260_v45 = vrot.slane %v2244_v37, %v10060_v18  ;;  %v1412_v46 = vrot.slane %v1398_v39, %v10060_v18 }
  0x6d   : > { %v1443_v47 = vrot.slane %v8721_v32, %v10060_v18  ;;  %v8738_v48 = vcombine.high %v1381_v30, %v1388_v36  ;;  %v2267_v51 = vrot.slane %v2245_v42, %v10060_v18  ;;  %v1436_v54 = vcombine.high %v8721_v32, %v8721_v32 }
  0x6e   : > { %v2242_v50 = vcombine.low %v2234_v28, %v2241_v41  ;;  %v2274_v52 = vrot.slane %v2246_v43, %v10060_v18  ;;  %v2275_v55 = vcombine.low %v2253_v38, %v2260_v45  ;;  %v2293_v56 = vcombine.low %v1405_v40, %v1412_v46 }
  0x6f   : > { %v8739_v57 = vcombine.high %v1405_v40, %v1412_v46  ;;  %v2295_v58 = vcombine.low %v1428_v44, %v1443_v47  ;;  %v2302_v60 = vrot.slane %v8738_v48, %v10060_v18  ;;  %v1450_v61 = vrot.slane %v1436_v54, %v10060_v18 }
  0x70   : > { %9194 = vmatprep.mubr.bf16.mxu0 %v2242_v50  ;;  %v2276_v59 = vcombine.low %v2267_v51, %v2274_v52  ;;  %v1451_v62 = vcombine.high %v1443_v47, %v1443_v47  ;;  %v2283_v0 = vrot.slane %v2275_v55, %v10060_v18  ;;  %v2309_v1 = vrot.slane %v2293_v56, %v10060_v18 }
  0x71   : > { %v2316_v3 = vrot.slane %v8739_v57, %v10060_v18  ;;  %v2323_v4 = vrot.slane %v2295_v58, %v10060_v18  ;;  %v1452_v7 = vcombine.high %v1450_v61, %v1450_v61  ;;  %v1460_v8 = vcombine.high %v8722_v49, %v8722_v49 }
  0x72   : > { %v2290_v5 = vrot.slane %v2276_v59, %v10060_v18  ;;  %v1467_v9 = vrot.slane %v8722_v49, %v10060_v18  ;;  %v2324_v11 = vcombine.low %v2302_v60, %v2309_v1  ;;  %v1490_v13 = vrot.slane %v8723_v53, %v10060_v18 }
  0x73   : > { %v2325_v12 = vcombine.low %v2316_v3, %v2323_v4  ;;  %v2341_v14 = vcombine.low %v1450_v61, %v1451_v62  ;;  %v1474_v17 = vrot.slane %v1460_v8, %v10060_v18  ;;  %v4804_v25 = vcombine.high %v8748_v63, %v8748_v63 }
  0x74   : > { %v2291_v16 = vcombine.low %v2283_v0, %v2290_v5  ;;  %v1475_v19 = vcombine.high %v1467_v9, %v1467_v9  ;;  %v2342_v20 = vcombine.low %v1452_v7, %v1467_v9  ;;  %v2332_v22 = vrot.slane %v2324_v11, %v10060_v18 }
  0x75   : > { %v2339_v23 = vrot.slane %v2325_v12, %v10060_v18  ;;  %v2351_v24 = vrot.slane %v2341_v14, %v10060_v18  ;;  %v1476_v27 = vcombine.high %v1474_v17, %v1474_v17  ;;  %v4811_v30 = vrot.slane %v8748_v63, %v10060_v18  ;;  %v8753_v12 = vld.sshfl [vmem:[%s10348_s29 + $0x14] sm:$0x1 pattern:$0x75316420] }
  0x76   : > { %9195 = vmatmul.mubr.bf16.gmra.mrb[28].mxu0 %v2291_v16  ;;  %v2343_v28 = vcombine.low %v1474_v17, %v1475_v19  ;;  %v2358_v29 = vrot.slane %v2342_v20, %v10060_v18  ;;  %v4818_v32 = vrot.slane %v4804_v25, %v10060_v18  ;;  %v4828_v33 = vcombine.high %v8749_v10, %v8749_v10  ;;  %v9667_v16 = vld [vmem:[%s12429_s4 + $0x14] ss:$8 sps:$4 sm:$0xff]  }
  0x77   : > { %v2340_v31 = vcombine.low %v2332_v22, %v2339_v23  ;;  %v4835_v34 = vrot.slane %v8749_v10, %v10060_v18  ;;  %v2344_v35 = vcombine.low %v1476_v27, %v1490_v13  ;;  %v4858_v38 = vrot.slane %v8750_v15, %v10060_v18  ;;  %v9659_v13 = vld [vmem:[%s12429_s4] ss:$8 sps:$4 sm:$0xff]   ;;  %v9665_v23 = vld [vmem:[%s12429_s4 + $0x10] ss:$8 sps:$4 sm:$0xff]  }
  0x78   : > { %v2365_v36 = vrot.slane %v2343_v28, %v10060_v18  ;;  %v2373_v37 = vcombine.low %v2351_v24, %v2358_v29  ;;  %v4842_v39 = vrot.slane %v4828_v33, %v10060_v18  ;;  %v4921_v40 = vcombine.low %v4811_v30, %v4818_v32  ;;  %v9673_v24 = vld [vmem:[%s12429_s4 + $0x24] ss:$8 sps:$4 sm:$0xff]   ;;  %v9671_v27 = vld [vmem:[%s12429_s4 + $0x20] ss:$8 sps:$4 sm:$0xff]   ;;  %v9679_v28 = vld [vmem:[%s12429_s4 + $0x34] ss:$8 sps:$4 sm:$0xff]  }
  0x79   : > { %9198 = vmatprep.mubr.bf16.mxu0 %v2340_v31  ;;  %v8754_v41 = vcombine.high %v4811_v30, %v4818_v32  ;;  %v4866_v42 = vcombine.high %v8751_v21, %v8751_v21  ;;  %v2372_v43 = vrot.slane %v2344_v35, %v10060_v18  ;;  %v4873_v45 = vrot.slane %v8751_v21, %v10060_v18  ;;  %v9709_v29 = vld [vmem:[%s12429_s4 + $0x394] ss:$8 sps:$4 sm:$0xff]   ;;  %v9707_v30 = vld [vmem:[%s12429_s4 + $0x390] ss:$8 sps:$4 sm:$0xff]   ;;  %v9682_v33 = vld [vmem:[%s12429_s4 + $0x44] ss:$8 sps:$4 sm:$0xff]  }
  0x7a   : > { %v2381_v44 = vrot.slane %v2373_v37, %v10060_v18  ;;  %v4890_v46 = vcombine.high %v8752_v26, %v8752_v26  ;;  %v4923_v47 = vcombine.low %v4835_v34, %v4842_v39  ;;  %v8755_v48 = vcombine.high %v4835_v34, %v4842_v39  ;;  %v9677_v32 = vld [vmem:[%s12429_s4 + $0x30] ss:$8 sps:$4 sm:$0xff]   ;;  %7731 = vmatprep.subr.bf16.mxu0 %v9709_v29  ;;  %v9680_v35 = vld [vmem:[%s12429_s4 + $0x40] ss:$8 sps:$4 sm:$0xff]  }
  0x7b   : > { %v4931_v49 = vrot.slane %v4921_v40, %v10060_v18  ;;  %v4938_v50 = vrot.slane %v8754_v41, %v10060_v18  ;;  %v2374_v51 = vcombine.low %v2365_v36, %v2372_v43  ;;  %v4880_v52 = vrot.slane %v4866_v42, %v10060_v18  ;;  %7732 = vmatpush1.bf16.msra.mxu0 %v9707_v30  ;;  %v9715_v36 = vld [vmem:[%s12429_s4 + $0x3a4] ss:$8 sps:$4 sm:$0xff]   ;;  %v9713_v37 = vld [vmem:[%s12429_s4 + $0x3a0] ss:$8 sps:$4 sm:$0xff]   ;;  %v9700_v40 = vld [vmem:[%s12429_s4 + $0x74] ss:$8 sps:$4 sm:$0xff]  }
  0x7c   : > { %v4881_v53 = vcombine.high %v4873_v45, %v4873_v45  ;;  %v4897_v54 = vrot.slane %v8752_v26, %v10060_v18  ;;  %v4945_v55 = vrot.slane %v4923_v47, %v10060_v18  ;;  %v4952_v56 = vrot.slane %v8755_v48, %v10060_v18  ;;  %7733 = vmatprep.subr.bf16.mxu0 %v9715_v36  ;;  %v9692_v39 = vld [vmem:[%s12429_s4 + $0x60] ss:$8 sps:$4 sm:$0xff]   ;;  %v9698_v41 = vld [vmem:[%s12429_s4 + $0x70] ss:$8 sps:$4 sm:$0xff]   ;;  %v9706_v42 = vld [vmem:[%s12429_s4 + $0x84] ss:$8 sps:$4 sm:$0xff]  }
  0x7d   : > { %v4953_v57 = vcombine.low %v4931_v49, %v4938_v50  ;;  %v4904_v58 = vrot.slane %v4890_v46, %v10060_v18  ;;  %v2388_v59 = vrot.slane %v2374_v51, %v10060_v18  ;;  %v4882_v60 = vcombine.high %v4880_v52, %v4880_v52  ;;  %v9721_v43 = vld [vmem:[%s12429_s4 + $0x3b4] ss:$8 sps:$4 sm:$0xff]   ;;  %v9710_v47 = vld [vmem:[%s12429_s4 + $0x90] ss:$8 sps:$4 sm:$0xff]   ;;  %v9718_v48 = vld [vmem:[%s12429_s4 + $0xa4] ss:$8 sps:$4 sm:$0xff]  }
  0x7e   : > { %v4905_v61 = vcombine.high %v4897_v54, %v4897_v54  ;;  %v4970_v62 = vcombine.low %v4858_v38, %v4873_v45  ;;  %v4954_v63 = vcombine.low %v4945_v55, %v4952_v56  ;;  %v4971_v1 = vcombine.low %v4880_v52, %v4881_v53  ;;  %v9694_v38 = vld [vmem:[%s12429_s4 + $0x64] ss:$8 sps:$4 sm:$0xff]   ;;  %v9704_v45 = vld [vmem:[%s12429_s4 + $0x80] ss:$8 sps:$4 sm:$0xff]   ;;  %v9712_v46 = vld [vmem:[%s12429_s4 + $0x94] ss:$8 sps:$4 sm:$0xff]  }
  0x7f   : > { %v4961_v0 = vrot.slane %v4953_v57, %v10060_v18  ;;  %v2389_v3 = vcombine.low %v2381_v44, %v2388_v59  ;;  %v4972_v4 = vcombine.low %v4882_v60, %v4897_v54  ;;  %v4906_v20 = vcombine.high %v4904_v58, %v4904_v58  ;;  %7734 = vmatpush1.bf16.msra.mxu0 %v9713_v37  ;;  %v9719_v44 = vld [vmem:[%s12429_s4 + $0x3b0] ss:$8 sps:$4 sm:$0xff]   ;;  %v9716_v49 = vld [vmem:[%s12429_s4 + $0xa0] ss:$8 sps:$4 sm:$0xff]   ;;  %v9727_v50 = vld [vmem:[%s12429_s4 + $0x3c4] ss:$8 sps:$4 sm:$0xff]  }
  0x80   : > { %v4973_v5 = vcombine.low %v4904_v58, %v4905_v61  ;;  %v4980_v7 = vrot.slane %v4970_v62, %v10060_v18  ;;  %v4968_v8 = vrot.slane %v4954_v63, %v10060_v18  ;;  %v4987_v9 = vrot.slane %v4971_v1, %v10060_v18  ;;  %7735 = vmatprep.subr.bf16.mxu0 %v9721_v43  ;;  %v9724_v51 = vld [vmem:[%s12429_s4 + $0xb4] ss:$8 sps:$4 sm:$0xff]   ;;  %v9725_v52 = vld [vmem:[%s12429_s4 + $0x3c0] ss:$8 sps:$4 sm:$0xff]   ;;  %v9722_v53 = vld [vmem:[%s12429_s4 + $0xb0] ss:$8 sps:$4 sm:$0xff]  }
  0x81   : > { %9199 = vmatmul.mubr.bf16.gmra.mrb[32].mxu0 %v2389_v3  ;;  %v4994_v10 = vrot.slane %v4972_v4, %v10060_v18  ;;  %v4920_v21 = vrot.slane %v8753_v12, %v10060_v18  ;;  %v9730_v54 = vld [vmem:[%s12429_s4 + $0xc4] ss:$8 sps:$4 sm:$0xff]   ;;  %v9728_v55 = vld [vmem:[%s12429_s4 + $0xc0] ss:$8 sps:$4 sm:$0xff]   ;;  %v9733_v56 = vld [vmem:[%s12429_s4 + $0xd4] ss:$8 sps:$4 sm:$0xff]  }
  0x82   : > { %v5001_v11 = vrot.slane %v4973_v5, %v10060_v18  ;;  %v4969_v14 = vcombine.low %v4961_v0, %v4968_v8  ;;  %v5002_v15 = vcombine.low %v4980_v7, %v4987_v9  ;;  %v9731_v57 = vld [vmem:[%s12429_s4 + $0xd0] ss:$8 sps:$4 sm:$0xff]   ;;  %v9736_v58 = vld [vmem:[%s12429_s4 + $0x3d4] ss:$8 sps:$4 sm:$0xff]   ;;  %v9739_v60 = vld [vmem:[%s12429_s4 + $0xe4] ss:$8 sps:$4 sm:$0xff]  }
  0x83   : > { %v5019_v26 = vcombine.low %v4906_v20, %v4920_v21  ;;  %7736 = vmatpush1.bf16.msra.mxu0 %v9719_v44  ;;  %v9734_v59 = vld [vmem:[%s12429_s4 + $0x3d0] ss:$8 sps:$4 sm:$0xff]   ;;  %v9737_v61 = vld [vmem:[%s12429_s4 + $0xe0] ss:$8 sps:$4 sm:$0xff]   ;;  %v9742_v62 = vld [vmem:[%s12429_s4 + $0x3e4] ss:$8 sps:$4 sm:$0xff]  }
  0x84   : > { %v5003_v17 = vcombine.low %v4994_v10, %v5001_v11  ;;  %9219 = vmatmul.mubr.bf16.vlgmr.msra.gmra.mrb[0].mxu1 %v4969_v14  ;;  %v5010_v19 = vrot.slane %v5002_v15, %v10060_v18  ;;  %7737 = vmatprep.subr.bf16.mxu0 %v9727_v50  ;;  %v9740_v63 = vld [vmem:[%s12429_s4 + $0x3e0] ss:$8 sps:$4 sm:$0xff]   ;;  %v9745_v0 = vld [vmem:[%s12429_s4 + $0xf4] ss:$8 sps:$4 sm:$0xff]   ;;  %v9743_v1 = vld [vmem:[%s12429_s4 + $0xf0] ss:$8 sps:$4 sm:$0xff]  }
  0x85   : > { %9222 = vmatprep.mubr.msk.bf16.mxu1 %vm9966_vm0, %v9965_v2  ;;  %6271 = vmatpush1.bf16.msra.mxu1 %v9659_v13  ;;  %v5026_v31 = vrot.slane %v5019_v26, %v10060_v18  ;;  %v9748_v3 = vld [vmem:[%s12429_s4 + $0x3f4] ss:$8 sps:$4 sm:$0xff]   ;;  %v9746_v4 = vld [vmem:[%s12429_s4 + $0x3f0] ss:$8 sps:$4 sm:$0xff]   ;;  %v9968_v5 = vmov 1983009808  }
  0x86   : > { %v5017_v22 = vrot.slane %v5003_v17, %v10060_v18  ;;  %6272 = vmatprep.subr.bf16.mxu1 %v9667_v16  ;;  %v1493_v7 = vunpack.c.l.s4 %v9968_v5  ;;  %v8675_v9 = vld [vmem:[%s12428_s3] ss:$0 sm:$0xff]  ;;  %v9751_v12 = vld [vmem:[%s12429_s4 + $0x104] ss:$8 sps:$4 sm:$0xff]  }
  0x87   : > { %v5033_v34 = vrot.slane %v5026_v31, %v10060_v18  ;;  %v9686_v18 = vld [vmem:[%s12429_s4 + $0x50] ss:$8 sps:$4 sm:$0xff]   ;;  %7738 = vmatpush1.bf16.msra.mxu0 %v9725_v52  ;;  %v1491_v11 = vcombine.high %v8675_v9, %v8675_v9  ;;  %v9754_v13 = vld [vmem:[%s12429_s4 + $0x404] ss:$8 sps:$4 sm:$0xff]  }
  0x88   : > { %v5018_v25 = vcombine.low %v5010_v19, %v5017_v22  ;;  %7739 = vmatprep.subr.bf16.mxu0 %v9736_v58  ;;  %v1494_v8 = vunpack.c.0.s8 %v1493_v7 }
  0x89   : > { %6273 = vmatpush1.bf16.msra.mxu1 %v9665_v23 }
  0x8a   : > { %6274 = vmatprep.subr.bf16.mxu1 %v9673_v24  ;;  %v10544_v10 = vsub.s32 %v1494_v8, %v10048_v6 }
  0x8b   : > { %7740 = vmatpush1.bf16.msra.mxu0 %v9734_v59 }
  0x8c   : > { %9223 = vmatmul.mubr.bf16.gmra.mrb[4].mxu1 %v5018_v25  ;;  %7741 = vmatprep.subr.bf16.mxu0 %v9742_v62  ;;  %v1498_v14 = vrot.slane %v8675_v9, %v10544_v10  ;;  %v1505_v15 = vrot.slane %v1491_v11, %v10544_v10 }
  0x8d   : > { %9226 = vmatprep.mubr.msk.bf16.mxu1 %vm9966_vm0, %v9965_v2  ;;  %6275 = vmatpush1.bf16.msra.mxu1 %v9671_v27  ;;  %v9688_v2 = vld [vmem:[%s12429_s4 + $0x54] ss:$8 sps:$4 sm:$0xff]  }
  0x8e   : > { %6276 = vmatprep.subr.bf16.mxu1 %v9679_v28  ;;  %v1506_v16 = vcombine.high %v1498_v14, %v1498_v14  ;;  %v1507_v17 = vcombine.high %v1505_v15, %v1505_v15  ;;  %v2473_v19 = vcombine.low %v1498_v14, %v1498_v14 }
  0x8f   : > { %7742 = vmatpush1.bf16.msra.mxu0 %v9740_v63 }
  0x90   : > { %7743 = vmatprep.subr.bf16.mxu0 %v9748_v3  ;;  %v2474_v20 = vcombine.low %v1506_v16, %v1505_v15  ;;  %v2456_v21 = vcombine.low %v1498_v14, %v1506_v16  ;;  %v2457_v22 = vcombine.low %v1505_v15, %v1507_v17  ;;  %v2481_v23 = vrot.slane %v2473_v19, %v10544_v10 }
  0x91   : > { %6277 = vmatpush1.bf16.msra.mxu1 %v9677_v32  ;;  %v2490_v27 = vcombine.low %v1507_v17, %v1498_v14 }
  0x92   : > { %6278 = vmatprep.subr.bf16.mxu1 %v9682_v33  ;;  %v2488_v24 = vrot.slane %v2474_v20, %v10544_v10  ;;  %v10557_v25 = vrot.slane %v2456_v21, %v10544_v10  ;;  %v10560_v26 = vrot.slane %v2457_v22, %v10544_v10 }
  0x93   : > { %7744 = vmatpush1.bf16.msra.mxu0 %v9746_v4  ;;  %v10569_v30 = vrot.slane %v2490_v27, %v10544_v10 }
  0x94   : > { %9227 = vmatmul.mubr.bf16.gmra.mrb[8].mxu1 %v5033_v34  ;;  %7906 = vmatprep.subr.bf16.mxu0 %v9754_v13  ;;  %v10562_v28 = vcombine.low %v2481_v23, %v2488_v24  ;;  %v10566_v29 = vcombine.low %v10557_v25, %v10560_v26  ;;  %v10587_v43 = vcombine.low %v10560_v26, %v2481_v23 }
  0x95   : > { %6279 = vmatpush1.bf16.msra.mxu1 %v9680_v35  ;;  %12457 = vst [vmem:[#allocation3_spill] sm:$0xff] %v10569_v30  ;;  %v10574_v35 = vcombine.low %v10569_v30, %v2488_v24 }
  0x96   : > { %6280 = vmatprep.subr.bf16.mxu1 %v9688_v2 }
  0x99   : > { %6281 = vmatpush1.bf16.msra.mxu1 %v9686_v18 }
  0x9a   : > { %6282 = vmatprep.subr.bf16.mxu1 %v9694_v38 }
  0x9d   : > { %6283 = vmatpush1.bf16.msra.mxu1 %v9692_v39 }
  0x9e   : > { %6284 = vmatprep.subr.bf16.mxu1 %v9700_v40 }
  0xa1   : > { %6285 = vmatpush1.bf16.msra.mxu1 %v9698_v41 }
  0xa2   : > { %6286 = vmatprep.subr.bf16.mxu1 %v9706_v42  ;;  %v10584_v42 = vcombine.low %v2488_v24, %v10569_v30 }
  0xa5   : > { %6287 = vmatpush1.bf16.msra.mxu1 %v9704_v45 }
  0xa6   : > { %6288 = vmatprep.subr.bf16.mxu1 %v9712_v46 }
  0xa9   : > { %6289 = vmatpush1.bf16.msra.mxu1 %v9710_v47 }
  0xaa   : > { %6290 = vmatprep.subr.bf16.mxu1 %v9718_v48 }
  0xad   : > { %6291 = vmatpush1.bf16.msra.mxu1 %v9716_v49 }
  0xae   : > { %6292 = vmatprep.subr.bf16.mxu1 %v9724_v51 }
  0xb1   : > { %6293 = vmatpush1.bf16.msra.mxu1 %v9722_v53 }
  0xb2   : > { %6294 = vmatprep.subr.bf16.mxu1 %v9730_v54 }
  0xb5   : > { %6295 = vmatpush1.bf16.msra.mxu1 %v9728_v55 }
  0xb6   : > { %6296 = vmatprep.subr.bf16.mxu1 %v9733_v56 }
  0xb9   : > { %6297 = vmatpush1.bf16.msra.mxu1 %v9731_v57 }
  0xba   : > { %6298 = vmatprep.subr.bf16.mxu1 %v9739_v60 }
  0xbd   : > { %6299 = vmatpush1.bf16.msra.mxu1 %v9737_v61 }
  0xbe   : > { %6300 = vmatprep.subr.bf16.mxu1 %v9745_v0  ;;  %v10596_v0 = vcombine.low %v10569_v30, %v10557_v25 }
  0xc1   : > { %6301 = vmatpush1.bf16.msra.mxu1 %v9743_v1 }
  0xc2   : > { %6463 = vmatprep.subr.bf16.mxu1 %v9751_v12 }
 0x102   : > { %v9168_v31 = vpop.f32.mrb[0].mxu0 }
 0x103   : > { %v2553_v32 = vadd.f32 %v9168_v31, %v10562_v28  ;;  %v2544_v33 = vpop.f32.mrb[1].mxu0 }
 0x104   : > { %v2545_v34 = vadd.f32 %v2544_v33, %v10566_v29  ;;  %v9169_v2 = vpop.f32.mrb[2].mxu0 }
 0x105   : > { %v2757_v36 = vcombine.high %v2553_v32, %v2553_v32  ;;  %v10577_v37 = vrot.slane %v2553_v32, %v10544_v10  ;;  %v2547_v18 = vpop.f32.mrb[3].mxu0  ;;  %v2556_v46 = vadd.f32 %v9169_v2, %v10574_v35 }
 0x106   : > { %v2723_v38 = vcombine.high %v2545_v34, %v2545_v34  ;;  %v2730_v39 = vrot.slane %v2545_v34, %v10544_v10  ;;  %v2548_v7 = vadd.f32 %v2547_v18, %v10566_v29 }
 0x107   : > { %v2771_v40 = vrot.slane %v2757_v36, %v10544_v10  ;;  %v2772_v41 = vcombine.high %v10577_v37, %v10577_v37  ;;  %v2774_v59 = vcombine.high %v2556_v46, %v2556_v46  ;;  %v2781_v63 = vrot.slane %v2556_v46, %v10544_v10 }
 0x108   : > { %v2737_v44 = vrot.slane %v2723_v38, %v10544_v10  ;;  %v2738_v45 = vcombine.high %v2730_v39, %v2730_v39  ;;  %vm3479_vm1 = vcmp.ge.f32.partialorder %v2730_v39, 0.0  ;;  %v3623_v48 = vmul.f32 0.2, %v2730_v39 }
 0x109   : > { %vm3488_vm2 = vcmp.ge.f32.partialorder %v2772_v41, 0.0  ;;  %vm3489_vm3 = vcmp.ge.f32.partialorder %v2771_v40, 0.0  ;;  %v3632_v47 = vmul.f32 0.2, %v2772_v41  ;;  %v2773_v49 = vcombine.high %v2771_v40, %v2771_v40 }
 0x10a   : > { %v3633_v50 = vmul.f32 0.2, %v2771_v40  ;;  %v2739_v51 = vcombine.high %v2737_v44, %v2737_v44  ;;  %vm3480_vm4 = vcmp.ge.f32.partialorder %v2738_v45, 0.0  ;;  %v9172_v52 = vpop.f32.mrb[4].mxu0  ;;  %vm3481_vm5 = vcmp.ge.f32.partialorder %v2737_v44, 0.0 }
 0x10b   : > { %v3776_v53 = vsel %vm3488_vm2, %v2772_v41, %v3632_v47  ;;  %v3624_v54 = vmul.f32 0.2, %v2738_v45  ;;  %v3625_v55 = vmul.f32 0.2, %v2737_v44  ;;  %v2560_v56 = vpop.f32.mrb[5].mxu0  ;;  %v3767_v3 = vsel %vm3479_vm1, %v2730_v39, %v3623_v48 }
 0x10c   : > { %v3777_v57 = vsel %vm3489_vm3, %v2771_v40, %v3633_v50  ;;  %vm3482_vm6 = vcmp.ge.f32.partialorder %v2739_v51, 0.0  ;;  %v3626_v58 = vmul.f32 0.2, %v2739_v51  ;;  %v10591_v60 = vpop.f32.mrb[6].mxu0  ;;  %v2788_v5 = vrot.slane %v2774_v59, %v10544_v10 }
 0x10d   : > { %v4096_v61 = vcombine.low %v3776_v53, %v3777_v57  ;;  %v3768_v62 = vsel %vm3480_vm4, %v2738_v45, %v3624_v54  ;;  %v10598_v1 = vpop.f32.mrb[7].mxu0  ;;  %v3769_v8 = vsel %vm3481_vm5, %v2737_v44, %v3625_v55  ;;  %v2789_v11 = vcombine.high %v2781_v63, %v2781_v63 }
 0x10e   : > { %v3770_v4 = vsel %vm3482_vm6, %v2739_v51, %v3626_v58  ;;  %v4055_v9 = vcombine.low %v3767_v3, %v3768_v62  ;;  %vm3490_vm7 = vcmp.ge.f32.partialorder %v2773_v49, 0.0  ;;  %vm3491_vm8 = vcmp.ge.f32.partialorder %v2781_v63, 0.0 }
 0x10f   : > { %v10605_v12 = vrot.slane %v4096_v61, %v10544_v10  ;;  %v4056_v13 = vcombine.low %v3769_v8, %v3770_v4  ;;  %v3634_v14 = vmul.f32 0.2, %v2773_v49  ;;  %vm3492_vm9 = vcmp.ge.f32.partialorder %v2789_v11, 0.0 }
 0x110   : > { %vm3493_vm10 = vcmp.ge.f32.partialorder %v2788_v5, 0.0  ;;  %v3635_v15 = vmul.f32 0.2, %v2781_v63  ;;  %v3636_v16 = vmul.f32 0.2, %v2789_v11  ;;  %v2740_v20 = vcombine.high %v2548_v7, %v2548_v7 }
 0x111   : > { %v3637_v17 = vmul.f32 0.2, %v2788_v5  ;;  %v3778_v19 = vsel %vm3490_vm7, %v2773_v49, %v3634_v14  ;;  %v2747_v21 = vrot.slane %v2548_v7, %v10544_v10  ;;  %v10609_v22 = vrot.slane %v4055_v9, %v10544_v10 }
 0x112   : > { %v3779_v23 = vsel %vm3491_vm8, %v2781_v63, %v3635_v15  ;;  %v3780_v24 = vsel %vm3492_vm9, %v2789_v11, %v3636_v16  ;;  %v2569_v27 = vadd.f32 %v9172_v52, %v10587_v43  ;;  %v2754_v33 = vrot.slane %v2740_v20, %v10544_v10 }
 0x113   : > { %v3781_v31 = vsel %vm3493_vm10, %v2788_v5, %v3637_v17  ;;  %v4097_v32 = vcombine.low %v3778_v19, %v3779_v23  ;;  %v2755_v34 = vcombine.high %v2747_v21, %v2747_v21  ;;  %v10614_v2 = vrot.slane %v4056_v13, %v10544_v10 }
 0x114   : > { %v2790_v36 = vcombine.high %v2788_v5, %v2788_v5  ;;  %v3627_v18 = vmul.f32 0.2, %v2747_v21  ;;  %v2825_v38 = vcombine.high %v2569_v27, %v2569_v27  ;;  %v2756_v40 = vcombine.high %v2754_v33, %v2754_v33  ;;  %v10619_v41 = vpop.f32.mrb[8].mxu0 }
 0x115   : > { %v10617_v39 = vrot.slane %v4097_v32, %v10544_v10  ;;  %vm3483_vm11 = vcmp.ge.f32.partialorder %v2747_v21, 0.0  ;;  %vm3484_vm12 = vcmp.ge.f32.partialorder %v2755_v34, 0.0  ;;  %v4113_v44 = vcombine.low %v3780_v24, %v3781_v31  ;;  %v10621_v47 = vpop.f32.mrb[9].mxu0 }
 0x116   : > { %vm3485_vm13 = vcmp.ge.f32.partialorder %v2754_v33, 0.0  ;;  %v3628_v45 = vmul.f32 0.2, %v2755_v34  ;;  %v3629_v46 = vmul.f32 0.2, %v2754_v33  ;;  %vm3486_vm14 = vcmp.ge.f32.partialorder %v2756_v40, 0.0 }
 0x117   : > { %v4112_v48 = vcombine.low %v10605_v12, %v10617_v39  ;;  %v3630_v49 = vmul.f32 0.2, %v2756_v40  ;;  %v2832_v50 = vrot.slane %v2569_v27, %v10544_v10  ;;  %v10626_v51 = vpop.f32.mrb[10].mxu0  ;;  %v3771_v52 = vsel %vm3483_vm11, %v2747_v21, %v3627_v18 }
 0x118   : > { %v3772_v53 = vsel %vm3484_vm12, %v2755_v34, %v3628_v45  ;;  %v10629_v54 = vrot.slane %v2825_v38, %v10544_v10  ;;  %v2561_v55 = vadd.f32 %v2560_v56, %v10596_v0  ;;  %v10632_v57 = vpop.f32.mrb[11].mxu0  ;;  %v3773_v58 = vsel %vm3485_vm13, %v2754_v33, %v3629_v46 }
 0x119   : > { %v3774_v59 = vsel %vm3486_vm14, %v2756_v40, %v3630_v49  ;;  %v4072_v61 = vcombine.low %v3771_v52, %v3772_v53  ;;  %v2840_v62 = vcombine.high %v2832_v50, %v2832_v50  ;;  %v10635_v63 = vmul.f32 0.2, %v10577_v37 }
 0x11a   : > { %v4073_v4 = vcombine.low %v3773_v58, %v3774_v59  ;;  %v10641_v5 = vcombine.low %v10560_v26, %v10557_v25  ;;  %v4121_v7 = vrot.slane %v4113_v44, %v10544_v10  ;;  %v3647_v56 = vmul.f32 0.2, %v2832_v50 }
 0x11b   : > { %vm3504_vm15 = vcmp.ge.f32.partialorder %v2840_v62, 0.0  ;;  %v3648_v8 = vmul.f32 0.2, %v2840_v62  ;;  %v2841_v9 = vcombine.high %v10629_v54, %v10629_v54  ;;  %vm3503_vm0 = vcmp.ge.f32.partialorder %v2832_v50, 0.0 }
 0x11c   : > { %v2791_v11 = vcombine.high %v2561_v55, %v2561_v55  ;;  %v10647_v13 = vrot.slane %v2561_v55, %v10544_v10  ;;  %v10650_v14 = vrot.slane %v4072_v61, %v10544_v10  ;;  %v3638_v16 = vmul.f32 0.2, %v2790_v36  ;;  %v10654_v26 = vpop.f32.mrb[12].mxu0 }
 0x11d   : > { %v3792_v15 = vsel %vm3504_vm15, %v2840_v62, %v3648_v8  ;;  %v2572_v25 = vadd.f32 %v10591_v60, %v10584_v42  ;;  %v10657_v17 = vrot.slane %v4073_v4, %v10544_v10  ;;  %v10660_v19 = vmul.f32 0.2, %v10629_v54  ;;  %v10663_v21 = vpop.f32.mrb[13].mxu0 }
 0x11e   : > { %v2805_v20 = vrot.slane %v2791_v11, %v10544_v10  ;;  %vm3494_vm1 = vcmp.ge.f32.partialorder %v2790_v36, 0.0  ;;  %v3791_v23 = vsel %vm3503_vm0, %v2832_v50, %v3647_v56  ;;  %vm3495_vm2 = vcmp.ge.f32.partialorder %v10647_v13, 0.0  ;;  %v10667_v60 = vpop.f32.mrb[14].mxu0 }
 0x11f   : > { %v3639_v24 = vmul.f32 0.2, %v10647_v13  ;;  %v2842_v27 = vcombine.high %v2572_v25, %v2572_v25  ;;  %v4155_v31 = vcombine.low %v3791_v23, %v3792_v15  ;;  %v10669_v34 = vpop.f32.mrb[15].mxu0  ;;  %v3782_v18 = vsel %vm3494_vm1, %v2790_v36, %v3638_v16 }
 0x120   : > { %v2807_v32 = vcombine.high %v2805_v20, %v2805_v20  ;;  %vm3497_vm3 = vcmp.ge.f32.partialorder %v2805_v20, 0.0  ;;  %v3641_v33 = vmul.f32 0.2, %v2805_v20  ;;  %v2849_v40 = vrot.slane %v2572_v25, %v10544_v10 }
 0x121   : > { %v3783_v38 = vsel %vm3495_vm2, %v10647_v13, %v3639_v24  ;;  %v2856_v44 = vrot.slane %v2842_v27, %v10544_v10  ;;  %vm3506_vm5 = vcmp.ge.f32.partialorder %v2841_v9, 0.0  ;;  %v3650_v55 = vmul.f32 0.2, %v2841_v9 }
 0x122   : > { %vm3498_vm4 = vcmp.ge.f32.partialorder %v2807_v32, 0.0  ;;  %v3642_v45 = vmul.f32 0.2, %v2807_v32  ;;  %v4114_v46 = vcombine.low %v3782_v18, %v3783_v38  ;;  %v3785_v49 = vsel %vm3497_vm3, %v2805_v20, %v3641_v33 }
 0x123   : > { %v2857_v50 = vcombine.high %v2849_v40, %v2849_v40  ;;  %vm3507_vm6 = vcmp.ge.f32.partialorder %v2849_v40, 0.0  ;;  %vm3509_vm7 = vcmp.ge.f32.partialorder %v2856_v44, 0.0  ;;  %v3651_v58 = vmul.f32 0.2, %v2849_v40 }
 0x124   : > { %v3786_v52 = vsel %vm3498_vm4, %v2807_v32, %v3642_v45  ;;  %v4128_v53 = vrot.slane %v4114_v46, %v10544_v10  ;;  %v3653_v61 = vmul.f32 0.2, %v2856_v44  ;;  %v3794_v4 = vsel %vm3506_vm5, %v2841_v9, %v3650_v55 }
 0x125   : > { %v4137_v36 = vcombine.low %v3785_v49, %v3786_v52  ;;  %vm3508_vm8 = vcmp.ge.f32.partialorder %v2857_v50, 0.0  ;;  %v3652_v59 = vmul.f32 0.2, %v2857_v50  ;;  %v3795_v56 = vsel %vm3507_vm6, %v2849_v40, %v3651_v58 }
 0x126   : > { %v4129_v62 = vcombine.low %v4121_v7, %v4128_v53  ;;  %v2564_v8 = vadd.f32 %v10598_v1, %v10641_v5  ;;  %v10678_v11 = vrot.slane %v4155_v31, %v10544_v10  ;;  %v3797_v16 = vsel %vm3509_vm7, %v2856_v44, %v3653_v61 }
 0x127   : > { %v3796_v15 = vsel %vm3508_vm8, %v2857_v50, %v3652_v59  ;;  %v4178_v25 = vcombine.low %v3794_v4, %v3795_v56  ;;  %v10686_v9 = vpop.f32.mrb[16].mxu0  ;;  %v10688_v27 = vcombine.high %v2856_v44, %v2856_v44  ;;  %v2585_v31 = vadd.f32 %v10619_v41, %v10566_v29 }
 0x128   : > { %v10683_v20 = vpack.c.bf16 %v4129_v62, %v4112_v48  ;;  %v4179_v23 = vcombine.low %v3796_v15, %v3797_v16  ;;  %v2808_v24 = vcombine.high %v2564_v8, %v2564_v8  ;;  %v2815_v7 = vrot.slane %v2564_v8, %v10544_v10  ;;  %v10697_v12 = vpop.f32.mrb[17].mxu0 }
 0x129   : > { %v10691_v1 = vrot.slane %v4178_v25, %v10544_v10  ;;  %v2577_v32 = vadd.f32 %v10621_v47, %v10584_v42  ;;  %v4145_v39 = vrot.slane %v4137_v36, %v10544_v10  ;;  %v10704_v38 = vpop.f32.mrb[18].mxu0  ;;  %v2893_v44 = vcombine.high %v2585_v31, %v2585_v31 }
 0x12a   : > { %v10701_v48 = vrot.slane %v4179_v23, %v10544_v10  ;;  %v2822_v33 = vrot.slane %v2808_v24, %v10544_v10  ;;  %v2823_v18 = vcombine.high %v2815_v7, %v2815_v7  ;;  %vm3499_vm9 = vcmp.ge.f32.partialorder %v2815_v7, 0.0  ;;  %v10707_v45 = vpop.f32.mrb[19].mxu0 }
 0x12b   : > { %v3643_v40 = vmul.f32 0.2, %v2815_v7  ;;  %v2900_v41 = vrot.slane %v2585_v31, %v10544_v10  ;;  %v2907_v52 = vrot.slane %v2893_v44, %v10544_v10  ;;  %v2859_v53 = vcombine.high %v2577_v32, %v2577_v32 }
 0x12c   : > { %v4194_v47 = vcombine.low %v10691_v1, %v10701_v48  ;;  %v2824_v46 = vcombine.high %v2822_v33, %v2822_v33  ;;  %vm3500_vm10 = vcmp.ge.f32.partialorder %v2823_v18, 0.0  ;;  %vm3501_vm11 = vcmp.ge.f32.partialorder %v2822_v33, 0.0 }
 0x12d   : > { %v3644_v49 = vmul.f32 0.2, %v2823_v18  ;;  %v3645_v50 = vmul.f32 0.2, %v2822_v33  ;;  %v3787_v58 = vsel %vm3499_vm9, %v2815_v7, %v3643_v40  ;;  %v2908_v36 = vcombine.high %v2900_v41, %v2900_v41 }
 0x12e   : > { %vm3502_vm12 = vcmp.ge.f32.partialorder %v2824_v46, 0.0  ;;  %v3646_v55 = vmul.f32 0.2, %v2824_v46  ;;  %v2909_v62 = vcombine.high %v2907_v52, %v2907_v52  ;;  %vm3519_vm13 = vcmp.ge.f32.partialorder %v2900_v41, 0.0 }
 0x12f   : > { %v3788_v59 = vsel %vm3500_vm10, %v2823_v18, %v3644_v49  ;;  %v3789_v61 = vsel %vm3501_vm11, %v2822_v33, %v3645_v50  ;;  %vm3520_vm14 = vcmp.ge.f32.partialorder %v2908_v36, 0.0  ;;  %v3663_v8 = vmul.f32 0.2, %v2900_v41 }
 0x130   : > { %v3790_v4 = vsel %vm3502_vm12, %v2824_v46, %v3646_v55  ;;  %v4138_v56 = vcombine.low %v3787_v58, %v3788_v59  ;;  %vm3521_vm15 = vcmp.ge.f32.partialorder %v2907_v52, 0.0  ;;  %v3664_v16 = vmul.f32 0.2, %v2908_v36 }
 0x131   : > { %v4154_v15 = vcombine.low %v3789_v61, %v3790_v4  ;;  %v3665_v25 = vmul.f32 0.2, %v2907_v52  ;;  %vm3522_vm0 = vcmp.ge.f32.partialorder %v2909_v62, 0.0  ;;  %v3666_v24 = vmul.f32 0.2, %v2909_v62 }
 0x132   : > { %v4152_v23 = vrot.slane %v4138_v56, %v10544_v10  ;;  %v2866_v31 = vrot.slane %v2577_v32, %v10544_v10  ;;  %v3807_v18 = vsel %vm3519_vm13, %v2900_v41, %v3663_v8  ;;  %v3808_v33 = vsel %vm3520_vm14, %v2908_v36, %v3664_v16 }
 0x133   : > { %v4162_v7 = vrot.slane %v4154_v15, %v10544_v10  ;;  %v10716_v40 = vrot.slane %v2859_v53, %v10544_v10  ;;  %v10722_v46 = vcombine.high %v10647_v13, %v10647_v13  ;;  %v3809_v58 = vsel %vm3521_vm15, %v2907_v52, %v3665_v25 }
 0x134   : > { %v4153_v49 = vcombine.low %v4145_v39, %v4152_v23  ;;  %v2874_v50 = vcombine.high %v2866_v31, %v2866_v31  ;;  %v10724_v55 = vpop.f32.mrb[20].mxu0  ;;  %v3810_v41 = vsel %vm3522_vm0, %v2909_v62, %v3666_v24  ;;  %vm3510_vm1 = vcmp.ge.f32.partialorder %v10688_v27, 0.0 }
 0x135   : > { %v4170_v32 = vcombine.low %v4162_v7, %v10678_v11  ;;  %v10729_v53 = vpop.f32.mrb[21].mxu0  ;;  %v4236_v36 = vcombine.low %v3807_v18, %v3808_v33  ;;  %vm3511_vm2 = vcmp.ge.f32.partialorder %v2866_v31, 0.0  ;;  %v3654_v59 = vmul.f32 0.2, %v10688_v27 }
 0x136   : > { %vm3512_vm3 = vcmp.ge.f32.partialorder %v2874_v50, 0.0  ;;  %v10732_v13 = vpop.f32.mrb[22].mxu0  ;;  %vm3513_vm4 = vcmp.ge.f32.partialorder %v10716_v40, 0.0  ;;  %v3655_v61 = vmul.f32 0.2, %v2866_v31  ;;  %v4237_v52 = vcombine.low %v3809_v58, %v3810_v41 }
 0x137   : > { %v10734_v39 = vpack.c.bf16 %v4170_v32, %v4153_v49  ;;  %v3656_v11 = vmul.f32 0.2, %v2874_v50  ;;  %v10737_v4 = vpop.f32.mrb[23].mxu0  ;;  %v3657_v62 = vmul.f32 0.2, %v10716_v40  ;;  %v2588_v56 = vadd.f32 %v10626_v51, %v10562_v28 }
 0x138   : > { %v2580_v8 = vadd.f32 %v10632_v57, %v10566_v29  ;;  %v3798_v15 = vsel %vm3510_vm1, %v10688_v27, %v3654_v59  ;;  %v3799_v16 = vsel %vm3511_vm2, %v2866_v31, %v3655_v61  ;;  %v2601_v23 = vadd.f32 %v10654_v26, %v10641_v5 }
 0x139   : > { %v3800_v25 = vsel %vm3512_vm3, %v2874_v50, %v3656_v11  ;;  %v3801_v24 = vsel %vm3513_vm4, %v10716_v40, %v3657_v62  ;;  %v4195_v7 = vcombine.low %v3798_v15, %v3799_v16  ;;  %v2910_v18 = vcombine.high %v2588_v56, %v2588_v56 }
 0x13a   : > { %v2917_v33 = vrot.slane %v2588_v56, %v10544_v10  ;;  %v10752_v51 = vrot.slane %v4236_v36, %v10544_v10  ;;  %v4196_v49 = vcombine.low %v3800_v25, %v3801_v24  ;;  %v2876_v57 = vcombine.high %v2580_v8, %v2580_v8 }
 0x13b   : > { %v2883_v32 = vrot.slane %v2580_v8, %v10544_v10  ;;  %v10756_v27 = vrot.slane %v4237_v52, %v10544_v10  ;;  %v2924_v31 = vrot.slane %v2910_v18, %v10544_v10  ;;  %v2961_v26 = vcombine.high %v2601_v23, %v2601_v23 }
 0x13c   : > { %v2925_v50 = vcombine.high %v2917_v33, %v2917_v33  ;;  %v4203_v58 = vrot.slane %v4195_v7, %v10544_v10  ;;  %v4210_v41 = vrot.slane %v4196_v49, %v10544_v10  ;;  %v2890_v59 = vrot.slane %v2876_v57, %v10544_v10 }
 0x13d   : > { %v2891_v61 = vcombine.high %v2883_v32, %v2883_v32  ;;  %vm3523_vm5 = vcmp.ge.f32.partialorder %v2917_v33, 0.0  ;;  %vm3525_vm7 = vcmp.ge.f32.partialorder %v2924_v31, 0.0  ;;  %v3667_v62 = vmul.f32 0.2, %v2917_v33 }
 0x13e   : > { %vm3524_vm6 = vcmp.ge.f32.partialorder %v2925_v50, 0.0  ;;  %v3668_v36 = vmul.f32 0.2, %v2925_v50  ;;  %v4211_v11 = vcombine.low %v4203_v58, %v4210_v41  ;;  %v3669_v56 = vmul.f32 0.2, %v2924_v31  ;;  %v10762_v8 = vpop.f32.mrb[24].mxu0 }
 0x13f   : > { %v2892_v52 = vcombine.high %v2890_v59, %v2890_v59  ;;  %vm3515_vm8 = vcmp.ge.f32.partialorder %v2883_v32, 0.0  ;;  %vm3516_vm9 = vcmp.ge.f32.partialorder %v2891_v61, 0.0  ;;  %vm3517_vm10 = vcmp.ge.f32.partialorder %v2890_v59, 0.0  ;;  %v10764_v16 = vpop.f32.mrb[25].mxu0 }
 0x140   : > { %v3812_v15 = vsel %vm3524_vm6, %v2925_v50, %v3668_v36  ;;  %v10769_v25 = vpack.c.bf16 %v4211_v11, %v4194_v47  ;;  %v3813_v24 = vsel %vm3525_vm7, %v2924_v31, %v3669_v56  ;;  %v3659_v7 = vmul.f32 0.2, %v2883_v32  ;;  %v10771_v18 = vpop.f32.mrb[26].mxu0 }
 0x141   : > { %vm3518_vm11 = vcmp.ge.f32.partialorder %v2892_v52, 0.0  ;;  %12459 = vst [vmem:[#allocation5_spill] sm:$0xff] %v10771_v18  ;;  %v2926_v49 = vcombine.high %v2924_v31, %v2924_v31  ;;  %v3660_v57 = vmul.f32 0.2, %v2891_v61  ;;  %v3661_v58 = vmul.f32 0.2, %v2890_v59 }
 0x142   : > { %12458 = vst [vmem:[#allocation4_spill] sm:$0xff] %v10769_v25  ;;  %v3662_v41 = vmul.f32 0.2, %v2892_v52  ;;  %v4260_v50 = vcombine.low %v3812_v15, %v3813_v24  ;;  %v3803_v36 = vsel %vm3515_vm8, %v2883_v32, %v3659_v7  ;;  %v2968_v44 = vrot.slane %v2601_v23, %v10544_v10  ;;  %v10775_v6 = vpop.f32.mrb[27].mxu0 }
 0x143   : > { %v2975_v3 = vrot.slane %v2961_v26, %v10544_v10  ;;  %v3804_v1 = vsel %vm3516_vm9, %v2891_v61, %v3660_v57  ;;  %v3805_v48 = vsel %vm3517_vm10, %v2890_v59, %v3661_v58  ;;  %v2593_v11 = vadd.f32 %v10663_v21, %v10574_v35 }
 0x144   : > { %v3806_v47 = vsel %vm3518_vm11, %v2892_v52, %v3662_v41  ;;  %v4219_v31 = vcombine.low %v3803_v36, %v3804_v1  ;;  %v2976_v30 = vcombine.high %v2968_v44, %v2968_v44  ;;  %v4252_v32 = vcombine.low %v10752_v51, %v10756_v27 }
 0x145   : > { %v4220_v56 = vcombine.low %v3805_v48, %v3806_v47  ;;  %v2977_v18 = vcombine.high %v2975_v3, %v2975_v3  ;;  %v10785_v23 = vcombine.high %v10716_v40, %v10716_v40  ;;  %v10788_v26 = vsel %vm3523_vm5, %v2917_v33, %v3667_v62 }
 0x146   : > { %v3679_v61 = vmul.f32 0.2, %v2968_v44  ;;  %v4227_v59 = vrot.slane %v4219_v31, %v10544_v10  ;;  %vm3535_vm12 = vcmp.ge.f32.partialorder %v2968_v44, 0.0  ;;  %v3681_v21 = vmul.f32 0.2, %v2975_v3 }
 0x147   : > { %v4234_v52 = vrot.slane %v4220_v56, %v10544_v10  ;;  %v10793_v15 = vrot.slane %v4260_v50, %v10544_v10  ;;  %vm3537_vm13 = vcmp.ge.f32.partialorder %v2975_v3, 0.0  ;;  %v3680_v24 = vmul.f32 0.2, %v2976_v30 }
 0x148   : > { %v3682_v51 = vmul.f32 0.2, %v2977_v18  ;;  %v2927_v7 = vcombine.high %v2593_v11, %v2593_v11  ;;  %v2934_v40 = vrot.slane %v2593_v11, %v10544_v10  ;;  %vm3526_vm14 = vcmp.ge.f32.partialorder %v2926_v49, 0.0 }
 0x149   : > { %v4235_v27 = vcombine.low %v4227_v59, %v4234_v52  ;;  %v10796_v33 = vpop.f32.mrb[28].mxu0  ;;  %vm3536_vm15 = vcmp.ge.f32.partialorder %v2976_v30, 0.0  ;;  %vm3538_vm0 = vcmp.ge.f32.partialorder %v2977_v18, 0.0  ;;  %v3823_v62 = vsel %vm3535_vm12, %v2968_v44, %v3679_v61 }
 0x14a   : > { %12460 = vst [vmem:[#allocation6_spill] sm:$0xff] %v10796_v33  ;;  %v3670_v57 = vmul.f32 0.2, %v2926_v49  ;;  %v10798_v58 = vpop.f32.mrb[29].mxu0  ;;  %vm3487_vm1 = vcmp.ge.f32.partialorder %v10577_v37, 0.0  ;;  %v3825_v50 = vsel %vm3537_vm13, %v2975_v3, %v3681_v21  ;;  %v2941_v36 = vrot.slane %v2927_v7, %v10544_v10 }
 0x14b   : > { %12461 = vst [vmem:[#allocation7_spill] sm:$0xff] %v10798_v58  ;;  %v10801_v41 = vpack.c.bf16 %v4252_v32, %v4235_v27  ;;  %v2604_v1 = vadd.f32 %v10667_v60, %v10587_v43  ;;  %v10806_v48 = vpop.f32.mrb[30].mxu0  ;;  %v2942_v47 = vcombine.high %v2934_v40, %v2934_v40  ;;  %vm3527_vm2 = vcmp.ge.f32.partialorder %v2934_v40, 0.0 }
 0x14c   : > { %12463 = vst [vmem:[#allocation9_spill] sm:$0xff] %v10806_v48  ;;  %v3671_v11 = vmul.f32 0.2, %v2934_v40  ;;  %v3814_v44 = vsel %vm3526_vm14, %v2926_v49, %v3670_v57  ;;  %v10809_v31 = vpop.f32.mrb[31].mxu0  ;;  %v3824_v56 = vsel %vm3536_vm15, %v2976_v30, %v3680_v24  ;;  %v3826_v32 = vsel %vm3538_vm0, %v2977_v18, %v3682_v51 }
 0x14d   : > { %12462 = vst [vmem:[#allocation8_spill] sm:$0xff] %v10801_v41  ;;  %12464 = vst [vmem:[#allocation10_spill] sm:$0xff] %v10809_v31  ;;  %v2943_v61 = vcombine.high %v2941_v36, %v2941_v36  ;;  %vm3529_vm3 = vcmp.ge.f32.partialorder %v2941_v36, 0.0  ;;  %vm3528_vm4 = vcmp.ge.f32.partialorder %v2942_v47, 0.0  ;;  %v3672_v3 = vmul.f32 0.2, %v2942_v47 }
 0x14e   : > { %v3673_v59 = vmul.f32 0.2, %v2941_v36  ;;  %v3815_v52 = vsel %vm3527_vm2, %v2934_v40, %v3671_v11  ;;  %v2978_v21 = vcombine.high %v2604_v1, %v2604_v1  ;;  %v2985_v27 = vrot.slane %v2604_v1, %v10544_v10 }
 0x14f   : > { %v4261_v60 = vcombine.low %v3814_v44, %v3815_v52  ;;  %v2596_v7 = vadd.f32 %v10669_v34, %v10596_v0  ;;  %v4302_v49 = vcombine.low %v3823_v62, %v3824_v56  ;;  %v4318_v57 = vcombine.low %v3825_v50, %v3826_v32 }
 0x150   : > { %v3816_v31 = vsel %vm3528_vm4, %v2942_v47, %v3672_v3  ;;  %v3817_v48 = vsel %vm3529_vm3, %v2941_v36, %v3673_v59  ;;  %v2993_v24 = vcombine.high %v2985_v27, %v2985_v27  ;;  %v3674_v51 = vmul.f32 0.2, %v2943_v61 }
 0x151   : > { %v4275_v30 = vrot.slane %v4261_v60, %v10544_v10  ;;  %v4277_v18 = vcombine.low %v3816_v31, %v3817_v48  ;;  %vm3539_vm5 = vcmp.ge.f32.partialorder %v2985_v27, 0.0  ;;  %v3683_v58 = vmul.f32 0.2, %v2985_v27 }
 0x152   : > { %v2944_v33 = vcombine.high %v2596_v7, %v2596_v7  ;;  %v10818_v40 = vrot.slane %v2596_v7, %v10544_v10  ;;  %v10822_v11 = vrot.slane %v2978_v21, %v10544_v10  ;;  %vm3540_vm6 = vcmp.ge.f32.partialorder %v2993_v24, 0.0 }
 0x153   : > { %v4276_v1 = vcombine.low %v10793_v15, %v4275_v30  ;;  %vm3530_vm7 = vcmp.ge.f32.partialorder %v2943_v61, 0.0  ;;  %v10825_v34 = vrot.slane %v4302_v49, %v10544_v10  ;;  %v10828_v62 = vrot.slane %v4318_v57, %v10544_v10 }
 0x154   : > { %v3684_v50 = vmul.f32 0.2, %v2993_v24  ;;  %v3827_v36 = vsel %vm3539_vm5, %v2985_v27, %v3683_v58  ;;  %v4285_v48 = vrot.slane %v4277_v18, %v10544_v10  ;;  %v2958_v47 = vrot.slane %v2944_v33, %v10544_v10  ;;  %v10834_v44 = vpop.f32.mrb[32].mxu0 }
 0x155   : > { %vm3531_vm8 = vcmp.ge.f32.partialorder %v10818_v40, 0.0  ;;  %v3675_v15 = vmul.f32 0.2, %v10818_v40  ;;  %vm5357_vm9 = vsmask.f32 7424  ;;  %v3818_v56 = vsel %vm3530_vm7, %v2943_v61, %v3674_v51  ;;  %v10852_v61 = vpop.f32.mrb[33].mxu0 }
 0x156   : > { %v3828_v31 = vsel %vm3540_vm6, %v2993_v24, %v3684_v50  ;;  %v3775_v32 = vsel %vm3487_vm1, %v10577_v37, %v10635_v63  ;;  %v12465_v58 = vcombine.low %v10609_v22, %v10614_v2  ;;  %v12466_v33 = vcombine.low %v10650_v14, %v10657_v17  ;;  %v10866_v51 = vpop.f32.mrb[34].mxu0 }
 0x157   : > { %v10850_v59 = vcombine.high %v10822_v11, %v10822_v11  ;;  %v4319_v52 = vcombine.low %v3827_v36, %v3828_v31  ;;  %v2960_v60 = vcombine.high %v2958_v47, %v2958_v47  ;;  %vm3533_vm10 = vcmp.ge.f32.partialorder %v2958_v47, 0.0 }
 0x158   : > { %v10846_v3 = vpack.c.bf16 %v12466_v33, %v12465_v58  ;;  %v3677_v21 = vmul.f32 0.2, %v2958_v47  ;;  %v3819_v37 = vsel %vm3531_vm8, %v10818_v40, %v3675_v15  ;;  %v4095_v63 = vrot.slane %v3775_v32, %v10544_v10 }
 0x159   : > { %v4333_v2 = vrot.slane %v4319_v52, %v10544_v10  ;;  %vm3534_vm11 = vcmp.ge.f32.partialorder %v2960_v60, 0.0  ;;  %v3678_v14 = vmul.f32 0.2, %v2960_v60  ;;  %v4278_v17 = vcombine.low %v3818_v56, %v3819_v37 }
 0x15a   : > { %v5359_v22 = vshrl.u32 %v10846_v3, 16  ;;  %v3821_v27 = vsel %vm3533_vm10, %v2958_v47, %v3677_v21  ;;  %v10858_v7 = vpack.c.bf16 %v4095_v63, %v4095_v63  ;;  %v5361_v49 = vshll.u32 %v10846_v3, 16 }
 0x15b   : > { %v2617_v57 = vadd.f32 %v10686_v9, %v10566_v29  ;;  %v4334_v30 = vcombine.low %v10828_v62, %v4333_v2  ;;  %v3822_v18 = vsel %vm3534_vm11, %v2960_v60, %v3678_v14  ;;  %v4292_v24 = vrot.slane %v4278_v17, %v10544_v10 }
 0x15c   : > { %vm3496_vm12 = vcmp.ge.f32.partialorder %v10722_v46, 0.0  ;;  %v4301_v50 = vcombine.low %v3821_v27, %v3822_v18  ;;  %v5363_v36 = vrot.slane %v5361_v49, 1  ;;  %v5366_v47 = vshll.u32 %v10858_v7, 16  ;;  %v10884_v49 = vpop.f32.mrb[35].mxu0 }
 0x15d   : > { %v3029_v15 = vcombine.high %v2617_v57, %v2617_v57  ;;  %v4293_v31 = vcombine.low %v4285_v48, %v4292_v24  ;;  %v3036_v56 = vrot.slane %v2617_v57, %v10544_v10  ;;  %v3640_v32 = vmul.f32 0.2, %v10722_v46  ;;  %v9749_v48 = vld [vmem:[%s12429_s4 + $0x100] ss:$8 sps:$4 sm:$0xff]  }
 0x15e   : > { %v5371_v9 = vshrl.u32 %v10683_v20, 16  ;;  %v4309_v62 = vrot.slane %v4301_v50, %v10544_v10  ;;  %v5364_v58 = vor.u32 %v5363_v36, %v5359_v22  ;;  %v5368_v33 = vrot.slane %v5366_v47, 1  ;;  %v9757_v22 = vld [vmem:[%s12429_s4 + $0x114] ss:$8 sps:$4 sm:$0xff]  }
 0x15f   : > { %v3043_v52 = vrot.slane %v3029_v15, %v10544_v10  ;;  %v10874_v60 = vpack.c.bf16 %v4293_v31, %v4276_v1  ;;  %v3044_v21 = vcombine.high %v3036_v56, %v3036_v56  ;;  %vm3551_vm13 = vcmp.ge.f32.partialorder %v3036_v56, 0.0 }
 0x160   : > { %v3695_v37 = vmul.f32 0.2, %v3036_v56  ;;  %v4317_v63 = vcombine.low %v4309_v62, %v10825_v34  ;;  %v5369_v2 = vsel %vm5357_vm9, %v5364_v58, %v5368_v33  ;;  %v3784_v18 = vsel %vm3496_vm12, %v10722_v46, %v3640_v32  ;;  %v9763_v46 = vld [vmem:[%s12429_s4 + $0x124] ss:$8 sps:$4 sm:$0xff]  }
 0x161   : > { %v3045_v14 = vcombine.high %v3043_v52, %v3043_v52  ;;  %vm3553_vm14 = vcmp.ge.f32.partialorder %v3043_v52, 0.0  ;;  %6302 = vmatprep.mubr.bf16.mxu1 %v5369_v2  ;;  %vm3552_vm15 = vcmp.ge.f32.partialorder %v3044_v21, 0.0  ;;  %v3696_v1 = vmul.f32 0.2, %v3044_v21 }
 0x162   : > { %v3697_v17 = vmul.f32 0.2, %v3043_v52  ;;  %v3839_v27 = vsel %vm3551_vm13, %v3036_v56, %v3695_v37  ;;  %v10886_v57 = vpack.c.bf16 %v4334_v30, %v4317_v63  ;;  %6303 = vmatmul.mubr.bf16.vlgmr.msra.gmra.mrb[12].mxu1 %v10846_v3  ;;  %v4136_v36 = vrot.slane %v3784_v18, %v10544_v10  ;;  %v9755_v30 = vld [vmem:[%s12429_s4 + $0x110] ss:$8 sps:$4 sm:$0xff]  }
 0x163   : > { %vm3554_vm0 = vcmp.ge.f32.partialorder %v3045_v14, 0.0  ;;  %v3698_v34 = vmul.f32 0.2, %v3045_v14  ;;  %v3840_v24 = vsel %vm3552_vm15, %v3044_v21, %v3696_v1  ;;  %v5373_v47 = vshll.u32 %v10683_v20, 16  ;;  %6464 = vmatpush1.bf16.msra.mxu1 %v9749_v48 }
 0x164   : > { %v3841_v50 = vsel %vm3553_vm14, %v3043_v52, %v3697_v17  ;;  %v4383_v31 = vcombine.low %v3839_v27, %v3840_v24  ;;  %v2609_v56 = vadd.f32 %v10697_v12, %v10584_v42  ;;  %vm3542_vm1 = vcmp.ge.f32.partialorder %v10850_v59, 0.0  ;;  %6465 = vmatprep.subr.bf16.mxu1 %v9757_v22  ;;  %v9761_v22 = vld [vmem:[%s12429_s4 + $0x120] ss:$8 sps:$4 sm:$0xff]  }
 0x165   : > { %v3842_v15 = vsel %vm3554_vm0, %v3045_v14, %v3698_v34  ;;  %v10903_v62 = vpack.c.bf16 %v4136_v36, %v4136_v36  ;;  %v5375_v58 = vrot.slane %v5373_v47, 1  ;;  %v3686_v33 = vmul.f32 0.2, %v10850_v59  ;;  %v9769_v36 = vld [vmem:[%s12429_s4 + $0x134] ss:$8 sps:$4 sm:$0xff]  }
 0x166   : > { %v4384_v32 = vcombine.low %v3841_v50, %v3842_v15  ;;  %v10907_v52 = vrot.slane %v4383_v31, %v10544_v10  ;;  %v2995_v21 = vcombine.high %v2609_v56, %v2609_v56  ;;  %v3002_v37 = vrot.slane %v2609_v56, %v10544_v10  ;;  %v9760_v56 = vld [vmem:[%s12429_s4 + $0x414] ss:$8 sps:$4 sm:$0xff]  }
 0x167   : > { %12467 = vst [vmem:[#allocation11_spill] sm:$0xff] %v10903_v62  ;;  %v2620_v12 = vadd.f32 %v10704_v38, %v10566_v29  ;;  %v5376_v63 = vor.u32 %v5375_v58, %v5371_v9  ;;  %v5378_v2 = vshll.u32 %v10903_v62, 16  ;;  %v3830_v14 = vsel %vm3542_vm1, %v10850_v59, %v3686_v33  ;;  %6466 = vmatpush1.bf16.msra.mxu1 %v9755_v30  ;;  %v9752_v59 = vld [vmem:[%s12429_s4 + $0x400] ss:$8 sps:$4 sm:$0xff]  }
 0x168   : > { %v10913_v48 = vrot.slane %v4384_v32, %v10544_v10  ;;  %vm3505_vm2 = vcmp.ge.f32.partialorder %v10629_v54, 0.0  ;;  %v3009_v1 = vrot.slane %v2995_v21, %v10544_v10  ;;  %v3010_v17 = vcombine.high %v3002_v37, %v3002_v37  ;;  %6467 = vmatprep.subr.bf16.mxu1 %v9763_v46  ;;  %v9767_v46 = vld [vmem:[%s12429_s4 + $0x130] ss:$8 sps:$4 sm:$0xff]  }
 0x169   : > { %vm3543_vm3 = vcmp.ge.f32.partialorder %v3002_v37, 0.0  ;;  %v3687_v38 = vmul.f32 0.2, %v3002_v37  ;;  %v5380_v27 = vrot.slane %v5378_v2, 1  ;;  %v3046_v34 = vcombine.high %v2620_v12, %v2620_v12  ;;  %v9758_v21 = vld [vmem:[%s12429_s4 + $0x410] ss:$8 sps:$4 sm:$0xff]  }
 0x16a   : > { %v4399_v9 = vcombine.low %v10907_v52, %v10913_v48  ;;  %v3053_v18 = vrot.slane %v2620_v12, %v10544_v10  ;;  %v3011_v24 = vcombine.high %v3009_v1, %v3009_v1  ;;  %vm3544_vm4 = vcmp.ge.f32.partialorder %v3010_v17, 0.0 }
 0x16b   : > { %vm3545_vm5 = vcmp.ge.f32.partialorder %v3009_v1, 0.0  ;;  %v3688_v50 = vmul.f32 0.2, %v3010_v17  ;;  %v10932_v47 = vsel %vm5357_vm9, %v5376_v63, %v5380_v27  ;;  %v3689_v30 = vmul.f32 0.2, %v3009_v1  ;;  %6468 = vmatpush1.bf16.msra.mxu1 %v9761_v22 }
 0x16c   : > { %12468 = vst [vmem:[#allocation12_spill] sm:$0xff] %v10932_v47  ;;  %v3831_v15 = vsel %vm3543_vm3, %v3002_v37, %v3687_v38  ;;  %v3060_v31 = vrot.slane %v3046_v34, %v10544_v10  ;;  %6312 = vmatprep.mubr.bf16.mxu1 %v10932_v47  ;;  %7745 = vmatprep.mubr.bf16.mxu0 %v10932_v47  ;;  %vm3555_vm6 = vcmp.ge.f32.partialorder %v3053_v18, 0.0  ;;  %v9775_v37 = vld [vmem:[%s12429_s4 + $0x144] ss:$8 sps:$4 sm:$0xff]   ;;  %v3699_v2 = vmul.f32 0.2, %v3053_v18 }
 0x16d   : > { %v3832_v32 = vsel %vm3544_vm4, %v3010_v17, %v3688_v50  ;;  %v4342_v58 = vcombine.low %v3830_v14, %v3831_v15  ;;  %v3061_v33 = vcombine.high %v3053_v18, %v3053_v18  ;;  %v3833_v12 = vsel %vm3545_vm5, %v3009_v1, %v3689_v30  ;;  %7746 = vmatmul.mubr.bf16.vlgmr.msra.gmra.mrb[36].mxu0 %v10683_v20  ;;  %v9766_v14 = vld [vmem:[%s12429_s4 + $0x424] ss:$8 sps:$4 sm:$0xff]   ;;  %v9773_v1 = vld [vmem:[%s12429_s4 + $0x140] ss:$8 sps:$4 sm:$0xff]  }
 0x16e   : > { %v3062_v63 = vcombine.high %v3060_v31, %v3060_v31  ;;  %vm3557_vm7 = vcmp.ge.f32.partialorder %v3060_v31, 0.0  ;;  %6313 = vmatmul.mubr.bf16.gmra.mrb[16].mxu1 %v10683_v20  ;;  %v4343_v22 = vcombine.low %v3832_v32, %v3833_v12  ;;  %7907 = vmatpush1.bf16.msra.mxu0 %v9752_v59  ;;  %v3701_v27 = vmul.f32 0.2, %v3060_v31 }
 0x16f   : > { %v10956_v17 = vrot.slane %v4342_v58, %v10544_v10  ;;  %vm3556_vm8 = vcmp.ge.f32.partialorder %v3061_v33, 0.0  ;;  %v3700_v38 = vmul.f32 0.2, %v3061_v33  ;;  %6469 = vmatprep.subr.bf16.mxu1 %v9769_v36  ;;  %v3843_v50 = vsel %vm3555_vm6, %v3053_v18, %v3699_v2  ;;  %7908 = vmatprep.subr.bf16.mxu0 %v9760_v56  ;;  %v9781_v36 = vld [vmem:[%s12429_s4 + $0x154] ss:$8 sps:$4 sm:$0xff]  }
 0x170   : > { %vm3558_vm10 = vcmp.ge.f32.partialorder %v3062_v63, 0.0  ;;  %v3702_v34 = vmul.f32 0.2, %v3062_v63  ;;  %6470 = vmatpush1.bf16.msra.mxu1 %v9767_v46  ;;  %v10963_v30 = vrot.slane %v4343_v22, %v10544_v10  ;;  %v2612_v59 = vadd.f32 %v10707_v45, %v10584_v42  ;;  %v9764_v45 = vld [vmem:[%s12429_s4 + $0x420] ss:$8 sps:$4 sm:$0xff]  }
 0x171   : > { %v3844_v15 = vsel %vm3556_vm8, %v3061_v33, %v3700_v38  ;;  %vm3546_vm11 = vcmp.ge.f32.partialorder %v3011_v24, 0.0  ;;  %6471 = vmatprep.subr.bf16.mxu1 %v9775_v37  ;;  %v3845_v32 = vsel %vm3557_vm7, %v3060_v31, %v3701_v27  ;;  %v3690_v18 = vmul.f32 0.2, %v3011_v24 }
 0x172   : > { %v3846_v58 = vsel %vm3558_vm10, %v3062_v63, %v3702_v34  ;;  %v4400_v12 = vcombine.low %v3843_v50, %v3844_v15  ;;  %v4358_v56 = vcombine.low %v10956_v17, %v10963_v30  ;;  %v3012_v2 = vcombine.high %v2612_v59, %v2612_v59  ;;  %7909 = vmatpush1.bf16.msra.mxu0 %v9758_v21  ;;  %v9772_v63 = vld [vmem:[%s12429_s4 + $0x434] ss:$8 sps:$4 sm:$0xff]   ;;  %v9779_v21 = vld [vmem:[%s12429_s4 + $0x150] ss:$8 sps:$4 sm:$0xff]  }
 0x173   : > { %v4401_v46 = vcombine.low %v3845_v32, %v3846_v58  ;;  %v3019_v33 = vrot.slane %v2612_v59, %v10544_v10  ;;  %v3834_v22 = vsel %vm3546_vm11, %v3011_v24, %v3690_v18  ;;  %v3793_v31 = vsel %vm3505_vm2, %v10629_v54, %v10660_v19  ;;  %7910 = vmatprep.subr.bf16.mxu0 %v9766_v14  ;;  %v9787_v54 = vld [vmem:[%s12429_s4 + $0x164] ss:$8 sps:$4 sm:$0xff]   ;;  %v9770_v50 = vld [vmem:[%s12429_s4 + $0x430] ss:$8 sps:$4 sm:$0xff]   ;;  %v9785_v18 = vld [vmem:[%s12429_s4 + $0x160] ss:$8 sps:$4 sm:$0xff]  }
 0x174   : > { %v4408_v37 = vrot.slane %v4400_v12, %v10544_v10  ;;  %6472 = vmatpush1.bf16.msra.mxu1 %v9773_v1  ;;  %v10990_v27 = vrot.slane %v3012_v2, %v10544_v10  ;;  %v4177_v14 = vrot.slane %v3793_v31, %v10544_v10  ;;  %v5383_v1 = vshrl.u32 %v10734_v39, 16  ;;  %v9778_v59 = vld [vmem:[%s12429_s4 + $0x444] ss:$8 sps:$4 sm:$0xff]   ;;  %v11022_v31 = vpop.f32.mrb[0].mxu1 }
 0x175   : > { %v4415_v38 = vrot.slane %v4401_v46, %v10544_v10  ;;  %v3027_v24 = vcombine.high %v3019_v33, %v3019_v33  ;;  %vm3547_vm12 = vcmp.ge.f32.partialorder %v3019_v33, 0.0  ;;  %6473 = vmatprep.subr.bf16.mxu1 %v9781_v36  ;;  %v3691_v19 = vmul.f32 0.2, %v3019_v33 }
 0x176   : > { %v5385_v34 = vshll.u32 %v10734_v39, 16  ;;  %vm3549_vm14 = vcmp.ge.f32.partialorder %v10990_v27, 0.0  ;;  %vm3514_vm15 = vcmp.ge.f32.partialorder %v10785_v23, 0.0  ;;  %7911 = vmatpush1.bf16.msra.mxu0 %v9764_v45  ;;  %v3693_v32 = vmul.f32 0.2, %v10990_v27 }
 0x177   : > { %v4416_v15 = vcombine.low %v4408_v37, %v4415_v38  ;;  %vm3548_vm13 = vcmp.ge.f32.partialorder %v3027_v24, 0.0  ;;  %v3692_v36 = vmul.f32 0.2, %v3027_v24  ;;  %v3835_v58 = vsel %vm3547_vm12, %v3019_v33, %v3691_v19  ;;  %7912 = vmatprep.subr.bf16.mxu0 %v9772_v63  ;;  %v9793_v33 = vld [vmem:[%s12429_s4 + $0x174] ss:$8 sps:$4 sm:$0xff]  }
 0x178   : > { %v11008_v12 = vpack.c.bf16 %v4177_v14, %v4177_v14  ;;  %6474 = vmatpush1.bf16.msra.mxu1 %v9779_v21  ;;  %v4359_v2 = vcombine.low %v3834_v22, %v3835_v58  ;;  %v5387_v45 = vrot.slane %v5385_v34, 1  ;;  %v3658_v37 = vmul.f32 0.2, %v10785_v23 }
 0x179   : > { %v11016_v46 = vpack.c.bf16 %v4416_v15, %v4399_v9  ;;  %6475 = vmatprep.subr.bf16.mxu1 %v9787_v54  ;;  %v11026_v63 = vcombine.high %v10818_v40, %v10818_v40  ;;  %v3836_v21 = vsel %vm3548_vm13, %v3027_v24, %v3692_v36  ;;  %v3837_v52 = vsel %vm3549_vm14, %v10990_v27, %v3693_v32  ;;  %v9220_v9 = vpop.f32.mrb[1].mxu1 }
 0x17a   : > { %12469 = vst [vmem:[#allocation13_spill] sm:$0xff] %v11008_v12  ;;  %v5390_v48 = vshll.u32 %v11008_v12, 16  ;;  %v4360_v22 = vcombine.low %v3836_v21, %v3837_v52  ;;  %v4367_v38 = vrot.slane %v4359_v2, %v10544_v10  ;;  %v5388_v54 = vor.u32 %v5387_v45, %v5383_v1  ;;  %7913 = vmatpush1.bf16.msra.mxu0 %v9770_v50  ;;  %v9776_v50 = vld [vmem:[%s12429_s4 + $0x440] ss:$8 sps:$4 sm:$0xff]   ;;  %v11062_v2 = vpop.f32.mrb[2].mxu1 }
 0x17b   : > { %v3802_v19 = vsel %vm3514_vm15, %v10785_v23, %v3658_v37  ;;  %v5397_v24 = vshll.u32 %v10769_v25, 16  ;;  %v4259_v34 = vrot.slane %v10788_v26, %v10544_v10  ;;  %7914 = vmatprep.subr.bf16.mxu0 %v9778_v59  ;;  %v5395_v36 = vshrl.u32 %v10769_v25, 16  ;;  %v9799_v52 = vld [vmem:[%s12429_s4 + $0x184] ss:$8 sps:$4 sm:$0xff]  }
 0x17c   : > { %v5392_v40 = vrot.slane %v5390_v48, 1  ;;  %v4218_v14 = vrot.slane %v3802_v19, %v10544_v10  ;;  %6476 = vmatpush1.bf16.msra.mxu1 %v9785_v18  ;;  %v4374_v15 = vrot.slane %v4360_v22, %v10544_v10  ;;  %v5409_v1 = vshll.u32 %v10801_v41, 16  ;;  %v9784_v18 = vld [vmem:[%s12429_s4 + $0x454] ss:$8 sps:$4 sm:$0xff]   ;;  %v9221_v48 = vpop.f32.mrb[3].mxu1 }
 0x17d   : > { %v2633_v23 = vadd.f32 %v10724_v55, %v10596_v0  ;;  %6477 = vmatprep.subr.bf16.mxu1 %v9793_v33  ;;  %v5399_v59 = vrot.slane %v5397_v24, 1  ;;  %v11054_v58 = vpack.c.bf16 %v4259_v34, %v4259_v34  ;;  %v9791_v55 = vld [vmem:[%s12429_s4 + $0x170] ss:$8 sps:$4 sm:$0xff]   ;;  %v11065_v45 = vmul.f32 0.2, %v10822_v11 }
 0x17e   : > { %v11050_v32 = vsel %vm5357_vm9, %v5388_v54, %v5392_v40  ;;  %v11052_v26 = vpack.c.bf16 %v4218_v14, %v4218_v14  ;;  %v4375_v37 = vcombine.low %v4367_v38, %v4374_v15  ;;  %v5411_v33 = vrot.slane %v5409_v1, 1  ;;  %7915 = vmatpush1.bf16.msra.mxu0 %v9776_v50  ;;  %v9782_v34 = vld [vmem:[%s12429_s4 + $0x450] ss:$8 sps:$4 sm:$0xff]   ;;  %v9790_v15 = vld [vmem:[%s12429_s4 + $0x464] ss:$8 sps:$4 sm:$0xff]  }
 0x17f   : > { %12470 = vst [vmem:[#allocation14_spill] sm:$0xff] %v11050_v32  ;;  %12472 = vst [vmem:[#allocation16_spill] sm:$0xff] %v11054_v58  ;;  %7755 = vmatprep.mubr.bf16.mxu0 %v11050_v32  ;;  %6322 = vmatprep.mubr.bf16.mxu1 %v11050_v32  ;;  %v3097_v21 = vcombine.high %v2633_v23, %v2633_v23  ;;  %v5400_v9 = vor.u32 %v5399_v59, %v5395_v36  ;;  %v5414_v38 = vshll.u32 %v11054_v58, 16 }
 0x180   : > { %12471 = vst [vmem:[#allocation15_spill] sm:$0xff] %v11052_v26  ;;  %7756 = vmatmul.mubr.bf16.gmra.mrb[40].mxu0 %v10734_v39  ;;  %v5402_v22 = vshll.u32 %v11052_v26, 16  ;;  %6323 = vmatmul.mubr.bf16.gmra.mrb[20].mxu1 %v10734_v39  ;;  %v11077_v54 = vrot.slane %v2633_v23, %v10544_v10  ;;  %v11082_v19 = vpack.c.bf16 %v4375_v37, %v4358_v56  ;;  %v5407_v40 = vshrl.u32 %v10801_v41, 16  ;;  %v9797_v56 = vld [vmem:[%s12429_s4 + $0x180] ss:$8 sps:$4 sm:$0xff]  }
 0x181   : > { %v3111_v14 = vrot.slane %v3097_v21, %v10544_v10  ;;  %v2625_v24 = vadd.f32 %v10729_v53, %v10562_v28  ;;  %v11095_v17 = vmul.f32 0.2, %v11026_v63  ;;  %7916 = vmatprep.subr.bf16.mxu0 %v9784_v18  ;;  %6478 = vmatpush1.bf16.msra.mxu1 %v9791_v55  ;;  %v9805_v23 = vld [vmem:[%s12429_s4 + $0x194] ss:$8 sps:$4 sm:$0xff]   ;;  %v5416_v59 = vrot.slane %v5414_v38, 1  ;;  %v11121_v38 = vpop.f32.mrb[4].mxu1 }
 0x182   : > { %v5404_v30 = vrot.slane %v5402_v22, 1  ;;  %v5412_v53 = vor.u32 %v5411_v33, %v5407_v40  ;;  %6479 = vmatprep.subr.bf16.mxu1 %v9799_v52  ;;  %v3711_v18 = vmul.f32 0.2, %v11077_v54  ;;  %vm3567_vm2 = vcmp.ge.f32.partialorder %v11077_v54, 0.0  ;;  %7917 = vmatpush1.bf16.msra.mxu0 %v9782_v34  ;;  %v9788_v22 = vld [vmem:[%s12429_s4 + $0x460] ss:$8 sps:$4 sm:$0xff]  }
 0x183   : > { %v3113_v36 = vcombine.high %v3111_v14, %v3111_v14  ;;  %vm3569_vm0 = vcmp.ge.f32.partialorder %v3111_v14, 0.0  ;;  %v3713_v1 = vmul.f32 0.2, %v3111_v14  ;;  %v3063_v55 = vcombine.high %v2625_v24, %v2625_v24  ;;  %7918 = vmatprep.subr.bf16.mxu0 %v9790_v15  ;;  %v9224_v34 = vpop.f32.mrb[5].mxu1  ;;  %v9811_v15 = vld [vmem:[%s12429_s4 + $0x1a4] ss:$8 sps:$4 sm:$0xff]  }
 0x184   : > { %v11104_v50 = vsel %vm5357_vm9, %v5400_v9, %v5404_v30  ;;  %v11110_v21 = vrot.slane %v2625_v24, %v10544_v10  ;;  %v2636_v48 = vadd.f32 %v10732_v13, %v10641_v5  ;;  %v2628_v9 = vadd.f32 %v10737_v4, %v10574_v35  ;;  %v9796_v13 = vld [vmem:[%s12429_s4 + $0x474] ss:$8 sps:$4 sm:$0xff]   ;;  %v9803_v4 = vld [vmem:[%s12429_s4 + $0x190] ss:$8 sps:$4 sm:$0xff]  }
 0x185   : > { %12473 = vst [vmem:[#allocation17_spill] sm:$0xff] %v11104_v50  ;;  %7765 = vmatprep.mubr.bf16.mxu0 %v11104_v50  ;;  %6332 = vmatprep.mubr.bf16.mxu1 %v11104_v50  ;;  %vm3570_vm1 = vcmp.ge.f32.partialorder %v3113_v36, 0.0  ;;  %v3714_v37 = vmul.f32 0.2, %v3113_v36  ;;  %v3857_v33 = vsel %vm3569_vm0, %v3111_v14, %v3713_v1  ;;  %v3077_v52 = vrot.slane %v3063_v55, %v10544_v10  ;;  %v9815_v26 = vld [vmem:[%s12429_s4 + $0x1b0] ss:$8 sps:$4 sm:$0xff]  }
 0x186   : > { %6480 = vmatpush1.bf16.msra.mxu1 %v9797_v56  ;;  %v11125_v40 = vcombine.high %v10990_v27, %v10990_v27  ;;  %v3078_v24 = vcombine.high %v11110_v21, %v11110_v21  ;;  %v11137_v27 = vsel %vm5357_vm9, %v5412_v53, %v5416_v59  ;;  %v11149_v1 = vsel %vm3567_vm2, %v11077_v54, %v3711_v18  ;;  %v9794_v18 = vld [vmem:[%s12429_s4 + $0x470] ss:$8 sps:$4 sm:$0xff]  }
 0x187   : > { %v3858_v14 = vsel %vm3570_vm1, %v3113_v36, %v3714_v37  ;;  %6481 = vmatprep.subr.bf16.mxu1 %v9805_v23  ;;  %12474 = vst [vmem:[#allocation18_spill] sm:$0xff] %v11137_v27  ;;  %vm3561_vm3 = vcmp.ge.f32.partialorder %v3077_v52, 0.0  ;;  %v3705_v56 = vmul.f32 0.2, %v3077_v52  ;;  %v11143_v36 = vpop.f32.mrb[6].mxu1  ;;  %v3114_v23 = vcombine.high %v2636_v48, %v2636_v48  ;;  %7919 = vmatpush1.bf16.msra.mxu0 %v9788_v22 }
 0x188   : > { %7766 = vmatmul.mubr.bf16.gmra.mrb[44].mxu0 %v10769_v25  ;;  %v4465_v30 = vcombine.low %v3857_v33, %v3858_v14  ;;  %6333 = vmatmul.mubr.bf16.gmra.mrb[24].mxu1 %v10769_v25  ;;  %vm3560_vm4 = vcmp.ge.f32.partialorder %v3078_v24, 0.0  ;;  %v3704_v53 = vmul.f32 0.2, %v3078_v24  ;;  %v9225_v59 = vpop.f32.mrb[7].mxu1  ;;  %v11155_v37 = vcombine.high %v3077_v52, %v3077_v52  ;;  %v9809_v22 = vld [vmem:[%s12429_s4 + $0x1a0] ss:$8 sps:$4 sm:$0xff]  }
 0x189   : > { %7775 = vmatprep.mubr.bf16.mxu0 %v11137_v27  ;;  %6342 = vmatprep.mubr.bf16.mxu1 %v11137_v27  ;;  %v3121_v33 = vrot.slane %v2636_v48, %v10544_v10  ;;  %v3080_v14 = vcombine.high %v2628_v9, %v2628_v9  ;;  %v11162_v34 = vsel %vm3561_vm3, %v3077_v52, %v3705_v56  ;;  %vm3532_vm5 = vcmp.ge.f32.partialorder %v11026_v63, 0.0  ;;  %v9802_v48 = vld [vmem:[%s12429_s4 + $0x484] ss:$8 sps:$4 sm:$0xff]  }
 0x18a   : > { %v11153_v55 = vrot.slane %v4465_v30, %v10544_v10  ;;  %v3128_v50 = vrot.slane %v3114_v23, %v10544_v10  ;;  %v11166_v59 = vrot.slane %v2628_v9, %v10544_v10  ;;  %7920 = vmatprep.subr.bf16.mxu0 %v9796_v13  ;;  %6482 = vmatpush1.bf16.msra.mxu1 %v9803_v4  ;;  %v9800_v9 = vld [vmem:[%s12429_s4 + $0x480] ss:$8 sps:$4 sm:$0xff]   ;;  %v9808_v4 = vld [vmem:[%s12429_s4 + $0x494] ss:$8 sps:$4 sm:$0xff]   ;;  %vm3562_vm10 = vcmp.ge.f32.partialorder %v11155_v37, 0.0 }
 0x18b   : > { %v3848_v52 = vsel %vm3560_vm4, %v3078_v24, %v3704_v53  ;;  %v3129_v30 = vcombine.high %v3121_v33, %v3121_v33  ;;  %vm3571_vm6 = vcmp.ge.f32.partialorder %v3121_v33, 0.0  ;;  %v3715_v56 = vmul.f32 0.2, %v3121_v33  ;;  %6483 = vmatprep.subr.bf16.mxu1 %v9811_v15  ;;  %v9817_v24 = vld [vmem:[%s12429_s4 + $0x1b4] ss:$8 sps:$4 sm:$0xff]   ;;  %7921 = vmatpush1.bf16.msra.mxu0 %v9794_v18  ;;  %v11187_v15 = vpop.f32.mrb[8].mxu1 }
 0x18c   : > { %v3130_v13 = vcombine.high %v3128_v50, %v3128_v50  ;;  %vm3573_vm7 = vcmp.ge.f32.partialorder %v3128_v50, 0.0  ;;  %v3717_v23 = vmul.f32 0.2, %v3128_v50  ;;  %v3094_v27 = vrot.slane %v3080_v14, %v10544_v10  ;;  %7922 = vmatprep.subr.bf16.mxu0 %v9802_v48  ;;  %v9228_v12 = vpop.f32.mrb[9].mxu1  ;;  %v9823_v48 = vld [vmem:[%s12429_s4 + $0x1c4] ss:$8 sps:$4 sm:$0xff]  }
 0x18d   : > { %vm3572_vm8 = vcmp.ge.f32.partialorder %v3129_v30, 0.0  ;;  %v3716_v53 = vmul.f32 0.2, %v3129_v30  ;;  %v3859_v32 = vsel %vm3571_vm6, %v3121_v33, %v3715_v56  ;;  %v4424_v47 = vcombine.low %v3848_v52, %v11162_v34  ;;  %v9806_v34 = vld [vmem:[%s12429_s4 + $0x490] ss:$8 sps:$4 sm:$0xff]   ;;  %v5091_v52 = vpop.f32.mrb[10].mxu1 }
 0x18e   : > { %vm3574_vm11 = vcmp.ge.f32.partialorder %v3130_v13, 0.0  ;;  %v3718_v14 = vmul.f32 0.2, %v3130_v13  ;;  %v3095_v58 = vcombine.high %v11166_v59, %v11166_v59  ;;  %6484 = vmatpush1.bf16.msra.mxu1 %v9809_v22  ;;  %v11196_v56 = vsel %vm3573_vm7, %v3128_v50, %v3717_v23  ;;  %v9814_v22 = vld [vmem:[%s12429_s4 + $0x4a4] ss:$8 sps:$4 sm:$0xff]  }
 0x18f   : > { %v3860_v33 = vsel %vm3572_vm8, %v3129_v30, %v3716_v53  ;;  %v3096_v18 = vcombine.high %v3094_v27, %v3094_v27  ;;  %vm3563_vm12 = vcmp.ge.f32.partialorder %v11166_v59, 0.0  ;;  %vm3541_vm13 = vcmp.ge.f32.partialorder %v10822_v11, 0.0  ;;  %6485 = vmatprep.subr.bf16.mxu1 %v9817_v24  ;;  %7923 = vmatpush1.bf16.msra.mxu0 %v9800_v9 }
 0x190   : > { %7776 = vmatmul.mubr.bf16.gmra.mrb[48].mxu0 %v10801_v41  ;;  %6343 = vmatmul.mubr.bf16.gmra.mrb[28].mxu1 %v10801_v41  ;;  %v4466_v12 = vcombine.low %v3859_v32, %v3860_v33  ;;  %vm3564_vm14 = vcmp.ge.f32.partialorder %v3095_v58, 0.0  ;;  %vm3565_vm15 = vcmp.ge.f32.partialorder %v3094_v27, 0.0  ;;  %v3706_v50 = vmul.f32 0.2, %v11155_v37  ;;  %v9229_v41 = vpop.f32.mrb[11].mxu1 }
 0x191   : > { %v11213_v30 = vsel %vm3574_vm11, %v3130_v13, %v3718_v14  ;;  %vm3566_vm0 = vcmp.ge.f32.partialorder %v3096_v18, 0.0  ;;  %v3707_v23 = vmul.f32 0.2, %v11166_v59  ;;  %v3708_v53 = vmul.f32 0.2, %v3095_v58  ;;  %7924 = vmatprep.subr.bf16.mxu0 %v9808_v4 }
 0x192   : > { %v11217_v32 = vrot.slane %v4466_v12, %v10544_v10  ;;  %v3709_v33 = vmul.f32 0.2, %v3094_v27  ;;  %v3710_v25 = vmul.f32 0.2, %v3096_v18  ;;  %v3850_v62 = vsel %vm3562_vm10, %v11155_v37, %v3706_v50  ;;  %6486 = vmatpush1.bf16.msra.mxu1 %v9815_v26  ;;  %v9821_v13 = vld [vmem:[%s12429_s4 + $0x1c0] ss:$8 sps:$4 sm:$0xff]  }
 0x193   : > { %v4432_v24 = vrot.slane %v4424_v47, %v10544_v10  ;;  %v3851_v41 = vsel %vm3563_vm12, %v11166_v59, %v3707_v23  ;;  %v3852_v9 = vsel %vm3564_vm14, %v3095_v58, %v3708_v53  ;;  %v3820_v14 = vsel %vm3532_vm5, %v11026_v63, %v11095_v17  ;;  %6487 = vmatprep.subr.bf16.mxu1 %v9823_v48  ;;  %v9829_v26 = vld [vmem:[%s12429_s4 + $0x1d4] ss:$8 sps:$4 sm:$0xff]   ;;  %v9812_v17 = vld [vmem:[%s12429_s4 + $0x4a0] ss:$8 sps:$4 sm:$0xff]  }
 0x194   : > { %v4481_v37 = vcombine.low %v11153_v55, %v11217_v32  ;;  %v3853_v47 = vsel %vm3565_vm15, %v3094_v27, %v3709_v33  ;;  %v3854_v4 = vsel %vm3566_vm0, %v3096_v18, %v3710_v25  ;;  %v4425_v59 = vcombine.low %v3850_v62, %v3851_v41  ;;  %7925 = vmatpush1.bf16.msra.mxu0 %v9806_v34 }
 0x195   : > { %v4482_v58 = vcombine.low %v11196_v56, %v11213_v30  ;;  %v4441_v12 = vcombine.low %v3852_v9, %v3853_v47  ;;  %v4442_v50 = vcombine.low %v3854_v4, %v11149_v1  ;;  %v4300_v63 = vrot.slane %v3820_v14, %v10544_v10  ;;  %7926 = vmatprep.subr.bf16.mxu0 %v9814_v22  ;;  %v9820_v1 = vld [vmem:[%s12429_s4 + $0x4b4] ss:$8 sps:$4 sm:$0xff]   ;;  %v9827_v56 = vld [vmem:[%s12429_s4 + $0x1d0] ss:$8 sps:$4 sm:$0xff]  }
 0x196   : > { %v4439_v48 = vrot.slane %v4425_v59, %v10544_v10  ;;  %v5421_v27 = vshll.u32 %v10874_v60, 16  ;;  %v2649_v25 = vadd.f32 %v10762_v8, %v10584_v42  ;;  %v2641_v62 = vadd.f32 %v10764_v16, %v10587_v43  ;;  %6488 = vmatpush1.bf16.msra.mxu1 %v9821_v13  ;;  %v9835_v16 = vld [vmem:[%s12429_s4 + $0x1e4] ss:$8 sps:$4 sm:$0xff]   ;;  %v9818_v14 = vld [vmem:[%s12429_s4 + $0x4b0] ss:$8 sps:$4 sm:$0xff]  }
 0x197   : > { %v4449_v18 = vrot.slane %v4441_v12, %v10544_v10  ;;  %v4456_v34 = vrot.slane %v4442_v50, %v10544_v10  ;;  %v11262_v52 = vpack.c.bf16 %v4300_v63, %v4300_v63  ;;  %v5419_v8 = vshrl.u32 %v10874_v60, 16  ;;  %6489 = vmatprep.subr.bf16.mxu1 %v9829_v26 }
 0x198   : > { %v4440_v22 = vcombine.low %v4432_v24, %v4439_v48  ;;  %v5423_v30 = vrot.slane %v5421_v27, 1  ;;  %v3165_v23 = vcombine.high %v2649_v25, %v2649_v25  ;;  %v3172_v53 = vrot.slane %v2649_v25, %v10544_v10  ;;  %7927 = vmatpush1.bf16.msra.mxu0 %v9812_v17  ;;  %v9824_v17 = vld [vmem:[%s12429_s4 + $0x4c0] ss:$8 sps:$4 sm:$0xff]   ;;  %v9826_v48 = vld [vmem:[%s12429_s4 + $0x4c4] ss:$8 sps:$4 sm:$0xff]  }
 0x199   : > { %v4457_v33 = vcombine.low %v4449_v18, %v4456_v34  ;;  %v5426_v13 = vshll.u32 %v11262_v52, 16  ;;  %v3131_v41 = vcombine.high %v2641_v62, %v2641_v62  ;;  %v3138_v9 = vrot.slane %v2641_v62, %v10544_v10  ;;  %7928 = vmatprep.subr.bf16.mxu0 %v9820_v1  ;;  %v9841_v1 = vld [vmem:[%s12429_s4 + $0x1f4] ss:$8 sps:$4 sm:$0xff]  }
 0x19a   : > { %v11275_v26 = vmul.f32 0.2, %v11110_v21  ;;  %v5424_v47 = vor.u32 %v5423_v30, %v5419_v8  ;;  %v11278_v24 = vrot.slane %v3165_v23, %v10544_v10  ;;  %v3180_v4 = vcombine.high %v3172_v53, %v3172_v53  ;;  %6490 = vmatpush1.bf16.msra.mxu1 %v9827_v56  ;;  %v9832_v8 = vld [vmem:[%s12429_s4 + $0x4d4] ss:$8 sps:$4 sm:$0xff]  }
 0x19b   : > { %v11282_v59 = vcombine.high %v11077_v54, %v11077_v54  ;;  %v11284_v12 = vpack.c.bf16 %v4457_v33, %v4440_v22  ;;  %v5428_v50 = vrot.slane %v5426_v13, 1  ;;  %v3829_v63 = vsel %vm3541_vm13, %v10822_v11, %v11065_v45  ;;  %v9833_v54 = vld [vmem:[%s12429_s4 + $0x1e0] ss:$8 sps:$4 sm:$0xff]   ;;  %6491 = vmatprep.subr.bf16.mxu1 %v9835_v16 }
 0x19c   : > { %vm3584_vm1 = vcmp.ge.f32.partialorder %v3180_v4, 0.0  ;;  %vm3585_vm2 = vcmp.ge.f32.partialorder %v11278_v24, 0.0  ;;  %v3727_v27 = vmul.f32 0.2, %v3172_v53  ;;  %v3728_v25 = vmul.f32 0.2, %v3180_v4  ;;  %7929 = vmatpush1.bf16.msra.mxu0 %v9818_v14 }
 0x19d   : > { %v11301_v11 = vsel %vm5357_vm9, %v5424_v47, %v5428_v50  ;;  %vm3583_vm3 = vcmp.ge.f32.partialorder %v3172_v53, 0.0  ;;  %v3729_v45 = vmul.f32 0.2, %v11278_v24  ;;  %v3146_v62 = vcombine.high %v3138_v9, %v3138_v9  ;;  %7930 = vmatprep.subr.bf16.mxu0 %v9826_v48  ;;  %v12475_v50 = vld [vmem:[#allocation5_spill] sm:$0xff] }
 0x19e   : > { %v4490_v56 = vrot.slane %v4482_v58, %v10544_v10  ;;  %7785 = vmatprep.mubr.bf16.mxu0 %v11301_v11  ;;  %v3872_v18 = vsel %vm3584_vm1, %v3180_v4, %v3728_v25  ;;  %v11310_v34 = vrot.slane %v3131_v41, %v10544_v10  ;;  %vm3575_vm4 = vcmp.ge.f32.partialorder %v3138_v9, 0.0  ;;  %6352 = vmatprep.mubr.bf16.mxu1 %v11301_v11  ;;  %v9839_v41 = vld [vmem:[%s12429_s4 + $0x1f0] ss:$8 sps:$4 sm:$0xff]  }
 0x19f   : > { %v3873_v16 = vsel %vm3585_vm2, %v11278_v24, %v3729_v45  ;;  %vm3576_vm5 = vcmp.ge.f32.partialorder %v3146_v62, 0.0  ;;  %v3719_v22 = vmul.f32 0.2, %v3138_v9  ;;  %v3720_v58 = vmul.f32 0.2, %v3146_v62  ;;  %7786 = vmatmul.mubr.bf16.gmra.mrb[52].mxu0 %v10874_v60  ;;  %6353 = vmatmul.mubr.bf16.gmra.mrb[32].mxu1 %v10874_v60 }
 0x1a0   : > { %v11322_v30 = vsel %vm3583_vm3, %v3172_v53, %v3727_v27  ;;  %v4524_v23 = vcombine.low %v3872_v18, %v3873_v16  ;;  %v4341_v33 = vrot.slane %v3829_v63, %v10544_v10  ;;  %v5431_v13 = vshrl.u32 %v10886_v57, 16  ;;  %6492 = vmatpush1.bf16.msra.mxu1 %v9833_v54  ;;  %7931 = vmatpush1.bf16.msra.mxu0 %v9824_v17  ;;  %v9830_v63 = vld [vmem:[%s12429_s4 + $0x4d0] ss:$8 sps:$4 sm:$0xff]   ;;  %v9838_v17 = vld [vmem:[%s12429_s4 + $0x4e4] ss:$8 sps:$4 sm:$0xff]  }
 0x1a1   : > { %v3863_v14 = vsel %vm3575_vm4, %v3138_v9, %v3719_v22  ;;  %v3864_v47 = vsel %vm3576_vm5, %v3146_v62, %v3720_v58  ;;  %v5433_v4 = vshll.u32 %v10886_v57, 16  ;;  %v2652_v53 = vadd.f32 %v12475_v50, %v10566_v29  ;;  %6493 = vmatprep.subr.bf16.mxu1 %v9841_v1  ;;  %7932 = vmatprep.subr.bf16.mxu0 %v9832_v8 }
 0x1a2   : > { %v11338_v48 = vcombine.high %v11310_v34, %v11310_v34  ;;  %v4483_v54 = vcombine.low %v3863_v14, %v3864_v47  ;;  %v11340_v27 = vpack.c.bf16 %v4341_v33, %v4341_v33  ;;  %v2644_v9 = vadd.f32 %v10775_v6, %v10584_v42 }
 0x1a3   : > { %v11348_v25 = vrot.slane %v4524_v23, %v10544_v10  ;;  %v5435_v45 = vrot.slane %v5433_v4, 1  ;;  %v3182_v62 = vcombine.high %v2652_v53, %v2652_v53  ;;  %v3189_v1 = vrot.slane %v2652_v53, %v10544_v10  ;;  %v9847_v23 = vld [vmem:[%s12429_s4 + $0x204] ss:$8 sps:$4 sm:$0xff]  }
 0x1a4   : > { %v4497_v18 = vrot.slane %v4483_v54, %v10544_v10  ;;  %v5438_v16 = vshll.u32 %v11340_v27, 16  ;;  %v3148_v22 = vcombine.high %v2644_v9, %v2644_v9  ;;  %v3155_v58 = vrot.slane %v2644_v9, %v10544_v10  ;;  %6494 = vmatpush1.bf16.msra.mxu1 %v9839_v41  ;;  %7933 = vmatpush1.bf16.msra.mxu0 %v9830_v63 }
 0x1a5   : > { %v5436_v6 = vor.u32 %v5435_v45, %v5431_v13  ;;  %v3196_v8 = vrot.slane %v3182_v62, %v10544_v10  ;;  %v3197_v33 = vcombine.high %v3189_v1, %v3189_v1  ;;  %vm3587_vm6 = vcmp.ge.f32.partialorder %v3189_v1, 0.0  ;;  %7934 = vmatprep.subr.bf16.mxu0 %v9838_v17  ;;  %v9836_v13 = vld [vmem:[%s12429_s4 + $0x4e0] ss:$8 sps:$4 sm:$0xff]   ;;  %6656 = vmatprep.subr.bf16.mxu1 %v9847_v23  ;;  %v9844_v17 = vld [vmem:[%s12429_s4 + $0x4f4] ss:$8 sps:$4 sm:$0xff]  }
 0x1a6   : > { %v4498_v14 = vcombine.low %v4490_v56, %v4497_v18  ;;  %v5440_v47 = vrot.slane %v5438_v16, 1  ;;  %v3731_v4 = vmul.f32 0.2, %v3189_v1  ;;  %v3162_v50 = vrot.slane %v3148_v22, %v10544_v10  ;;  %v9842_v22 = vld [vmem:[%s12429_s4 + $0x4f0] ss:$8 sps:$4 sm:$0xff]  }
 0x1a7   : > { %v3198_v53 = vcombine.high %v3196_v8, %v3196_v8  ;;  %vm3588_vm7 = vcmp.ge.f32.partialorder %v3197_v33, 0.0  ;;  %vm3589_vm8 = vcmp.ge.f32.partialorder %v3196_v8, 0.0  ;;  %v3732_v41 = vmul.f32 0.2, %v3197_v33 }
 0x1a8   : > { %vm3559_vm10 = vcmp.ge.f32.partialorder %v11110_v21, 0.0  ;;  %v11366_v56 = vpack.c.bf16 %v4498_v14, %v4481_v37  ;;  %v11369_v63 = vsel %vm5357_vm9, %v5436_v6, %v5440_v47  ;;  %v3733_v54 = vmul.f32 0.2, %v3196_v8  ;;  %7935 = vmatpush1.bf16.msra.mxu0 %v9836_v13  ;;  %v12477_v13 = vld [vmem:[#allocation6_spill] sm:$0xff] }
 0x1a9   : > { %12476 = vst [vmem:[#allocation5_spill] sm:$0xff] %v11369_v63  ;;  %v3875_v9 = vsel %vm3587_vm6, %v3189_v1, %v3731_v4  ;;  %7795 = vmatprep.mubr.bf16.mxu0 %v11369_v63  ;;  %vm3590_vm11 = vcmp.ge.f32.partialorder %v3198_v53, 0.0  ;;  %v3734_v45 = vmul.f32 0.2, %v3198_v53  ;;  %v3876_v62 = vsel %vm3588_vm7, %v3197_v33, %v3732_v41  ;;  %6362 = vmatprep.mubr.bf16.mxu1 %v11369_v63  ;;  %v9850_v33 = vld [vmem:[%s12429_s4 + $0x504] ss:$8 sps:$4 sm:$0xff]  }
 0x1aa   : > { %v3163_v18 = vcombine.high %v3155_v58, %v3155_v58  ;;  %v3877_v55 = vsel %vm3589_vm8, %v3196_v8, %v3733_v54  ;;  %v4547_v32 = vcombine.low %v3875_v9, %v3876_v62  ;;  %v3164_v37 = vcombine.high %v3162_v50, %v3162_v50  ;;  %7796 = vmatmul.mubr.bf16.gmra.mrb[56].mxu0 %v10886_v57  ;;  %v12478_v9 = vld [vmem:[#allocation7_spill] sm:$0xff] }
 0x1ab   : > { %vm3578_vm12 = vcmp.ge.f32.partialorder %v11338_v48, 0.0  ;;  %6363 = vmatmul.mubr.bf16.gmra.mrb[36].mxu1 %v10886_v57  ;;  %v3878_v1 = vsel %vm3590_vm11, %v3198_v53, %v3734_v45  ;;  %vm3579_vm13 = vcmp.ge.f32.partialorder %v3155_v58, 0.0  ;;  %v3722_v16 = vmul.f32 0.2, %v11338_v48  ;;  %7936 = vmatprep.subr.bf16.mxu0 %v9844_v17 }
 0x1ac   : > { %vm3580_vm14 = vcmp.ge.f32.partialorder %v3163_v18, 0.0  ;;  %v4548_v6 = vcombine.low %v3877_v55, %v3878_v1  ;;  %vm3581_vm15 = vcmp.ge.f32.partialorder %v3162_v50, 0.0  ;;  %vm3582_vm0 = vcmp.ge.f32.partialorder %v3164_v37, 0.0  ;;  %7937 = vmatpush1.bf16.msra.mxu0 %v9842_v22 }
 0x1ad   : > { %v3723_v8 = vmul.f32 0.2, %v3155_v58  ;;  %v3724_v23 = vmul.f32 0.2, %v3163_v18  ;;  %v3725_v14 = vmul.f32 0.2, %v3162_v50  ;;  %v3866_v4 = vsel %vm3578_vm12, %v11338_v48, %v3722_v16  ;;  %8099 = vmatprep.subr.bf16.mxu0 %v9850_v33 }
 0x1ae   : > { %v3726_v47 = vmul.f32 0.2, %v3164_v37  ;;  %v11392_v53 = vrot.slane %v4547_v32, %v10544_v10  ;;  %v2665_v54 = vadd.f32 %v12477_v13, %v10574_v35  ;;  %v2657_v17 = vadd.f32 %v12478_v9, %v10566_v29 }
 0x1af   : > { %v3867_v41 = vsel %vm3579_vm13, %v3155_v58, %v3723_v8  ;;  %v3868_v45 = vsel %vm3580_vm14, %v3163_v18, %v3724_v23  ;;  %v3869_v62 = vsel %vm3581_vm15, %v3162_v50, %v3725_v14  ;;  %v11401_v63 = vrot.slane %v4548_v6, %v10544_v10 }
 0x1b0   : > { %v3870_v55 = vsel %vm3582_vm0, %v3164_v37, %v3726_v47  ;;  %v4506_v1 = vcombine.low %v3866_v4, %v3867_v41  ;;  %v4507_v48 = vcombine.low %v3868_v45, %v3869_v62  ;;  %v3233_v16 = vcombine.high %v2665_v54, %v2665_v54 }
 0x1b1   : > { %v4523_v32 = vcombine.low %v3870_v55, %v11322_v30  ;;  %v11405_v58 = vmul.f32 0.2, %v11282_v59  ;;  %v11409_v13 = vrot.slane %v2665_v54, %v10544_v10  ;;  %v3199_v50 = vcombine.high %v2657_v17, %v2657_v17 }
 0x1b2   : > { %v4514_v8 = vrot.slane %v4506_v1, %v10544_v10  ;;  %v4521_v18 = vrot.slane %v4507_v48, %v10544_v10  ;;  %v3247_v22 = vrot.slane %v3233_v16, %v10544_v10  ;;  %v3206_v6 = vrot.slane %v2657_v17, %v10544_v10 }
 0x1b3   : > { %v4531_v37 = vrot.slane %v4523_v32, %v10544_v10  ;;  %v11419_v30 = vsel %vm3559_vm10, %v11110_v21, %v11275_v26  ;;  %v11423_v33 = vcombine.high %v11278_v24, %v11278_v24  ;;  %v3248_v23 = vcombine.high %v11409_v13, %v11409_v13 }
 0x1b4   : > { %v3213_v14 = vrot.slane %v3199_v50, %v10544_v10  ;;  %v4563_v47 = vcombine.low %v11392_v53, %v11401_v63  ;;  %v4522_v4 = vcombine.low %v4514_v8, %v4521_v18  ;;  %vm3601_vm1 = vcmp.ge.f32.partialorder %v3247_v22, 0.0 }
 0x1b5   : > { %v4539_v41 = vcombine.low %v4531_v37, %v11348_v25  ;;  %vm3600_vm2 = vcmp.ge.f32.partialorder %v3248_v23, 0.0  ;;  %v3744_v54 = vmul.f32 0.2, %v3248_v23  ;;  %v3745_v21 = vmul.f32 0.2, %v3247_v22 }
 0x1b6   : > { %vm3550_vm3 = vcmp.ge.f32.partialorder %v11125_v40, 0.0  ;;  %v3214_v24 = vcombine.high %v3206_v6, %v3206_v6  ;;  %v3215_v9 = vcombine.high %v3213_v14, %v3213_v14  ;;  %vm3591_vm4 = vcmp.ge.f32.partialorder %v3206_v6, 0.0 }
 0x1b7   : > { %v11432_v26 = vpack.c.bf16 %v4539_v41, %v4522_v4  ;;  %v3249_v17 = vcombine.high %v3247_v22, %v3247_v22  ;;  %v3888_v45 = vsel %vm3600_vm2, %v3248_v23, %v3744_v54  ;;  %v3889_v62 = vsel %vm3601_vm1, %v3247_v22, %v3745_v21  ;;  %v12479_v54 = vld [vmem:[#allocation9_spill] sm:$0xff] }
 0x1b8   : > { %v3735_v55 = vmul.f32 0.2, %v3206_v6  ;;  %vm3592_vm5 = vcmp.ge.f32.partialorder %v3214_v24, 0.0  ;;  %vm3593_vm6 = vcmp.ge.f32.partialorder %v3213_v14, 0.0  ;;  %vm3594_vm7 = vcmp.ge.f32.partialorder %v3215_v9, 0.0 }
 0x1b9   : > { %v3736_v63 = vmul.f32 0.2, %v3214_v24  ;;  %v3737_v25 = vmul.f32 0.2, %v3213_v14  ;;  %v3738_v53 = vmul.f32 0.2, %v3215_v9  ;;  %v4605_v32 = vcombine.low %v3888_v45, %v3889_v62 }
 0x1ba   : > { %v3879_v1 = vsel %vm3591_vm4, %v3206_v6, %v3735_v55  ;;  %v3694_v48 = vmul.f32 0.2, %v11125_v40  ;;  %vm3599_vm8 = vcmp.ge.f32.partialorder %v11409_v13, 0.0  ;;  %v5443_v8 = vshrl.u32 %v11082_v19, 16  ;;  %v12480_v62 = vld [vmem:[#allocation10_spill] sm:$0xff] }
 0x1bb   : > { %v3880_v16 = vsel %vm3592_vm5, %v3214_v24, %v3736_v63  ;;  %v5445_v50 = vshll.u32 %v11082_v19, 16  ;;  %v3881_v18 = vsel %vm3593_vm6, %v3213_v14, %v3737_v25  ;;  %v3882_v37 = vsel %vm3594_vm7, %v3215_v9, %v3738_v53 }
 0x1bc   : > { %v4564_v22 = vcombine.low %v3879_v1, %v3880_v16  ;;  %v3838_v23 = vsel %vm3550_vm3, %v11125_v40, %v3694_v48  ;;  %v4565_v4 = vcombine.low %v3881_v18, %v3882_v37  ;;  %v2668_v21 = vadd.f32 %v12479_v54, %v10596_v0 }
 0x1bd   : > { %v4382_v6 = vrot.slane %v3838_v23, %v10544_v10  ;;  %v5447_v41 = vrot.slane %v5445_v50, 1  ;;  %vm3602_vm10 = vcmp.ge.f32.partialorder %v3249_v17, 0.0  ;;  %v3746_v45 = vmul.f32 0.2, %v3249_v17 }
 0x1be   : > { %v4572_v24 = vrot.slane %v4564_v22, %v10544_v10  ;;  %v2660_v14 = vadd.f32 %v12480_v62, %v10562_v28  ;;  %v3743_v9 = vmul.f32 0.2, %v11409_v13  ;;  %v4579_v55 = vrot.slane %v4565_v4, %v10544_v10 }
 0x1bf   : > { %v11449_v63 = vpack.c.bf16 %v4382_v6, %v4382_v6  ;;  %v3250_v40 = vcombine.high %v2668_v21, %v2668_v21  ;;  %v11452_v25 = vrot.slane %v4605_v32, %v10544_v10  ;;  %v5448_v53 = vor.u32 %v5447_v41, %v5443_v8 }
 0x1c0   : > { %v3257_v0 = vrot.slane %v2668_v21, %v10544_v10  ;;  %v3216_v1 = vcombine.high %v2660_v14, %v2660_v14  ;;  %v4580_v48 = vcombine.low %v4572_v24, %v4579_v55  ;;  %v3890_v18 = vsel %vm3602_vm10, %v3249_v17, %v3746_v45 }
 0x1c1   : > { %v5450_v16 = vshll.u32 %v11449_v63, 16  ;;  %v3264_v50 = vrot.slane %v3250_v40, %v10544_v10  ;;  %v3223_v22 = vrot.slane %v2660_v14, %v10544_v10  ;;  %v4423_v21 = vrot.slane %v11419_v30, %v10544_v10 }
 0x1c2   : > { %vm3603_vm11 = vcmp.ge.f32.partialorder %v3257_v0, 0.0  ;;  %v3747_v37 = vmul.f32 0.2, %v3257_v0  ;;  %v3230_v23 = vrot.slane %v3216_v1, %v10544_v10  ;;  %v11459_v4 = vpack.c.bf16 %v4580_v48, %v4563_v47 }
 0x1c3   : > { %v5452_v32 = vrot.slane %v5450_v16, 1  ;;  %v3266_v6 = vcombine.high %v3264_v50, %v3264_v50  ;;  %vm3605_vm12 = vcmp.ge.f32.partialorder %v3264_v50, 0.0  ;;  %v3749_v8 = vmul.f32 0.2, %v3264_v50 }
 0x1c4   : > { %v3891_v41 = vsel %vm3603_vm11, %v3257_v0, %v3747_v37  ;;  %v3231_v54 = vcombine.high %v3223_v22, %v3223_v22  ;;  %v11467_v62 = vmul.f32 0.2, %v11310_v34  ;;  %v3887_v47 = vsel %vm3599_vm8, %v11409_v13, %v3743_v9 }
 0x1c5   : > { %v11464_v24 = vsel %vm5357_vm9, %v5448_v53, %v5452_v32  ;;  %vm3606_vm13 = vcmp.ge.f32.partialorder %v3266_v6, 0.0  ;;  %v3750_v17 = vmul.f32 0.2, %v3266_v6  ;;  %v4606_v45 = vcombine.low %v3890_v18, %v3891_v41 }
 0x1c6   : > { %12481 = vst [vmem:[#allocation6_spill] sm:$0xff] %v11464_v24  ;;  %7805 = vmatprep.mubr.bf16.mxu0 %v11464_v24  ;;  %v3893_v14 = vsel %vm3605_vm12, %v3264_v50, %v3749_v8  ;;  %v3232_v55 = vcombine.high %v3230_v23, %v3230_v23  ;;  %6372 = vmatprep.mubr.bf16.mxu1 %v11464_v24  ;;  %vm3596_vm14 = vcmp.ge.f32.partialorder %v3231_v54, 0.0  ;;  %vm3597_vm15 = vcmp.ge.f32.partialorder %v3230_v23, 0.0 }
 0x1c7   : > { %v3894_v30 = vsel %vm3606_vm13, %v3266_v6, %v3750_v17  ;;  %v4620_v40 = vrot.slane %v4606_v45, %v10544_v10  ;;  %7806 = vmatmul.mubr.bf16.gmra.mrb[60].mxu0 %v11082_v19  ;;  %6373 = vmatmul.mubr.bf16.gmra.mrb[40].mxu1 %v11082_v19  ;;  %vm3595_vm0 = vcmp.ge.f32.partialorder %v3223_v22, 0.0  ;;  %v3740_v53 = vmul.f32 0.2, %v3231_v54 }
 0x1c8   : > { %vm3598_vm1 = vcmp.ge.f32.partialorder %v3232_v55, 0.0  ;;  %v3741_v1 = vmul.f32 0.2, %v3230_v23  ;;  %v3739_v9 = vmul.f32 0.2, %v3223_v22  ;;  %v11478_v16 = vpack.c.bf16 %v4423_v21, %v4423_v21 }
 0x1c9   : > { %v4621_v13 = vcombine.low %v11452_v25, %v4620_v40  ;;  %v3742_v48 = vmul.f32 0.2, %v3232_v55  ;;  %v4629_v50 = vcombine.low %v3893_v14, %v3894_v30  ;;  %v3884_v18 = vsel %vm3596_vm14, %v3231_v54, %v3740_v53 }
 0x1ca   : > { %v3885_v37 = vsel %vm3597_vm15, %v3230_v23, %v3741_v1  ;;  %v5455_v32 = vshrl.u32 %v11016_v46, 16  ;;  %v5457_v41 = vshll.u32 %v11016_v46, 16  ;;  %v5462_v17 = vshll.u32 %v11478_v16, 16 }
 0x1cb   : > { %v3886_v6 = vsel %vm3598_vm1, %v3232_v55, %v3742_v48  ;;  %v4588_v8 = vcombine.low %v3884_v18, %v3885_v37  ;;  %v2681_v24 = vadd.f32 %v10834_v44, %v10584_v42  ;;  %v2673_v25 = vadd.f32 %v10852_v61, %v10641_v5 }
 0x1cc   : > { %v4589_v45 = vcombine.low %v3886_v6, %v3887_v47  ;;  %v2684_v21 = vadd.f32 %v10866_v51, %v10584_v42  ;;  %v11489_v54 = vcombine.high %v3257_v0, %v3257_v0  ;;  %v5459_v14 = vrot.slane %v5457_v41, 1 }
 0x1cd   : > { %v4596_v23 = vrot.slane %v4588_v8, %v10544_v10  ;;  %v5464_v55 = vrot.slane %v5462_v17, 1  ;;  %v3301_v40 = vcombine.high %v2681_v24, %v2681_v24  ;;  %v3308_v47 = vrot.slane %v2681_v24, %v10544_v10 }
 0x1ce   : > { %v4603_v30 = vrot.slane %v4589_v45, %v10544_v10  ;;  %v3267_v53 = vcombine.high %v2673_v25, %v2673_v25  ;;  %v11495_v44 = vrot.slane %v4629_v50, %v10544_v10  ;;  %v11498_v5 = vsel %vm3595_vm0, %v3223_v22, %v3739_v9 }
 0x1cf   : > { %v5460_v61 = vor.u32 %v5459_v14, %v5455_v32  ;;  %v3274_v42 = vrot.slane %v2673_v25, %v10544_v10  ;;  %v3315_v0 = vrot.slane %v3301_v40, %v10544_v10  ;;  %v3316_v1 = vcombine.high %v3308_v47, %v3308_v47 }
 0x1d0   : > { %v4604_v51 = vcombine.low %v4596_v23, %v4603_v30  ;;  %v3318_v48 = vcombine.high %v2684_v21, %v2684_v21  ;;  %v3281_v24 = vrot.slane %v3267_v53, %v10544_v10  ;;  %v3325_v50 = vrot.slane %v2684_v21, %v10544_v10 }
 0x1d1   : > { %v11503_v18 = vsel %vm5357_vm9, %v5460_v61, %v5464_v55  ;;  %v3282_v37 = vcombine.high %v3274_v42, %v3274_v42  ;;  %vm3615_vm2 = vcmp.ge.f32.partialorder %v3308_v47, 0.0  ;;  %vm3616_vm3 = vcmp.ge.f32.partialorder %v3316_v1, 0.0 }
 0x1d2   : > { %12482 = vst [vmem:[#allocation7_spill] sm:$0xff] %v11503_v18  ;;  %v11507_v6 = vpack.c.bf16 %v4621_v13, %v4604_v51  ;;  %7815 = vmatprep.mubr.bf16.mxu0 %v11503_v18  ;;  %v3759_v22 = vmul.f32 0.2, %v3308_v47  ;;  %6382 = vmatprep.mubr.bf16.mxu1 %v11503_v18  ;;  %vm3617_vm4 = vcmp.ge.f32.partialorder %v3315_v0, 0.0  ;;  %v3760_v9 = vmul.f32 0.2, %v3316_v1 }
 0x1d3   : > { %v3761_v32 = vmul.f32 0.2, %v3315_v0  ;;  %v3283_v8 = vcombine.high %v3281_v24, %v3281_v24  ;;  %7816 = vmatmul.mubr.bf16.gmra.mrb[64].mxu0 %v11016_v46  ;;  %6383 = vmatmul.mubr.bf16.gmra.mrb[44].mxu1 %v11016_v46  ;;  %v3317_v41 = vcombine.high %v3315_v0, %v3315_v0  ;;  %vm3607_vm5 = vcmp.ge.f32.partialorder %v3274_v42, 0.0 }
 0x1d4   : > { %vm3608_vm6 = vcmp.ge.f32.partialorder %v3282_v37, 0.0  ;;  %v3751_v13 = vmul.f32 0.2, %v3274_v42  ;;  %v3904_v17 = vsel %vm3616_vm3, %v3316_v1, %v3760_v9  ;;  %vm3609_vm7 = vcmp.ge.f32.partialorder %v3281_v24, 0.0 }
 0x1d5   : > { %vm3610_vm8 = vcmp.ge.f32.partialorder %v3283_v8, 0.0  ;;  %v3752_v45 = vmul.f32 0.2, %v3282_v37  ;;  %v3905_v25 = vsel %vm3617_vm4, %v3315_v0, %v3761_v32  ;;  %v3753_v21 = vmul.f32 0.2, %v3281_v24 }
 0x1d6   : > { %v3754_v23 = vmul.f32 0.2, %v3283_v8  ;;  %v3895_v14 = vsel %vm3607_vm5, %v3274_v42, %v3751_v13  ;;  %v11514_v30 = vrot.slane %v3318_v48, %v10544_v10  ;;  %v3333_v40 = vcombine.high %v3325_v50, %v3325_v50 }
 0x1d7   : > { %v3896_v55 = vsel %vm3608_vm6, %v3282_v37, %v3752_v45  ;;  %v2676_v53 = vadd.f32 %v10884_v49, %v10587_v43  ;;  %vm3577_vm10 = vcmp.ge.f32.partialorder %v11310_v34, 0.0  ;;  %v3903_v61 = vsel %vm3615_vm2, %v3308_v47, %v3759_v22 }
 0x1d8   : > { %v3897_v51 = vsel %vm3609_vm7, %v3281_v24, %v3753_v21  ;;  %v3898_v1 = vsel %vm3610_vm8, %v3283_v8, %v3754_v23  ;;  %v4630_v9 = vcombine.low %v3895_v14, %v3896_v55  ;;  %v4671_v18 = vcombine.low %v3904_v17, %v3905_v25 }
 0x1d9   : > { %vm3618_vm11 = vcmp.ge.f32.partialorder %v3317_v41, 0.0  ;;  %vm3619_vm12 = vcmp.ge.f32.partialorder %v3325_v50, 0.0  ;;  %vm3620_vm13 = vcmp.ge.f32.partialorder %v3333_v40, 0.0  ;;  %vm3621_vm14 = vcmp.ge.f32.partialorder %v11514_v30, 0.0 }
 0x1da   : > { %v4644_v42 = vrot.slane %v4630_v9, %v10544_v10  ;;  %v3762_v0 = vmul.f32 0.2, %v3317_v41  ;;  %v3763_v48 = vmul.f32 0.2, %v3325_v50  ;;  %v4646_v37 = vcombine.low %v3897_v51, %v3898_v1 }
 0x1db   : > { %v3764_v32 = vmul.f32 0.2, %v3333_v40  ;;  %v3765_v43 = vmul.f32 0.2, %v11514_v30  ;;  %v3284_v49 = vcombine.high %v2676_v53, %v2676_v53  ;;  %v3291_v8 = vrot.slane %v2676_v53, %v10544_v10 }
 0x1dc   : > { %v4645_v47 = vcombine.low %v11495_v44, %v4644_v42  ;;  %v3906_v24 = vsel %vm3618_vm11, %v3317_v41, %v3762_v0  ;;  %v3907_v22 = vsel %vm3619_vm12, %v3325_v50, %v3763_v48  ;;  %v4685_v55 = vrot.slane %v4671_v18, %v10544_v10 }
 0x1dd   : > { %v3908_v13 = vsel %vm3620_vm13, %v3333_v40, %v3764_v32  ;;  %v3909_v17 = vsel %vm3621_vm14, %v11514_v30, %v3765_v43  ;;  %v4687_v45 = vcombine.low %v3906_v24, %v3907_v22  ;;  %v11527_v25 = vrot.slane %v3284_v49, %v10544_v10 }
 0x1de   : > { %v4688_v21 = vcombine.low %v3908_v13, %v3909_v17  ;;  %v3299_v23 = vcombine.high %v3291_v8, %v3291_v8  ;;  %vm3611_vm15 = vcmp.ge.f32.partialorder %v3291_v8, 0.0  ;;  %v3755_v14 = vmul.f32 0.2, %v3291_v8 }
 0x1df   : > { %v4654_v51 = vrot.slane %v4646_v37, %v10544_v10  ;;  %v4695_v44 = vrot.slane %v4687_v45, %v10544_v10  ;;  %v3300_v50 = vcombine.high %v11527_v25, %v11527_v25  ;;  %vm3568_vm2 = vcmp.ge.f32.partialorder %v11282_v59, 0.0 }
 0x1e0   : > { %v4702_v41 = vrot.slane %v4688_v21, %v10544_v10  ;;  %vm3612_vm0 = vcmp.ge.f32.partialorder %v3299_v23, 0.0  ;;  %v3756_v40 = vmul.f32 0.2, %v3299_v23  ;;  %v3899_v53 = vsel %vm3611_vm15, %v3291_v8, %v3755_v14 }
 0x1e1   : > { %vm3614_vm1 = vcmp.ge.f32.partialorder %v3300_v50, 0.0  ;;  %v3758_v1 = vmul.f32 0.2, %v3300_v50  ;;  %v5467_v9 = vshrl.u32 %v11284_v12, 16  ;;  %v3856_v0 = vsel %vm3568_vm2, %v11282_v59, %v11405_v58 }
 0x1e2   : > { %v4703_v42 = vcombine.low %v4695_v44, %v4702_v41  ;;  %v3900_v18 = vsel %vm3612_vm0, %v3299_v23, %v3756_v40  ;;  %v5469_v48 = vshll.u32 %v11284_v12, 16  ;;  %v4464_v43 = vrot.slane %v3856_v0, %v10544_v10 }
 0x1e3   : > { %v3902_v37 = vsel %vm3614_vm1, %v3300_v50, %v3758_v1  ;;  %v4647_v32 = vcombine.low %v3899_v53, %v3900_v18  ;;  %v3865_v49 = vsel %vm3577_vm10, %v11310_v34, %v11467_v62  ;;  %v5479_v13 = vshrl.u32 %v11366_v56, 16 }
 0x1e4   : > { %v4670_v24 = vcombine.low %v3902_v37, %v3903_v61  ;;  %v5471_v22 = vrot.slane %v5469_v48, 1  ;;  %v4505_v8 = vrot.slane %v3865_v49, %v10544_v10  ;;  %v11548_v59 = vpack.c.bf16 %v4464_v43, %v4464_v43 }
 0x1e5   : > { %v4661_v17 = vrot.slane %v4647_v32, %v10544_v10  ;;  %v5481_v58 = vshll.u32 %v11366_v56, 16  ;;  %vm3586_vm3 = vcmp.ge.f32.partialorder %v11423_v33, 0.0  ;;  %v3730_v34 = vmul.f32 0.2, %v11423_v33 }
 0x1e6   : > { %v4678_v45 = vrot.slane %v4670_v24, %v10544_v10  ;;  %v5472_v21 = vor.u32 %v5471_v22, %v5467_v9  ;;  %v11553_v23 = vpack.c.bf16 %v4505_v8, %v4505_v8  ;;  %v5474_v61 = vshll.u32 %v11548_v59, 16 }
 0x1e7   : > { %v4662_v62 = vcombine.low %v4654_v51, %v4661_v17  ;;  %v5483_v14 = vrot.slane %v5481_v58, 1  ;;  %v5491_v44 = vshrl.u32 %v11432_v26, 16  ;;  %v3874_v40 = vsel %vm3586_vm3, %v11423_v33, %v3730_v34 }
 0x1e8   : > { %v4686_v50 = vcombine.low %v4678_v45, %v4685_v55  ;;  %v5486_v41 = vshll.u32 %v11553_v23, 16  ;;  %v5493_v53 = vshll.u32 %v11432_v26, 16  ;;  %v5476_v9 = vrot.slane %v5474_v61, 1 }
 0x1e9   : > { %v11561_v1 = vpack.c.bf16 %v4662_v62, %v4645_v47  ;;  %v5484_v18 = vor.u32 %v5483_v14, %v5479_v13  ;;  %v4546_v0 = vrot.slane %v3874_v40, %v10544_v10  ;;  %v5073_v32 = vadd.f32 %v11022_v31, %v10566_v29 }
 0x1ea   : > { %v11564_v48 = vpack.c.bf16 %v4703_v42, %v4686_v50  ;;  %v5488_v51 = vrot.slane %v5486_v41, 1  ;;  %v5495_v37 = vrot.slane %v5493_v53, 1  ;;  %v11569_v55 = vsel %vm5357_vm9, %v5472_v21, %v5476_v9 }
 0x1eb   : > { %v11571_v43 = vpack.c.bf16 %v4546_v0, %v4546_v0  ;;  %v4587_v33 = vrot.slane %v11498_v5, %v10544_v10  ;;  %v3748_v47 = vmul.f32 0.2, %v11489_v54  ;;  %7825 = vmatprep.mubr.bf16.mxu0 %v11569_v55  ;;  %6392 = vmatprep.mubr.bf16.mxu1 %v11569_v55  ;;  %v5099_v49 = vcombine.high %v5073_v32, %v5073_v32 }
 0x1ec   : > { %v11579_v42 = vsel %vm5357_vm9, %v5484_v18, %v5488_v51  ;;  %7826 = vmatmul.mubr.bf16.gmra.mrb[68].mxu0 %v11284_v12  ;;  %6393 = vmatmul.mubr.bf16.gmra.mrb[48].mxu1 %v11284_v12  ;;  %v5496_v31 = vor.u32 %v5495_v37, %v5491_v44  ;;  %v5106_v22 = vrot.slane %v5073_v32, %v10544_v10  ;;  %v5505_v5 = vshll.u32 %v11459_v4, 16 }
 0x1ed   : > { %v5498_v24 = vshll.u32 %v11571_v43, 16  ;;  %7835 = vmatprep.mubr.bf16.mxu0 %v11579_v42  ;;  %6402 = vmatprep.mubr.bf16.mxu1 %v11579_v42  ;;  %v5113_v8 = vrot.slane %v5099_v49, %v10544_v10  ;;  %v11589_v13 = vpack.c.bf16 %v4587_v33, %v4587_v33  ;;  %v5503_v17 = vshrl.u32 %v11459_v4, 16 }
 0x1ee   : > { %v5076_v58 = vadd.f32 %v11062_v2, %v10566_v29  ;;  %v5114_v45 = vcombine.high %v5106_v22, %v5106_v22  ;;  %vm5193_vm4 = vcmp.ge.f32.partialorder %v5106_v22, 0.0  ;;  %v5211_v21 = vmul.f32 0.2, %v5106_v22 }
 0x1ef   : > { %vm3604_vm5 = vcmp.ge.f32.partialorder %v11489_v54, 0.0  ;;  %v5500_v34 = vrot.slane %v5498_v24, 1  ;;  %v5115_v62 = vcombine.high %v5113_v8, %v5113_v8  ;;  %vm5195_vm6 = vcmp.ge.f32.partialorder %v5113_v8, 0.0 }
 0x1f0   : > { %v5213_v61 = vmul.f32 0.2, %v5113_v8  ;;  %vm5194_vm7 = vcmp.ge.f32.partialorder %v5114_v45, 0.0  ;;  %v5212_v14 = vmul.f32 0.2, %v5114_v45  ;;  %v5229_v44 = vsel %vm5193_vm4, %v5106_v22, %v5211_v21 }
 0x1f1   : > { %v5507_v50 = vrot.slane %v5505_v5, 1  ;;  %vm5196_vm8 = vcmp.ge.f32.partialorder %v5115_v62, 0.0  ;;  %v5214_v41 = vmul.f32 0.2, %v5115_v62  ;;  %v5510_v53 = vshll.u32 %v11589_v13, 16 }
 0x1f2   : > { %v5231_v40 = vsel %vm5195_vm6, %v5113_v8, %v5213_v61  ;;  %v5230_v9 = vsel %vm5194_vm7, %v5114_v45, %v5212_v14  ;;  %v5116_v29 = vcombine.high %v5076_v58, %v5076_v58  ;;  %v5123_v2 = vrot.slane %v5076_v58, %v10544_v10 }
 0x1f3   : > { %v3892_v18 = vsel %vm3604_vm5, %v11489_v54, %v3748_v47  ;;  %v11601_v0 = vsel %vm5357_vm9, %v5496_v31, %v5500_v34  ;;  %v5232_v51 = vsel %vm5196_vm8, %v5115_v62, %v5214_v41  ;;  %v5265_v37 = vcombine.low %v5229_v44, %v5230_v9 }
 0x1f4   : > { %v4628_v32 = vrot.slane %v3892_v18, %v10544_v10  ;;  %7836 = vmatmul.mubr.bf16.gmra.mrb[72].mxu0 %v11366_v56  ;;  %6403 = vmatmul.mubr.bf16.gmra.mrb[52].mxu1 %v11366_v56  ;;  %v5266_v33 = vcombine.low %v5231_v40, %v5232_v51  ;;  %v5130_v49 = vrot.slane %v5116_v29, %v10544_v10  ;;  %vm5197_vm10 = vcmp.ge.f32.partialorder %v5123_v2, 0.0 }
 0x1f5   : > { %v5131_v24 = vcombine.high %v5123_v2, %v5123_v2  ;;  %7845 = vmatprep.mubr.bf16.mxu0 %v11601_v0  ;;  %6412 = vmatprep.mubr.bf16.mxu1 %v11601_v0  ;;  %v5508_v54 = vor.u32 %v5507_v50, %v5503_v17  ;;  %v5215_v47 = vmul.f32 0.2, %v5123_v2  ;;  %v5515_v22 = vshrl.u32 %v11507_v6, 16 }
 0x1f6   : > { %v11609_v31 = vpack.c.bf16 %v4628_v32, %v4628_v32  ;;  %v5512_v5 = vrot.slane %v5510_v53, 1  ;;  %v5132_v8 = vcombine.high %v5130_v49, %v5130_v49  ;;  %vm5199_vm12 = vcmp.ge.f32.partialorder %v5130_v49, 0.0 }
 0x1f7   : > { %vm5198_vm11 = vcmp.ge.f32.partialorder %v5131_v24, 0.0  ;;  %v5216_v58 = vmul.f32 0.2, %v5131_v24  ;;  %v5217_v45 = vmul.f32 0.2, %v5130_v49  ;;  %v5233_v21 = vsel %vm5197_vm10, %v5123_v2, %v5215_v47 }
 0x1f8   : > { %v5517_v34 = vshll.u32 %v11507_v6, 16  ;;  %v5273_v62 = vrot.slane %v5265_v37, %v10544_v10  ;;  %v5280_v61 = vrot.slane %v5266_v33, %v10544_v10  ;;  %vm5200_vm13 = vcmp.ge.f32.partialorder %v5132_v8, 0.0 }
 0x1f9   : > { %v5218_v17 = vmul.f32 0.2, %v5132_v8  ;;  %v5234_v14 = vsel %vm5198_vm11, %v5131_v24, %v5216_v58  ;;  %v5235_v44 = vsel %vm5199_vm12, %v5130_v49, %v5217_v45  ;;  %v5522_v50 = vshll.u32 %v11609_v31, 16 }
 0x1fa   : > { %v5081_v41 = vadd.f32 %v11121_v38, %v10562_v28  ;;  %v5282_v53 = vcombine.low %v5233_v21, %v5234_v14  ;;  %v5519_v9 = vrot.slane %v5517_v34, 1  ;;  %v5084_v29 = vadd.f32 %v11143_v36, %v10574_v35 }
 0x1fb   : > { %v5236_v40 = vsel %vm5200_vm13, %v5132_v8, %v5218_v17  ;;  %v11622_v51 = vsel %vm5357_vm9, %v5508_v54, %v5512_v5  ;;  %vm3613_vm14 = vcmp.ge.f32.partialorder %v11527_v25, 0.0  ;;  %v5281_v28 = vcombine.low %v5273_v62, %v5280_v61 }
 0x1fc   : > { %v5283_v2 = vcombine.low %v5235_v44, %v5236_v40  ;;  %v5133_v18 = vcombine.high %v5081_v41, %v5081_v41  ;;  %7846 = vmatmul.mubr.bf16.gmra.mrb[76].mxu0 %v11432_v26  ;;  %v5290_v37 = vrot.slane %v5282_v53, %v10544_v10  ;;  %6413 = vmatmul.mubr.bf16.gmra.mrb[56].mxu1 %v11432_v26  ;;  %v3757_v36 = vmul.f32 0.2, %v11527_v25 }
 0x1fd   : > { %v5150_v32 = vcombine.high %v5084_v29, %v5084_v29  ;;  %7855 = vmatprep.mubr.bf16.mxu0 %v11622_v51  ;;  %6422 = vmatprep.mubr.bf16.mxu1 %v11622_v51  ;;  %v5520_v33 = vor.u32 %v5519_v9, %v5515_v22  ;;  %v5524_v49 = vrot.slane %v5522_v50, 1  ;;  %v5140_v47 = vrot.slane %v5081_v41, %v10544_v10 }
 0x1fe   : > { %v5297_v38 = vrot.slane %v5283_v2, %v10544_v10  ;;  %v11631_v35 = vrot.slane %v5133_v18, %v10544_v10  ;;  %v5157_v8 = vrot.slane %v5084_v29, %v10544_v10  ;;  %v3334_v58 = vcombine.high %v11514_v30, %v11514_v30 }
 0x1ff   : > { %v11635_v24 = vrot.slane %v5150_v32, %v10544_v10  ;;  %v3901_v62 = vsel %vm3613_vm14, %v11527_v25, %v3757_v36  ;;  %v5527_v61 = vshrl.u32 %v11561_v1, 16  ;;  %v11652_v17 = vsel %vm5357_vm9, %v5520_v33, %v5524_v49  ;;  %v12483_v25 = vld [vmem:[#allocation3_spill] sm:$0xff] }
 0x200   : > { %v5298_v54 = vcombine.low %v5290_v37, %v5297_v38  ;;  %v5149_v5 = vcombine.high %v11631_v35, %v11631_v35  ;;  %vm5205_vm0 = vcmp.ge.f32.partialorder %v5157_v8, 0.0  ;;  %v5223_v34 = vmul.f32 0.2, %v5157_v8 }
 0x201   : > { %v5166_v22 = vcombine.high %v11635_v24, %v11635_v24  ;;  %vm5201_vm1 = vcmp.ge.f32.partialorder %v5140_v47, 0.0  ;;  %v4669_v30 = vrot.slane %v3901_v62, %v10544_v10  ;;  %v5529_v14 = vshll.u32 %v11561_v1, 16 }
 0x202   : > { %v11643_v45 = vpack.c.bf16 %v5298_v54, %v5281_v28  ;;  %vm5204_vm15 = vcmp.ge.f32.partialorder %v5149_v5, 0.0  ;;  %v5222_v21 = vmul.f32 0.2, %v5149_v5  ;;  %v5219_v44 = vmul.f32 0.2, %v5140_v47 }
 0x203   : > { %v11659_v41 = vsel %vm5205_vm0, %v5157_v8, %v5223_v34  ;;  %v5089_v40 = vadd.f32 %v11187_v15, %v12483_v25  ;;  %v11668_v9 = vpack.c.bf16 %v4669_v30, %v4669_v30  ;;  %v5531_v29 = vrot.slane %v5529_v14, 1 }
 0x204   : > { %7856 = vmatmul.mubr.bf16.gmra.mrb[80].mxu0 %v11459_v4  ;;  %v11657_v50 = vsel %vm5204_vm15, %v5149_v5, %v5222_v21  ;;  %6423 = vmatmul.mubr.bf16.gmra.mrb[60].mxu1 %v11459_v4  ;;  %vm5208_vm2 = vcmp.ge.f32.partialorder %v5166_v22, 0.0  ;;  %v5226_v18 = vmul.f32 0.2, %v5166_v22  ;;  %vm3622_vm3 = vcmp.ge.f32.partialorder %v3334_v58, 0.0 }
 0x205   : > { %7865 = vmatprep.mubr.bf16.mxu0 %v11652_v17  ;;  %v5307_v53 = vcombine.low %v11657_v50, %v11659_v41  ;;  %6432 = vmatprep.mubr.bf16.mxu1 %v11652_v17  ;;  %v5173_v2 = vrot.slane %v5089_v40, %v10544_v10  ;;  %v3766_v37 = vmul.f32 0.2, %v3334_v58  ;;  %v5532_v32 = vor.u32 %v5531_v29, %v5527_v61 }
 0x206   : > { %v5534_v28 = vshll.u32 %v11668_v9, 16  ;;  %v11672_v38 = vsel %vm5208_vm2, %v5166_v22, %v5226_v18  ;;  %v5541_v36 = vshll.u32 %v11564_v48, 16  ;;  %v5237_v54 = vsel %vm5201_vm1, %v5140_v47, %v5219_v44 }
 0x207   : > { %vm5209_vm4 = vcmp.ge.f32.partialorder %v5173_v2, 0.0  ;;  %v5227_v15 = vmul.f32 0.2, %v5173_v2  ;;  %v3910_v49 = vsel %vm3622_vm3, %v3334_v58, %v3766_v37  ;;  %v5305_v34 = vrot.slane %v5237_v54, %v10544_v10 }
 0x208   : > { %v5536_v33 = vrot.slane %v5534_v28, 1  ;;  %v4710_v21 = vrot.slane %v3910_v49, %v10544_v10  ;;  %v5539_v58 = vshrl.u32 %v11564_v48, 16  ;;  %v5543_v30 = vrot.slane %v5541_v36, 1 }
 0x209   : > { %v11676_v5 = vsel %vm5209_vm4, %v5173_v2, %v5227_v15  ;;  %v5148_v14 = vcombine.high %v5140_v47, %v5140_v47  ;;  %v11690_v25 = vpack.c.bf16 %v5305_v34, %v5305_v34  ;;  %v5666_v40 = vshll.u32 %v11643_v45, 16 }
 0x20a   : > { %v11684_v22 = vsel %vm5357_vm9, %v5532_v32, %v5536_v33  ;;  %v4790_v61 = vpack.c.bf16 %v4710_v21, %v4710_v21  ;;  %v5221_v29 = vmul.f32 0.2, %v11631_v35  ;;  %v5165_v18 = vcombine.high %v5157_v8, %v5157_v8 }
 0x20b   : > { %vm5203_vm5 = vcmp.ge.f32.partialorder %v11631_v35, 0.0  ;;  %v5225_v37 = vmul.f32 0.2, %v11635_v24  ;;  %v5544_v32 = vor.u32 %v5543_v30, %v5539_v58  ;;  %vm5207_vm6 = vcmp.ge.f32.partialorder %v11635_v24, 0.0 }
 0x20c   : > { %7866 = vmatmul.mubr.bf16.gmra.mrb[84].mxu0 %v11507_v6  ;;  %6433 = vmatmul.mubr.bf16.gmra.mrb[64].mxu1 %v11507_v6  ;;  %v5546_v44 = vshll.u32 %v4790_v61, 16  ;;  %vm5202_vm7 = vcmp.ge.f32.partialorder %v5148_v14, 0.0  ;;  %v5664_v15 = vshrl.u32 %v11643_v45, 16  ;;  %v5668_v47 = vrot.slane %v5666_v40, 1 }
 0x20d   : > { %7875 = vmatprep.mubr.bf16.mxu0 %v11684_v22  ;;  %6442 = vmatprep.mubr.bf16.mxu1 %v11684_v22  ;;  %v5671_v36 = vshll.u32 %v11690_v25, 16  ;;  %v5220_v33 = vmul.f32 0.2, %v5148_v14  ;;  %v5239_v49 = vsel %vm5203_vm5, %v11631_v35, %v5221_v29  ;;  %vm5206_vm8 = vcmp.ge.f32.partialorder %v5165_v18, 0.0 }
 0x20e   : > { %v5548_v28 = vrot.slane %v5546_v44, 1  ;;  %v5224_v54 = vmul.f32 0.2, %v5165_v18  ;;  %v5243_v8 = vsel %vm5207_vm6, %v11635_v24, %v5225_v37  ;;  %v5174_v21 = vcombine.high %v5173_v2, %v5173_v2 }
 0x20f   : > { %v5626_v58 = vrot.slane %v11284_v12, 1  ;;  %vm5598_vm10 = vcmask 1046528   ;;  %v5627_v35 = vrot.slane %v11548_v59, 1  ;;  %v5629_v30 = vrot.slane %v11366_v56, 1 }
 0x210   : > { %v11703_v34 = vsel %vm5357_vm9, %v5544_v32, %v5548_v28  ;;  %v5630_v24 = vrot.slane %v11553_v23, 1  ;;  %v5669_v2 = vor.u32 %v5668_v47, %v5664_v15  ;;  %v5673_v44 = vrot.slane %v5671_v36, 1 }
 0x211   : > { %v5632_v40 = vrot.slane %v11432_v26, 1  ;;  %v5633_v29 = vrot.slane %v11571_v43, 1  ;;  %v11715_v37 = vsel %vm5598_vm10, %v5626_v58, %v5627_v35  ;;  %v5635_v28 = vrot.slane %v11459_v4, 1 }
 0x212   : > { %v11718_v32 = vsel %vm5598_vm10, %v5629_v30, %v5630_v24  ;;  %v5636_v59 = vrot.slane %v11589_v13, 1  ;;  %v5638_v23 = vrot.slane %v11507_v6, 1  ;;  %v5639_v15 = vrot.slane %v11609_v31, 1 }
 0x213   : > { %v11723_v62 = vsel %vm5598_vm10, %v5632_v40, %v5633_v29  ;;  %v5641_v47 = vrot.slane %v11561_v1, 1  ;;  %v5642_v36 = vrot.slane %v11668_v9, 1  ;;  %v5644_v58 = vrot.slane %v11564_v48, 1 }
 0x214   : > { %7876 = vmatmul.mubr.bf16.gmra.mrb[88].mxu0 %v11561_v1  ;;  %6443 = vmatmul.mubr.bf16.gmra.mrb[68].mxu1 %v11561_v1  ;;  %v11729_v43 = vsel %vm5598_vm10, %v5635_v28, %v5636_v59  ;;  %v5645_v35 = vrot.slane %v4790_v61, 1  ;;  %v11734_v30 = vsel %vm5598_vm10, %v5638_v23, %v5639_v15  ;;  %v5238_v13 = vsel %vm5202_vm7, %v5148_v14, %v5220_v33  ;;  %v9845_v23 = vld [vmem:[%s12429_s4 + $0x200] ss:$8 sps:$4 sm:$0xff]  }
 0x215   : > { %7885 = vmatprep.mubr.bf16.mxu0 %v11703_v34  ;;  %6452 = vmatprep.mubr.bf16.mxu1 %v11703_v34  ;;  %v5242_v24 = vsel %vm5206_vm8, %v5165_v18, %v5224_v54  ;;  %v5321_v31 = vrot.slane %v5307_v53, %v10544_v10  ;;  %v11743_v40 = vsel %vm5598_vm10, %v5641_v47, %v5642_v36  ;;  %v5678_v53 = vrot.slane %v11643_v45, 1  ;;  %v9853_v47 = vld [vmem:[%s12429_s4 + $0x214] ss:$8 sps:$4 sm:$0xff]  }
 0x216   : > { %v11746_v9 = vsel %vm5598_vm10, %v5644_v58, %v5645_v35  ;;  %v5306_v29 = vcombine.low %v5238_v13, %v5239_v49  ;;  %v5323_v61 = vcombine.low %v5242_v24, %v5243_v8  ;;  %v11750_v28 = vsel %vm5357_vm9, %v5669_v2, %v5673_v44  ;;  %v9859_v58 = vld [vmem:[%s12429_s4 + $0x224] ss:$8 sps:$4 sm:$0xff]   ;;  %v9848_v13 = vld [vmem:[%s12429_s4 + $0x500] ss:$8 sps:$4 sm:$0xff]  }
 0x217   : > { %v12484_v50 = vcombine.low %v11672_v38, %v11676_v5  ;;  %v5679_v14 = vrot.slane %v11690_v25, 1  ;;  %vm5210_vm11 = vcmp.ge.f32.partialorder %v5174_v21, 0.0  ;;  %v5228_v54 = vmul.f32 0.2, %v5174_v21  ;;  %v12485_v24 = vld [vmem:[#allocation11_spill] sm:$0xff] }
 0x218   : > { %v5314_v18 = vrot.slane %v5306_v29, %v10544_v10  ;;  %v5331_v33 = vrot.slane %v5323_v61, %v10544_v10  ;;  %v5599_v38 = vrot.slane %v10846_v3, 1  ;;  %v5600_v25 = vrot.slane %v10858_v7, 1  ;;  %v9851_v7 = vld [vmem:[%s12429_s4 + $0x210] ss:$8 sps:$4 sm:$0xff]   ;;  %v9856_v29 = vld [vmem:[%s12429_s4 + $0x514] ss:$8 sps:$4 sm:$0xff]  }
 0x219   : > { %v5338_v41 = vrot.slane %v12484_v50, %v10544_v10  ;;  %v11764_v49 = vsel %vm5598_vm10, %v5678_v53, %v5679_v14  ;;  %v5246_v2 = vsel %vm5210_vm11, %v5174_v21, %v5228_v54  ;;  %v5602_v36 = vrot.slane %v10683_v20, 1  ;;  %v9857_v61 = vld [vmem:[%s12429_s4 + $0x220] ss:$8 sps:$4 sm:$0xff]   ;;  %v9865_v50 = vld [vmem:[%s12429_s4 + $0x234] ss:$8 sps:$4 sm:$0xff]  }
 0x21a   : > { %v5322_v5 = vcombine.low %v5314_v18, %v5321_v31  ;;  %v5346_v59 = vrot.slane %v5246_v2, %v10544_v10  ;;  %v5601_v15 = vsel %vm5598_vm10, %v5599_v38, %v5600_v25  ;;  %v5603_v31 = vrot.slane %v12485_v24, 1  ;;  %v9854_v53 = vld [vmem:[%s12429_s4 + $0x510] ss:$8 sps:$4 sm:$0xff]   ;;  %v9862_v14 = vld [vmem:[%s12429_s4 + $0x524] ss:$8 sps:$4 sm:$0xff]  }
 0x21b   : > { %v5339_v8 = vcombine.low %v5331_v33, %v5338_v41  ;;  %v12486_v41 = vld [vmem:[#allocation4_spill] sm:$0xff]  ;;  %v5605_v18 = vrot.slane %v10734_v39, 1  ;;  %v12487_v54 = vld [vmem:[#allocation13_spill] sm:$0xff]  ;;  %v9869_v25 = vld [vmem:[%s12429_s4 + $0x240] ss:$8 sps:$4 sm:$0xff]  }
 0x21c   : > { %7886 = vmatmul.mubr.bf16.gmra.mrb[92].mxu0 %v11564_v48  ;;  %6453 = vmatmul.mubr.bf16.gmra.mrb[72].mxu1 %v11564_v48  ;;  %v11778_v3 = vpack.c.bf16 %v5346_v59, %v5346_v59  ;;  %v9863_v33 = vld [vmem:[%s12429_s4 + $0x230] ss:$8 sps:$4 sm:$0xff]   ;;  %v5606_v38 = vrot.slane %v12487_v54, 1  ;;  %v9868_v2 = vld [vmem:[%s12429_s4 + $0x534] ss:$8 sps:$4 sm:$0xff]  }
 0x21d   : > { %7895 = vmatprep.mubr.bf16.mxu0 %v11750_v28  ;;  %6495 = vmatprep.mubr.bf16.mxu1 %v10683_v20  ;;  %v11768_v44 = vpack.c.bf16 %v5339_v8, %v5322_v5  ;;  %v11803_v20 = vsel %vm5598_vm10, %v5602_v36, %v5603_v31  ;;  %v9860_v5 = vld [vmem:[%s12429_s4 + $0x520] ss:$8 sps:$4 sm:$0xff]   ;;  %v9871_v8 = vld [vmem:[%s12429_s4 + $0x244] ss:$8 sps:$4 sm:$0xff]   ;;  %v9877_v59 = vld [vmem:[%s12429_s4 + $0x254] ss:$8 sps:$4 sm:$0xff]  }
 0x21e   : > { %v7121_v10 = vrot.slane %v11778_v3, 1  ;;  %v9875_v36 = vld [vmem:[%s12429_s4 + $0x250] ss:$8 sps:$4 sm:$0xff]   ;;  %v9880_v31 = vld [vmem:[%s12429_s4 + $0x554] ss:$8 sps:$4 sm:$0xff]  }
 0x21f   : > { %v7120_v21 = vrot.slane %v11768_v44, 1  ;;  %v9884_v54 = vld [vmem:[%s12429_s4 + $0x560] ss:$8 sps:$4 sm:$0xff]  }
 0x221   : > { %v11793_v35 = vsel %vm5598_vm10, %v7120_v21, %v7121_v10  ;;  %v12489_v21 = vld [vmem:[#allocation15_spill] sm:$0xff] }
 0x222   : > { %v5609_v10 = vrot.slane %v12489_v21, 1  ;;  %v9899_v21 = vld [vmem:[%s12429_s4 + $0x290] ss:$8 sps:$4 sm:$0xff]  }
 0x224   : > { %7896 = vmatmul.mubr.bf16.gmra.mrb[96].mxu0 %v11643_v45  ;;  %6496 = vmatmul.mubr.bf16.vlgmr.msra.gmra.mrb[12].mxu1 %v5601_v15  ;;  %v9866_v15 = vld [vmem:[%s12429_s4 + $0x530] ss:$8 sps:$4 sm:$0xff]  }
 0x225   : > { %7938 = vmatprep.mubr.bf16.mxu0 %v10734_v39  ;;  %6505 = vmatprep.mubr.bf16.mxu1 %v10734_v39  ;;  %v11833_v39 = vsel %vm5598_vm10, %v5605_v18, %v5606_v38  ;;  %v12490_v18 = vld [vmem:[#allocation16_spill] sm:$0xff]  ;;  %v9895_v38 = vld [vmem:[%s12429_s4 + $0x284] ss:$8 sps:$4 sm:$0xff]  }
 0x226   : > { %6657 = vmatpush1.bf16.msra.mxu1 %v9845_v23  ;;  %v12488_v23 = vld [vmem:[#allocation8_spill] sm:$0xff] }
 0x227   : > { %6658 = vmatprep.subr.bf16.mxu1 %v9853_v47  ;;  %v5608_v47 = vrot.slane %v12486_v41, 1 }
 0x229   : > { %v11866_v24 = vsel %vm5598_vm10, %v5608_v47, %v5609_v10  ;;  %v9898_v47 = vld [vmem:[%s12429_s4 + $0x584] ss:$8 sps:$4 sm:$0xff]   ;;  %v9896_v10 = vld [vmem:[%s12429_s4 + $0x580] ss:$8 sps:$4 sm:$0xff]  }
 0x22a   : > { %6659 = vmatpush1.bf16.msra.mxu1 %v9851_v7  ;;  %v9874_v7 = vld [vmem:[%s12429_s4 + $0x544] ss:$8 sps:$4 sm:$0xff]  }
 0x22b   : > { %6660 = vmatprep.subr.bf16.mxu1 %v9859_v58  ;;  %v9872_v58 = vld [vmem:[%s12429_s4 + $0x540] ss:$8 sps:$4 sm:$0xff]  }
 0x22c   : > { %7939 = vmatmul.mubr.bf16.vlgmr.msra.gmra.mrb[36].mxu0 %v11803_v20  ;;  %6506 = vmatmul.mubr.bf16.gmra.mrb[16].mxu1 %v11803_v20 }
 0x22d   : > { %8100 = vmatpush1.bf16.msra.mxu0 %v9848_v13  ;;  %7948 = vmatprep.mubr.bf16.mxu0 %v12486_v41  ;;  %v9883_v13 = vld [vmem:[%s12429_s4 + $0x264] ss:$8 sps:$4 sm:$0xff]  }
 0x22e   : > { %6515 = vmatprep.mubr.bf16.mxu1 %v12486_v41  ;;  %8101 = vmatprep.subr.bf16.mxu0 %v9856_v29  ;;  %v9881_v29 = vld [vmem:[%s12429_s4 + $0x260] ss:$8 sps:$4 sm:$0xff]   ;;  %v5611_v41 = vrot.slane %v12488_v23, 1 }
 0x22f   : > { %6661 = vmatpush1.bf16.msra.mxu1 %v9857_v61  ;;  %v9889_v61 = vld [vmem:[%s12429_s4 + $0x274] ss:$8 sps:$4 sm:$0xff]  }
 0x230   : > { %6662 = vmatprep.subr.bf16.mxu1 %v9865_v50  ;;  %v9878_v50 = vld [vmem:[%s12429_s4 + $0x550] ss:$8 sps:$4 sm:$0xff]  }
 0x231   : > { %8102 = vmatpush1.bf16.msra.mxu0 %v9854_v53  ;;  %v9886_v53 = vld [vmem:[%s12429_s4 + $0x564] ss:$8 sps:$4 sm:$0xff]  }
 0x232   : > { %8103 = vmatprep.subr.bf16.mxu0 %v9862_v14  ;;  %v9887_v14 = vld [vmem:[%s12429_s4 + $0x270] ss:$8 sps:$4 sm:$0xff]  }
 0x233   : > { %6663 = vmatpush1.bf16.msra.mxu1 %v9863_v33  ;;  %v5612_v33 = vrot.slane %v12490_v18, 1  ;;  %v9925_v18 = vld [vmem:[%s12429_s4 + $0x2d4] ss:$8 sps:$4 sm:$0xff]  }
 0x234   : > { %7949 = vmatmul.mubr.bf16.gmra.mrb[40].mxu0 %v11833_v39  ;;  %6516 = vmatmul.mubr.bf16.gmra.mrb[20].mxu1 %v11833_v39 }
 0x235   : > { %7958 = vmatprep.mubr.bf16.mxu0 %v12488_v23  ;;  %6525 = vmatprep.mubr.bf16.mxu1 %v12488_v23  ;;  %v5614_v23 = vrot.slane %v10874_v60, 1 }
 0x236   : > { %8104 = vmatpush1.bf16.msra.mxu0 %v9860_v5  ;;  %6664 = vmatprep.subr.bf16.mxu1 %v9871_v8  ;;  %v11899_v5 = vsel %vm5598_vm10, %v5611_v41, %v5612_v33  ;;  %v9892_v8 = vld [vmem:[%s12429_s4 + $0x574] ss:$8 sps:$4 sm:$0xff]   ;;  %v9908_v41 = vld [vmem:[%s12429_s4 + $0x5a0] ss:$8 sps:$4 sm:$0xff]   ;;  %v9914_v33 = vld [vmem:[%s12429_s4 + $0x5b0] ss:$8 sps:$4 sm:$0xff]  }
 0x237   : > { %8105 = vmatprep.subr.bf16.mxu0 %v9868_v2  ;;  %6665 = vmatpush1.bf16.msra.mxu1 %v9869_v25  ;;  %v9893_v2 = vld [vmem:[%s12429_s4 + $0x280] ss:$8 sps:$4 sm:$0xff]   ;;  %v9901_v25 = vld [vmem:[%s12429_s4 + $0x294] ss:$8 sps:$4 sm:$0xff]  }
 0x238   : > { %6666 = vmatprep.subr.bf16.mxu1 %v9877_v59  ;;  %v9890_v59 = vld [vmem:[%s12429_s4 + $0x570] ss:$8 sps:$4 sm:$0xff]  }
 0x23a   : > { %8106 = vmatpush1.bf16.msra.mxu0 %v9866_v15  ;;  %v5615_v15 = vrot.slane %v11262_v52, 1 }
 0x23b   : > { %8107 = vmatprep.subr.bf16.mxu0 %v9874_v7  ;;  %6667 = vmatpush1.bf16.msra.mxu1 %v9875_v36  ;;  %v9904_v7 = vld [vmem:[%s12429_s4 + $0x594] ss:$8 sps:$4 sm:$0xff]   ;;  %v9905_v36 = vld [vmem:[%s12429_s4 + $0x2a0] ss:$8 sps:$4 sm:$0xff]  }
 0x23c   : > { %7959 = vmatmul.mubr.bf16.gmra.mrb[44].mxu0 %v11866_v24  ;;  %6526 = vmatmul.mubr.bf16.gmra.mrb[24].mxu1 %v11866_v24  ;;  %v11932_v52 = vsel %vm5598_vm10, %v5614_v23, %v5615_v15  ;;  %v9929_v23 = vld [vmem:[%s12429_s4 + $0x2e0] ss:$8 sps:$4 sm:$0xff]   ;;  %v9937_v15 = vld [vmem:[%s12429_s4 + $0x2f4] ss:$8 sps:$4 sm:$0xff]  }
 0x23d   : > { %7968 = vmatprep.mubr.bf16.mxu0 %v10874_v60  ;;  %6535 = vmatprep.mubr.bf16.mxu1 %v10874_v60  ;;  %v9907_v60 = vld [vmem:[%s12429_s4 + $0x2a4] ss:$8 sps:$4 sm:$0xff]  }
 0x23e   : > { %8108 = vmatpush1.bf16.msra.mxu0 %v9872_v58  ;;  %6668 = vmatprep.subr.bf16.mxu1 %v9883_v13  ;;  %v9913_v58 = vld [vmem:[%s12429_s4 + $0x2b4] ss:$8 sps:$4 sm:$0xff]   ;;  %v9902_v13 = vld [vmem:[%s12429_s4 + $0x590] ss:$8 sps:$4 sm:$0xff]  }
 0x23f   : > { %8109 = vmatprep.subr.bf16.mxu0 %v9880_v31  ;;  %6669 = vmatpush1.bf16.msra.mxu1 %v9881_v29  ;;  %v5617_v31 = vrot.slane %v10886_v57, 1  ;;  %v5618_v29 = vrot.slane %v11340_v27, 1 }
 0x240   : > { %6670 = vmatprep.subr.bf16.mxu1 %v9889_v61  ;;  %v9910_v61 = vld [vmem:[%s12429_s4 + $0x5a4] ss:$8 sps:$4 sm:$0xff]  }
 0x241   : > { %v11965_v27 = vsel %vm5598_vm10, %v5617_v31, %v5618_v29 }
 0x242   : > { %8110 = vmatpush1.bf16.msra.mxu0 %v9878_v50  ;;  %v9911_v50 = vld [vmem:[%s12429_s4 + $0x2b0] ss:$8 sps:$4 sm:$0xff]  }
 0x243   : > { %8111 = vmatprep.subr.bf16.mxu0 %v9886_v53  ;;  %6671 = vmatpush1.bf16.msra.mxu1 %v9887_v14  ;;  %v9916_v53 = vld [vmem:[%s12429_s4 + $0x5b4] ss:$8 sps:$4 sm:$0xff]   ;;  %v9917_v14 = vld [vmem:[%s12429_s4 + $0x2c0] ss:$8 sps:$4 sm:$0xff]  }
 0x244   : > { %7969 = vmatmul.mubr.bf16.gmra.mrb[48].mxu0 %v11899_v5  ;;  %6536 = vmatmul.mubr.bf16.gmra.mrb[28].mxu1 %v11899_v5 }
 0x245   : > { %7978 = vmatprep.mubr.bf16.mxu0 %v10886_v57  ;;  %6545 = vmatprep.mubr.bf16.mxu1 %v10886_v57  ;;  %v9919_v57 = vld [vmem:[%s12429_s4 + $0x2c4] ss:$8 sps:$4 sm:$0xff]  }
 0x246   : > { %8112 = vmatpush1.bf16.msra.mxu0 %v9884_v54  ;;  %6672 = vmatprep.subr.bf16.mxu1 %v9895_v38  ;;  %v5620_v54 = vrot.slane %v11082_v19, 1  ;;  %v5621_v38 = vrot.slane %v11449_v63, 1 }
 0x247   : > { %8113 = vmatprep.subr.bf16.mxu0 %v9892_v8  ;;  %6673 = vmatpush1.bf16.msra.mxu1 %v9893_v2  ;;  %v9922_v8 = vld [vmem:[%s12429_s4 + $0x5c4] ss:$8 sps:$4 sm:$0xff]   ;;  %v9923_v2 = vld [vmem:[%s12429_s4 + $0x2d0] ss:$8 sps:$4 sm:$0xff]  }
 0x248   : > { %6674 = vmatprep.subr.bf16.mxu1 %v9901_v25  ;;  %v9920_v25 = vld [vmem:[%s12429_s4 + $0x5c0] ss:$8 sps:$4 sm:$0xff]   ;;  %v11998_v63 = vsel %vm5598_vm10, %v5620_v54, %v5621_v38 }
 0x24a   : > { %8114 = vmatpush1.bf16.msra.mxu0 %v9890_v59  ;;  %v9928_v59 = vld [vmem:[%s12429_s4 + $0x5d4] ss:$8 sps:$4 sm:$0xff]  }
 0x24b   : > { %8115 = vmatprep.subr.bf16.mxu0 %v9898_v47  ;;  %6675 = vmatpush1.bf16.msra.mxu1 %v9899_v21  ;;  %v9926_v47 = vld [vmem:[%s12429_s4 + $0x5d0] ss:$8 sps:$4 sm:$0xff]   ;;  %v5623_v21 = vrot.slane %v11016_v46, 1 }
 0x24c   : > { %7979 = vmatmul.mubr.bf16.gmra.mrb[52].mxu0 %v11932_v52  ;;  %6546 = vmatmul.mubr.bf16.gmra.mrb[32].mxu1 %v11932_v52 }
 0x24d   : > { %7988 = vmatprep.mubr.bf16.mxu0 %v11082_v19  ;;  %6555 = vmatprep.mubr.bf16.mxu1 %v11082_v19  ;;  %v9931_v19 = vld [vmem:[%s12429_s4 + $0x2e4] ss:$8 sps:$4 sm:$0xff]  }
 0x24e   : > { %8116 = vmatpush1.bf16.msra.mxu0 %v9896_v10  ;;  %6676 = vmatprep.subr.bf16.mxu1 %v9907_v60  ;;  %v5624_v10 = vrot.slane %v11478_v16, 1  ;;  %v9934_v60 = vld [vmem:[%s12429_s4 + $0x5e4] ss:$8 sps:$4 sm:$0xff]   ;;  %v9940_v16 = vld [vmem:[%s12429_s4 + $0x5f4] ss:$8 sps:$4 sm:$0xff]  }
 0x24f   : > { %8117 = vmatprep.subr.bf16.mxu0 %v9904_v7  ;;  %6677 = vmatpush1.bf16.msra.mxu1 %v9905_v36  ;;  %v9932_v7 = vld [vmem:[%s12429_s4 + $0x5e0] ss:$8 sps:$4 sm:$0xff]   ;;  %v9938_v36 = vld [vmem:[%s12429_s4 + $0x5f0] ss:$8 sps:$4 sm:$0xff]  }
 0x250   : > { %6678 = vmatprep.subr.bf16.mxu1 %v9913_v58 }
 0x252   : > { %8118 = vmatpush1.bf16.msra.mxu0 %v9902_v13 }
 0x253   : > { %8119 = vmatprep.subr.bf16.mxu0 %v9910_v61  ;;  %6679 = vmatpush1.bf16.msra.mxu1 %v9911_v50 }
 0x254   : > { %7989 = vmatmul.mubr.bf16.gmra.mrb[56].mxu0 %v11965_v27  ;;  %6556 = vmatmul.mubr.bf16.gmra.mrb[36].mxu1 %v11965_v27 }
 0x255   : > { %7998 = vmatprep.mubr.bf16.mxu0 %v11016_v46  ;;  %6565 = vmatprep.mubr.bf16.mxu1 %v11016_v46  ;;  %v12028_v46 = vsel %vm5598_vm10, %v5623_v21, %v5624_v10 }
 0x256   : > { %8120 = vmatpush1.bf16.msra.mxu0 %v9908_v41  ;;  %6680 = vmatprep.subr.bf16.mxu1 %v9919_v57 }
 0x257   : > { %8121 = vmatprep.subr.bf16.mxu0 %v9916_v53  ;;  %6681 = vmatpush1.bf16.msra.mxu1 %v9917_v14 }
 0x258   : > { %6682 = vmatprep.subr.bf16.mxu1 %v9925_v18 }
 0x25a   : > { %8122 = vmatpush1.bf16.msra.mxu0 %v9914_v33 }
 0x25b   : > { %8123 = vmatprep.subr.bf16.mxu0 %v9922_v8  ;;  %6683 = vmatpush1.bf16.msra.mxu1 %v9923_v2 }
 0x25c   : > { %7999 = vmatmul.mubr.bf16.gmra.mrb[60].mxu0 %v11998_v63  ;;  %6566 = vmatmul.mubr.bf16.gmra.mrb[40].mxu1 %v11998_v63 }
 0x25d   : > { %8008 = vmatprep.mubr.bf16.mxu0 %v11284_v12  ;;  %6575 = vmatprep.mubr.bf16.mxu1 %v11284_v12  ;;  %v9935_v12 = vld [vmem:[%s12429_s4 + $0x2f0] ss:$8 sps:$4 sm:$0xff]  }
 0x25e   : > { %8124 = vmatpush1.bf16.msra.mxu0 %v9920_v25  ;;  %6684 = vmatprep.subr.bf16.mxu1 %v9931_v19 }
 0x25f   : > { %8125 = vmatprep.subr.bf16.mxu0 %v9928_v59  ;;  %6685 = vmatpush1.bf16.msra.mxu1 %v9929_v23 }
 0x260   : > { %6686 = vmatprep.subr.bf16.mxu1 %v9937_v15 }
 0x262   : > { %8126 = vmatpush1.bf16.msra.mxu0 %v9926_v47 }
 0x263   : > { %8127 = vmatprep.subr.bf16.mxu0 %v9934_v60  ;;  %6687 = vmatpush1.bf16.msra.mxu1 %v9935_v12 }
 0x264   : > { %8009 = vmatmul.mubr.bf16.gmra.mrb[64].mxu0 %v12028_v46  ;;  %6576 = vmatmul.mubr.bf16.gmra.mrb[44].mxu1 %v12028_v46 }
 0x265   : > { %8018 = vmatprep.mubr.bf16.mxu0 %v11366_v56  ;;  %6585 = vmatprep.mubr.bf16.mxu1 %v11366_v56  ;;  %v12491_v56 = vld [vmem:[#allocation12_spill] sm:$0xff] }
 0x266   : > { %8128 = vmatpush1.bf16.msra.mxu0 %v9932_v7 }
 0x267   : > { %8129 = vmatprep.subr.bf16.mxu0 %v9940_v16 }
 0x26a   : > { %8130 = vmatpush1.bf16.msra.mxu0 %v9938_v36 }
 0x26c   : > { %8019 = vmatmul.mubr.bf16.gmra.mrb[68].mxu0 %v11715_v37  ;;  %6586 = vmatmul.mubr.bf16.gmra.mrb[48].mxu1 %v11715_v37 }
 0x26d   : > { %8028 = vmatprep.mubr.bf16.mxu0 %v11432_v26  ;;  %6595 = vmatprep.mubr.bf16.mxu1 %v11432_v26  ;;  %v12492_v26 = vld [vmem:[#allocation14_spill] sm:$0xff] }
 0x274   : > { %8029 = vmatmul.mubr.bf16.gmra.mrb[72].mxu0 %v11718_v32  ;;  %6596 = vmatmul.mubr.bf16.gmra.mrb[52].mxu1 %v11718_v32 }
 0x275   : > { %8038 = vmatprep.mubr.bf16.mxu0 %v11459_v4  ;;  %6605 = vmatprep.mubr.bf16.mxu1 %v11459_v4  ;;  %v12493_v4 = vld [vmem:[#allocation17_spill] sm:$0xff] }
 0x27c   : > { %8039 = vmatmul.mubr.bf16.gmra.mrb[76].mxu0 %v11723_v62  ;;  %6606 = vmatmul.mubr.bf16.gmra.mrb[56].mxu1 %v11723_v62 }
 0x27d   : > { %8048 = vmatprep.mubr.bf16.mxu0 %v11507_v6  ;;  %6615 = vmatprep.mubr.bf16.mxu1 %v11507_v6  ;;  %v12494_v6 = vld [vmem:[#allocation18_spill] sm:$0xff] }
 0x284   : > { %8049 = vmatmul.mubr.bf16.gmra.mrb[80].mxu0 %v11729_v43  ;;  %6616 = vmatmul.mubr.bf16.gmra.mrb[60].mxu1 %v11729_v43 }
 0x285   : > { %8058 = vmatprep.mubr.bf16.mxu0 %v11561_v1  ;;  %6625 = vmatprep.mubr.bf16.mxu1 %v11561_v1  ;;  %v12495_v1 = vld [vmem:[#allocation5_spill] sm:$0xff] }
 0x28c   : > { %8059 = vmatmul.mubr.bf16.gmra.mrb[84].mxu0 %v11734_v30  ;;  %6626 = vmatmul.mubr.bf16.gmra.mrb[64].mxu1 %v11734_v30 }
 0x28d   : > { %8068 = vmatprep.mubr.bf16.mxu0 %v11564_v48  ;;  %6635 = vmatprep.mubr.bf16.mxu1 %v11564_v48  ;;  %v12496_v48 = vld [vmem:[#allocation6_spill] sm:$0xff] }
 0x294   : > { %8069 = vmatmul.mubr.bf16.gmra.mrb[88].mxu0 %v11743_v40  ;;  %6636 = vmatmul.mubr.bf16.gmra.mrb[68].mxu1 %v11743_v40 }
 0x295   : > { %8078 = vmatprep.mubr.bf16.mxu0 %v11643_v45  ;;  %6645 = vmatprep.mubr.bf16.mxu1 %v11643_v45 }
 0x29c   : > { %8079 = vmatmul.mubr.bf16.gmra.mrb[92].mxu0 %v11746_v9  ;;  %6646 = vmatmul.mubr.bf16.gmra.mrb[72].mxu1 %v11746_v9 }
 0x29d   : > { %8088 = vmatprep.mubr.bf16.mxu0 %v11768_v44  ;;  %6688 = vmatprep.mubr.bf16.mxu1 %v11803_v20 }
 0x2a4   : > { %8089 = vmatmul.mubr.bf16.gmra.mrb[96].mxu0 %v11764_v49  ;;  %6689 = vmatmul.mubr.bf16.vlgmr.msra.gmra.mrb[12].mxu1 %v12491_v56 }
 0x2a5   : > { %8131 = vmatprep.mubr.bf16.mxu0 %v11833_v39  ;;  %6698 = vmatprep.mubr.bf16.mxu1 %v11833_v39 }
 0x2ac   : > { %8132 = vmatmul.mubr.bf16.vlgmr.msra.gmra.mrb[36].mxu0 %v12492_v26  ;;  %6699 = vmatmul.mubr.bf16.gmra.mrb[16].mxu1 %v12492_v26 }
 0x2ad   : > { %8141 = vmatprep.mubr.bf16.mxu0 %v11866_v24  ;;  %6708 = vmatprep.mubr.bf16.mxu1 %v11866_v24 }
 0x2b4   : > { %8142 = vmatmul.mubr.bf16.gmra.mrb[40].mxu0 %v12493_v4  ;;  %6709 = vmatmul.mubr.bf16.gmra.mrb[20].mxu1 %v12493_v4 }
 0x2b5   : > { %8151 = vmatprep.mubr.bf16.mxu0 %v11899_v5  ;;  %6718 = vmatprep.mubr.bf16.mxu1 %v11899_v5 }
 0x2bc   : > { %8152 = vmatmul.mubr.bf16.gmra.mrb[44].mxu0 %v12494_v6  ;;  %6719 = vmatmul.mubr.bf16.gmra.mrb[24].mxu1 %v12494_v6 }
 0x2bd   : > { %8161 = vmatprep.mubr.bf16.mxu0 %v11932_v52  ;;  %6728 = vmatprep.mubr.bf16.mxu1 %v11932_v52 }
 0x2c4   : > { %8162 = vmatmul.mubr.bf16.gmra.mrb[48].mxu0 %v11301_v11  ;;  %6729 = vmatmul.mubr.bf16.gmra.mrb[28].mxu1 %v11301_v11  ;;  %v12497_v11 = vld [vmem:[#allocation7_spill] sm:$0xff] }
 0x2c5   : > { %8171 = vmatprep.mubr.bf16.mxu0 %v11965_v27  ;;  %6738 = vmatprep.mubr.bf16.mxu1 %v11965_v27 }
 0x2cc   : > { %8172 = vmatmul.mubr.bf16.gmra.mrb[52].mxu0 %v12495_v1  ;;  %6739 = vmatmul.mubr.bf16.gmra.mrb[32].mxu1 %v12495_v1 }
 0x2cd   : > { %8181 = vmatprep.mubr.bf16.mxu0 %v11998_v63  ;;  %6748 = vmatprep.mubr.bf16.mxu1 %v11998_v63 }
 0x2d4   : > { %8182 = vmatmul.mubr.bf16.gmra.mrb[56].mxu0 %v12496_v48  ;;  %6749 = vmatmul.mubr.bf16.gmra.mrb[36].mxu1 %v12496_v48 }
 0x2d5   : > { %8191 = vmatprep.mubr.bf16.mxu0 %v12028_v46  ;;  %6758 = vmatprep.mubr.bf16.mxu1 %v12028_v46 }
 0x2dc   : > { %8192 = vmatmul.mubr.bf16.gmra.mrb[60].mxu0 %v12497_v11  ;;  %6759 = vmatmul.mubr.bf16.gmra.mrb[40].mxu1 %v12497_v11 }
 0x2dd   : > { %8201 = vmatprep.mubr.bf16.mxu0 %v11715_v37  ;;  %6768 = vmatprep.mubr.bf16.mxu1 %v11715_v37  ;;  %v5778_v37 = vld [vmem:[%s12430_s5] sm:$0x3] }
 0x2e4   : > { %8202 = vmatmul.mubr.bf16.gmra.mrb[64].mxu0 %v11569_v55  ;;  %6769 = vmatmul.mubr.bf16.gmra.mrb[44].mxu1 %v11569_v55  ;;  %v7108_v55 = vshll.u32 %v11768_v44, 16 }
 0x2e5   : > { %8211 = vmatprep.mubr.bf16.mxu0 %v11718_v32  ;;  %6778 = vmatprep.mubr.bf16.mxu1 %v11718_v32 }
 0x2ec   : > { %8212 = vmatmul.mubr.bf16.gmra.mrb[68].mxu0 %v11579_v42  ;;  %6779 = vmatmul.mubr.bf16.gmra.mrb[48].mxu1 %v11579_v42  ;;  %v7106_v42 = vshrl.u32 %v11768_v44, 16 }
 0x2ed   : > { %8221 = vmatprep.mubr.bf16.mxu0 %v11723_v62  ;;  %6788 = vmatprep.mubr.bf16.mxu1 %v11723_v62 }
 0x2f4   : > { %8222 = vmatmul.mubr.bf16.gmra.mrb[72].mxu0 %v11601_v0  ;;  %6789 = vmatmul.mubr.bf16.gmra.mrb[52].mxu1 %v11601_v0  ;;  %v7110_v0 = vrot.slane %v7108_v55, 1 }
 0x2f5   : > { %8231 = vmatprep.mubr.bf16.mxu0 %v11729_v43  ;;  %6798 = vmatprep.mubr.bf16.mxu1 %v11729_v43 }
 0x2f6   : > { %v7111_v45 = vor.u32 %v7110_v0, %v7106_v42 }
 0x2fc   : > { %8232 = vmatmul.mubr.bf16.gmra.mrb[76].mxu0 %v11622_v51  ;;  %6799 = vmatmul.mubr.bf16.gmra.mrb[56].mxu1 %v11622_v51  ;;  %v7113_v51 = vshll.u32 %v11778_v3, 16  ;;  %v7221_v3 = vld [vmem:[%s12430_s5] sm:$0x3] }
 0x2fd   : > { %8241 = vmatprep.mubr.bf16.mxu0 %v11734_v30  ;;  %6808 = vmatprep.mubr.bf16.mxu1 %v11734_v30 }
 0x304   : > { %8242 = vmatmul.mubr.bf16.gmra.mrb[80].mxu0 %v11652_v17  ;;  %6809 = vmatmul.mubr.bf16.gmra.mrb[60].mxu1 %v11652_v17  ;;  %v7115_v17 = vrot.slane %v7113_v51, 1 }
 0x305   : > { %8251 = vmatprep.mubr.bf16.mxu0 %v11743_v40  ;;  %6818 = vmatprep.mubr.bf16.mxu1 %v11743_v40 }
 0x306   : > { %v7116_v62 = vsel %vm5357_vm9, %v7111_v45, %v7115_v17 }
 0x30c   : > { %8252 = vmatmul.mubr.bf16.gmra.mrb[84].mxu0 %v11684_v22  ;;  %6819 = vmatmul.mubr.bf16.gmra.mrb[64].mxu1 %v11684_v22  ;;  %v12498_v22 = vld [vmem:[#allocation2_spill] sm:$0xff] }
 0x30d   : > { %8261 = vmatprep.mubr.bf16.mxu0 %v11746_v9  ;;  %6828 = vmatprep.mubr.bf16.mxu1 %v11746_v9  ;;  %v5786_v32 = vsub.s32 1, %v12498_v22 }
 0x30f   : > { %v12142_v30 = vrot.slane %v5778_v37, %v5786_v32  ;;  %v12160_v61 = vrot.slane %v7221_v3, %v5786_v32 }
 0x314   : > { %8262 = vmatmul.mubr.bf16.gmra.mrb[88].mxu0 %v11703_v34  ;;  %6829 = vmatmul.mubr.bf16.gmra.mrb[68].mxu1 %v11703_v34  ;;  %v5782_v34 = vsub.s32 0, %v12498_v22 }
 0x315   : > { %8271 = vmatprep.mubr.bf16.mxu0 %v11764_v49  ;;  %6838 = vmatprep.mubr.bf16.mxu1 %v11764_v49 }
 0x316   : > { %v12140_v43 = vrot.slane %v5778_v37, %v5782_v34  ;;  %v12157_v13 = vrot.slane %v7221_v3, %v5782_v34 }
 0x31c   : > { %8272 = vmatmul.mubr.bf16.gmra.mrb[92].mxu0 %v11750_v28  ;;  %6839 = vmatmul.mubr.bf16.gmra.mrb[72].mxu1 %v11750_v28 }
 0x31d   : > { %8281 = vmatprep.mubr.bf16.mxu0 %v11793_v35 }
 0x324   : > { %8282 = vmatmul.mubr.bf16.gmra.mrb[96].mxu0 %v7116_v62 }
 0x377   : > { %v6690_v40 = vpop.f32.mrb[12].mxu1 }
 0x378   : > { %v9230_v9 = vadd.f32 %v6690_v40, %v12140_v43  ;;  %v6692_v28 = vpop.f32.mrb[13].mxu1 }
 0x379   : > { %v9231_v49 = vadd.f32 %v6692_v28, %v12142_v30  ;;  %v6694_v44 = vpop.f32.mrb[14].mxu1 }
 0x37a   : > { %vm6849_vm9 = vcmp.ge.f32.partialorder %v9230_v9, 0.0  ;;  %v6913_v35 = vmul.f32 0.2, %v9230_v9  ;;  %v9232_v20 = vadd.f32 %v6694_v44, %v12140_v43  ;;  %v6696_v39 = vpop.f32.mrb[15].mxu1 }
 0x37b   : > { %vm6850_vm12 = vcmp.ge.f32.partialorder %v9231_v49, 0.0  ;;  %v6914_v24 = vmul.f32 0.2, %v9231_v49  ;;  %v9233_v5 = vadd.f32 %v6696_v39, %v12142_v30 }
 0x37c   : > { %v6977_v52 = vsel %vm6849_vm9, %v9230_v9, %v6913_v35  ;;  %vm6851_vm13 = vcmp.ge.f32.partialorder %v9232_v20, 0.0  ;;  %v6915_v58 = vmul.f32 0.2, %v9232_v20 }
 0x37d   : > { %7041 = vst [vmem:[%s12153_s26] sm:$0xff] %v6977_v52  ;;  %v6978_v31 = vsel %vm6850_vm12, %v9231_v49, %v6914_v24  ;;  %vm6852_vm14 = vcmp.ge.f32.partialorder %v9233_v5, 0.0  ;;  %v6916_v29 = vmul.f32 0.2, %v9233_v5 }
 0x37e   : > { %7042 = vst [vmem:[%s12153_s26 + $0x8] sm:$0xff] %v6978_v31  ;;  %v6979_v50 = vsel %vm6851_vm13, %v9232_v20, %v6915_v58 }
 0x37f   : > { %7043 = vst [vmem:[%s12153_s26 + $0x10] sm:$0xff] %v6979_v50  ;;  %v8133_v41 = vpop.f32.mrb[36].mxu0  ;;  %v6980_v57 = vsel %vm6852_vm14, %v9233_v5, %v6916_v29  ;;  %v6700_v27 = vpop.f32.mrb[16].mxu1 }
 0x380   : > { %v9294_v53 = vadd.f32 %v8133_v41, %v12157_v13  ;;  %7044 = vst [vmem:[%s12153_s26 + $0x18] sm:$0xff] %v6980_v57  ;;  %v8135_v14 = vpop.f32.mrb[37].mxu0  ;;  %v9234_v18 = vadd.f32 %v6700_v27, %v12140_v43  ;;  %v6702_v33 = vpop.f32.mrb[17].mxu1 }
 0x381   : > { %v9295_v54 = vadd.f32 %v8135_v14, %v12160_v61  ;;  %v8137_v38 = vpop.f32.mrb[38].mxu0  ;;  %v9235_v8 = vadd.f32 %v6702_v33, %v12142_v30  ;;  %v6704_v2 = vpop.f32.mrb[18].mxu1 }
 0x382   : > { %vm8292_vm15 = vcmp.ge.f32.partialorder %v9294_v53, 0.0  ;;  %v8356_v25 = vmul.f32 0.2, %v9294_v53  ;;  %v9296_v19 = vadd.f32 %v8137_v38, %v12157_v13  ;;  %v8139_v63 = vpop.f32.mrb[39].mxu0  ;;  %vm6853_vm0 = vcmp.ge.f32.partialorder %v9234_v18, 0.0  ;;  %v6706_v59 = vpop.f32.mrb[19].mxu1 }
 0x383   : > { %vm8293_vm1 = vcmp.ge.f32.partialorder %v9295_v54, 0.0  ;;  %v8357_v23 = vmul.f32 0.2, %v9295_v54  ;;  %v9297_v15 = vadd.f32 %v8139_v63, %v12160_v61  ;;  %v6917_v47 = vmul.f32 0.2, %v9234_v18 }
 0x384   : > { %v8420_v21 = vsel %vm8292_vm15, %v9294_v53, %v8356_v25  ;;  %vm8294_vm2 = vcmp.ge.f32.partialorder %v9296_v19, 0.0  ;;  %v8358_v10 = vmul.f32 0.2, %v9296_v19  ;;  %vm6854_vm3 = vcmp.ge.f32.partialorder %v9235_v8, 0.0 }
 0x385   : > { %9044 = vst [vmem:[%s12153_s26 + $0x20] sm:$0xff] %v8420_v21  ;;  %v8421_v60 = vsel %vm8293_vm1, %v9295_v54, %v8357_v23  ;;  %vm8295_vm4 = vcmp.ge.f32.partialorder %v9297_v15, 0.0  ;;  %v8359_v12 = vmul.f32 0.2, %v9297_v15  ;;  %v6981_v7 = vsel %vm6853_vm0, %v9234_v18, %v6917_v47 }
 0x386   : > { %9045 = vst [vmem:[%s12153_s26 + $0x28] sm:$0xff] %v8421_v60  ;;  %v8422_v46 = vsel %vm8294_vm2, %v9296_v19, %v8358_v10  ;;  %7045 = vst [vmem:[%s12153_s26 + $0x40] sm:$0xff] %v6981_v7  ;;  %v6918_v16 = vmul.f32 0.2, %v9235_v8  ;;  %v9236_v36 = vadd.f32 %v6704_v2, %v12140_v43  ;;  %v9237_v56 = vadd.f32 %v6706_v59, %v12142_v30 }
 0x387   : > { %9046 = vst [vmem:[%s12153_s26 + $0x30] sm:$0xff] %v8422_v46  ;;  %v8423_v26 = vsel %vm8295_vm4, %v9297_v15, %v8359_v12  ;;  %v8143_v4 = vpop.f32.mrb[40].mxu0  ;;  %v6710_v6 = vpop.f32.mrb[20].mxu1 }
 0x388   : > { %9047 = vst [vmem:[%s12153_s26 + $0x38] sm:$0xff] %v8423_v26  ;;  %v6982_v1 = vsel %vm6854_vm3, %v9235_v8, %v6918_v16  ;;  %vm6855_vm5 = vcmp.ge.f32.partialorder %v9236_v36, 0.0  ;;  %v6919_v48 = vmul.f32 0.2, %v9236_v36  ;;  %v9298_v11 = vadd.f32 %v8143_v4, %v12157_v13  ;;  %v8145_v55 = vpop.f32.mrb[41].mxu0  ;;  %v6712_v42 = vpop.f32.mrb[21].mxu1 }
 0x389   : > { %7046 = vst [vmem:[%s12153_s26 + $0x48] sm:$0xff] %v6982_v1  ;;  %vm6856_vm6 = vcmp.ge.f32.partialorder %v9237_v56, 0.0  ;;  %v6920_v0 = vmul.f32 0.2, %v9237_v56  ;;  %v9299_v51 = vadd.f32 %v8145_v55, %v12160_v61  ;;  %v8147_v45 = vpop.f32.mrb[42].mxu0  ;;  %v9238_v17 = vadd.f32 %v6710_v6, %v12140_v43  ;;  %v6714_v62 = vpop.f32.mrb[22].mxu1 }
 0x38a   : > { %v6983_v22 = vsel %vm6855_vm5, %v9236_v36, %v6919_v48  ;;  %vm8296_vm7 = vcmp.ge.f32.partialorder %v9298_v11, 0.0  ;;  %v8360_v34 = vmul.f32 0.2, %v9298_v11  ;;  %v9300_v37 = vadd.f32 %v8147_v45, %v12157_v13  ;;  %v8149_v32 = vpop.f32.mrb[43].mxu0  ;;  %v6716_v40 = vpop.f32.mrb[23].mxu1 }
 0x38b   : > { %7047 = vst [vmem:[%s12153_s26 + $0x50] sm:$0xff] %v6983_v22  ;;  %v6984_v9 = vsel %vm6856_vm6, %v9237_v56, %v6920_v0  ;;  %vm8297_vm8 = vcmp.ge.f32.partialorder %v9299_v51, 0.0  ;;  %v8361_v28 = vmul.f32 0.2, %v9299_v51  ;;  %v9301_v49 = vadd.f32 %v8149_v32, %v12160_v61 }
 0x38c   : > { %v8424_v44 = vsel %vm8296_vm7, %v9298_v11, %v8360_v34  ;;  %7048 = vst [vmem:[%s12153_s26 + $0x58] sm:$0xff] %v6984_v9  ;;  %vm8298_vm10 = vcmp.ge.f32.partialorder %v9300_v37, 0.0  ;;  %v8362_v3 = vmul.f32 0.2, %v9300_v37  ;;  %vm6857_vm11 = vcmp.ge.f32.partialorder %v9238_v17, 0.0 }
 0x38d   : > { %9048 = vst [vmem:[%s12153_s26 + $0x60] sm:$0xff] %v8424_v44  ;;  %v8425_v35 = vsel %vm8297_vm8, %v9299_v51, %v8361_v28  ;;  %vm8299_vm9 = vcmp.ge.f32.partialorder %v9301_v49, 0.0  ;;  %v8363_v20 = vmul.f32 0.2, %v9301_v49  ;;  %v6921_v39 = vmul.f32 0.2, %v9238_v17 }
 0x38e   : > { %9049 = vst [vmem:[%s12153_s26 + $0x68] sm:$0xff] %v8425_v35  ;;  %v8426_v24 = vsel %vm8298_vm10, %v9300_v37, %v8362_v3  ;;  %v9239_v5 = vadd.f32 %v6712_v42, %v12142_v30  ;;  %v9240_v52 = vadd.f32 %v6714_v62, %v12140_v43  ;;  %v9241_v58 = vadd.f32 %v6716_v40, %v12142_v30 }
 0x38f   : > { %9050 = vst [vmem:[%s12153_s26 + $0x70] sm:$0xff] %v8426_v24  ;;  %v8427_v31 = vsel %vm8299_vm9, %v9301_v49, %v8363_v20  ;;  %v6985_v29 = vsel %vm6857_vm11, %v9238_v17, %v6921_v39  ;;  %v8153_v50 = vpop.f32.mrb[44].mxu0  ;;  %v6720_v41 = vpop.f32.mrb[24].mxu1 }
 0x390   : > { %9051 = vst [vmem:[%s12153_s26 + $0x78] sm:$0xff] %v8427_v31  ;;  %7049 = vst [vmem:[%s12153_s26 + $0x80] sm:$0xff] %v6985_v29  ;;  %vm6858_vm12 = vcmp.ge.f32.partialorder %v9239_v5, 0.0  ;;  %v6922_v57 = vmul.f32 0.2, %v9239_v5  ;;  %vm6859_vm13 = vcmp.ge.f32.partialorder %v9240_v52, 0.0  ;;  %v9302_v53 = vadd.f32 %v8153_v50, %v12157_v13 }
 0x391   : > { %v6923_v27 = vmul.f32 0.2, %v9240_v52  ;;  %vm6860_vm14 = vcmp.ge.f32.partialorder %v9241_v58, 0.0  ;;  %v6924_v14 = vmul.f32 0.2, %v9241_v58  ;;  %v8155_v18 = vpop.f32.mrb[45].mxu0  ;;  %v9242_v33 = vadd.f32 %v6720_v41, %v12140_v43 }
 0x392   : > { %v6722_v54 = vpop.f32.mrb[25].mxu1  ;;  %v6986_v38 = vsel %vm6858_vm12, %v9239_v5, %v6922_v57  ;;  %v9303_v2 = vadd.f32 %v8155_v18, %v12160_v61  ;;  %v8157_v25 = vpop.f32.mrb[46].mxu0  ;;  %vm8300_vm15 = vcmp.ge.f32.partialorder %v9302_v53, 0.0  ;;  %v8364_v59 = vmul.f32 0.2, %v9302_v53 }
 0x393   : > { %v6987_v8 = vsel %vm6859_vm13, %v9240_v52, %v6923_v27  ;;  %v9243_v19 = vadd.f32 %v6722_v54, %v12142_v30  ;;  %v6724_v63 = vpop.f32.mrb[26].mxu1  ;;  %7050 = vst [vmem:[%s12153_s26 + $0x88] sm:$0xff] %v6986_v38  ;;  %v6988_v23 = vsel %vm6860_vm14, %v9241_v58, %v6924_v14  ;;  %v9304_v15 = vadd.f32 %v8157_v25, %v12157_v13  ;;  %v8159_v47 = vpop.f32.mrb[47].mxu0 }
 0x394   : > { %7051 = vst [vmem:[%s12153_s26 + $0x90] sm:$0xff] %v6987_v8  ;;  %v6726_v21 = vpop.f32.mrb[27].mxu1  ;;  %7052 = vst [vmem:[%s12153_s26 + $0x98] sm:$0xff] %v6988_v23  ;;  %vm8301_vm0 = vcmp.ge.f32.partialorder %v9303_v2, 0.0  ;;  %v8365_v10 = vmul.f32 0.2, %v9303_v2  ;;  %v9305_v60 = vadd.f32 %v8159_v47, %v12160_v61  ;;  %v8428_v12 = vsel %vm8300_vm15, %v9302_v53, %v8364_v59 }
 0x395   : > { %vm6861_vm1 = vcmp.ge.f32.partialorder %v9242_v33, 0.0  ;;  %vm8302_vm2 = vcmp.ge.f32.partialorder %v9304_v15, 0.0  ;;  %v8366_v7 = vmul.f32 0.2, %v9304_v15  ;;  %v6925_v46 = vmul.f32 0.2, %v9242_v33 }
 0x396   : > { %9052 = vst [vmem:[%s12153_s26 + $0xa0] sm:$0xff] %v8428_v12  ;;  %v8429_v16 = vsel %vm8301_vm0, %v9303_v2, %v8365_v10  ;;  %vm8303_vm3 = vcmp.ge.f32.partialorder %v9305_v60, 0.0  ;;  %v8367_v36 = vmul.f32 0.2, %v9305_v60  ;;  %vm6862_vm4 = vcmp.ge.f32.partialorder %v9243_v19, 0.0 }
 0x397   : > { %9053 = vst [vmem:[%s12153_s26 + $0xa8] sm:$0xff] %v8429_v16  ;;  %v8430_v56 = vsel %vm8302_vm2, %v9304_v15, %v8366_v7  ;;  %v6989_v26 = vsel %vm6861_vm1, %v9242_v33, %v6925_v46  ;;  %v6926_v4 = vmul.f32 0.2, %v9243_v19  ;;  %v9244_v6 = vadd.f32 %v6724_v63, %v12140_v43  ;;  %v8163_v1 = vpop.f32.mrb[48].mxu0  ;;  %v6730_v48 = vpop.f32.mrb[28].mxu1 }
 0x398   : > { %9054 = vst [vmem:[%s12153_s26 + $0xb0] sm:$0xff] %v8430_v56  ;;  %v8431_v11 = vsel %vm8303_vm3, %v9305_v60, %v8367_v36  ;;  %7053 = vst [vmem:[%s12153_s26 + $0xc0] sm:$0xff] %v6989_v26  ;;  %v9306_v55 = vadd.f32 %v8163_v1, %v12157_v13  ;;  %v9245_v42 = vadd.f32 %v6726_v21, %v12142_v30  ;;  %v8165_v0 = vpop.f32.mrb[49].mxu0  ;;  %v6732_v45 = vpop.f32.mrb[29].mxu1 }
 0x399   : > { %v9246_v51 = vadd.f32 %v6730_v48, %v12140_v43  ;;  %9055 = vst [vmem:[%s12153_s26 + $0xb8] sm:$0xff] %v8431_v11  ;;  %v6990_v17 = vsel %vm6862_vm4, %v9243_v19, %v6926_v4  ;;  %vm6863_vm5 = vcmp.ge.f32.partialorder %v9244_v6, 0.0  ;;  %v6927_v62 = vmul.f32 0.2, %v9244_v6  ;;  %v8167_v34 = vpop.f32.mrb[50].mxu0  ;;  %v6734_v37 = vpop.f32.mrb[30].mxu1 }
 0x39a   : > { %v9307_v22 = vadd.f32 %v8165_v0, %v12160_v61  ;;  %7054 = vst [vmem:[%s12153_s26 + $0xc8] sm:$0xff] %v6990_v17  ;;  %vm8304_vm6 = vcmp.ge.f32.partialorder %v9306_v55, 0.0  ;;  %v8368_v32 = vmul.f32 0.2, %v9306_v55  ;;  %vm6864_vm7 = vcmp.ge.f32.partialorder %v9245_v42, 0.0  ;;  %v8169_v44 = vpop.f32.mrb[51].mxu0 }
 0x39b   : > { %v6928_v40 = vmul.f32 0.2, %v9245_v42  ;;  %v6991_v9 = vsel %vm6863_vm5, %v9244_v6, %v6927_v62  ;;  %v9308_v49 = vadd.f32 %v8167_v34, %v12157_v13  ;;  %v6736_v3 = vpop.f32.mrb[31].mxu1  ;;  %v9309_v39 = vadd.f32 %v8169_v44, %v12160_v61 }
 0x39c   : > { %vm8305_vm8 = vcmp.ge.f32.partialorder %v9307_v22, 0.0  ;;  %v8369_v28 = vmul.f32 0.2, %v9307_v22  ;;  %7055 = vst [vmem:[%s12153_s26 + $0xd0] sm:$0xff] %v6991_v9  ;;  %v8432_v35 = vsel %vm8304_vm6, %v9306_v55, %v8368_v32  ;;  %vm6865_vm10 = vcmp.ge.f32.partialorder %v9246_v51, 0.0 }
 0x39d   : > { %v6992_v20 = vsel %vm6864_vm7, %v9245_v42, %v6928_v40  ;;  %9056 = vst [vmem:[%s12153_s26 + $0xe0] sm:$0xff] %v8432_v35  ;;  %vm8306_vm11 = vcmp.ge.f32.partialorder %v9308_v49, 0.0  ;;  %v8370_v5 = vmul.f32 0.2, %v9308_v49  ;;  %v6929_v52 = vmul.f32 0.2, %v9246_v51 }
 0x39e   : > { %7056 = vst [vmem:[%s12153_s26 + $0xd8] sm:$0xff] %v6992_v20  ;;  %v8433_v24 = vsel %vm8305_vm8, %v9307_v22, %v8369_v28  ;;  %vm8307_vm9 = vcmp.ge.f32.partialorder %v9309_v39, 0.0  ;;  %v8371_v58 = vmul.f32 0.2, %v9309_v39  ;;  %v9247_v31 = vadd.f32 %v6732_v45, %v12142_v30 }
 0x39f   : > { %9057 = vst [vmem:[%s12153_s26 + $0xe8] sm:$0xff] %v8433_v24  ;;  %v9248_v29 = vadd.f32 %v6734_v37, %v12140_v43  ;;  %v8434_v50 = vsel %vm8306_vm11, %v9308_v49, %v8370_v5  ;;  %v6993_v41 = vsel %vm6865_vm10, %v9246_v51, %v6929_v52  ;;  %v8173_v57 = vpop.f32.mrb[52].mxu0  ;;  %v9249_v27 = vadd.f32 %v6736_v3, %v12142_v30  ;;  %v6740_v53 = vpop.f32.mrb[32].mxu1 }
 0x3a0   : > { %9058 = vst [vmem:[%s12153_s26 + $0xf0] sm:$0xff] %v8434_v50  ;;  %v8435_v14 = vsel %vm8307_vm9, %v9309_v39, %v8371_v58  ;;  %7057 = vst [vmem:[%s12153_s26 + $0x100] sm:$0xff] %v6993_v41  ;;  %vm6866_vm12 = vcmp.ge.f32.partialorder %v9247_v31, 0.0  ;;  %v6930_v18 = vmul.f32 0.2, %v9247_v31  ;;  %v8175_v33 = vpop.f32.mrb[53].mxu0  ;;  %v9310_v8 = vadd.f32 %v8173_v57, %v12157_v13 }
 0x3a1   : > { %vm6867_vm13 = vcmp.ge.f32.partialorder %v9248_v29, 0.0  ;;  %v6742_v54 = vpop.f32.mrb[33].mxu1  ;;  %9059 = vst [vmem:[%s12153_s26 + $0xf8] sm:$0xff] %v8435_v14  ;;  %v6931_v38 = vmul.f32 0.2, %v9248_v29  ;;  %vm6868_vm14 = vcmp.ge.f32.partialorder %v9249_v27, 0.0  ;;  %v9311_v63 = vadd.f32 %v8175_v33, %v12160_v61 }
 0x3a2   : > { %v6932_v2 = vmul.f32 0.2, %v9249_v27  ;;  %v8177_v25 = vpop.f32.mrb[54].mxu0  ;;  %v6994_v19 = vsel %vm6866_vm12, %v9247_v31, %v6930_v18  ;;  %v9250_v15 = vadd.f32 %v6740_v53, %v12140_v43  ;;  %v6744_v47 = vpop.f32.mrb[34].mxu1  ;;  %vm8308_vm15 = vcmp.ge.f32.partialorder %v9310_v8, 0.0 }
 0x3a3   : > { %v9312_v59 = vadd.f32 %v8177_v25, %v12157_v13  ;;  %v8179_v23 = vpop.f32.mrb[55].mxu0  ;;  %7058 = vst [vmem:[%s12153_s26 + $0x108] sm:$0xff] %v6994_v19  ;;  %v6995_v21 = vsel %vm6867_vm13, %v9248_v29, %v6931_v38  ;;  %v8372_v10 = vmul.f32 0.2, %v9310_v8  ;;  %v6746_v12 = vpop.f32.mrb[35].mxu1  ;;  %vm8309_vm0 = vcmp.ge.f32.partialorder %v9311_v63, 0.0 }
 0x3a4   : > { %v6996_v60 = vsel %vm6868_vm14, %v9249_v27, %v6932_v2  ;;  %7059 = vst [vmem:[%s12153_s26 + $0x110] sm:$0xff] %v6995_v21  ;;  %v8373_v7 = vmul.f32 0.2, %v9311_v63  ;;  %v9313_v36 = vadd.f32 %v8179_v23, %v12160_v61  ;;  %vm6869_vm2 = vcmp.ge.f32.partialorder %v9250_v15, 0.0 }
 0x3a5   : > { %7060 = vst [vmem:[%s12153_s26 + $0x118] sm:$0xff] %v6996_v60  ;;  %vm8310_vm1 = vcmp.ge.f32.partialorder %v9312_v59, 0.0  ;;  %v8374_v46 = vmul.f32 0.2, %v9312_v59  ;;  %v8436_v16 = vsel %vm8308_vm15, %v9310_v8, %v8372_v10  ;;  %v6933_v56 = vmul.f32 0.2, %v9250_v15 }
 0x3a6   : > { %9060 = vst [vmem:[%s12153_s26 + $0x120] sm:$0xff] %v8436_v16  ;;  %v8437_v26 = vsel %vm8309_vm0, %v9311_v63, %v8373_v7  ;;  %v9251_v6 = vadd.f32 %v6742_v54, %v12142_v30  ;;  %v9252_v1 = vadd.f32 %v6744_v47, %v12140_v43  ;;  %vm8311_vm3 = vcmp.ge.f32.partialorder %v9313_v36, 0.0 }
 0x3a7   : > { %v8438_v4 = vsel %vm8310_vm1, %v9312_v59, %v8374_v46  ;;  %9061 = vst [vmem:[%s12153_s26 + $0x128] sm:$0xff] %v8437_v26  ;;  %v8375_v48 = vmul.f32 0.2, %v9313_v36  ;;  %v6997_v11 = vsel %vm6869_vm2, %v9250_v15, %v6933_v56  ;;  %v8183_v55 = vpop.f32.mrb[56].mxu0  ;;  %v9253_v42 = vadd.f32 %v6746_v12, %v12142_v30  ;;  %v6750_v0 = vpop.f32.mrb[36].mxu1 }
 0x3a8   : > { %9062 = vst [vmem:[%s12153_s26 + $0x130] sm:$0xff] %v8438_v4  ;;  %7061 = vst [vmem:[%s12153_s26 + $0x140] sm:$0xff] %v6997_v11  ;;  %vm6870_vm4 = vcmp.ge.f32.partialorder %v9251_v6, 0.0  ;;  %v6934_v51 = vmul.f32 0.2, %v9251_v6  ;;  %vm6871_vm5 = vcmp.ge.f32.partialorder %v9252_v1, 0.0  ;;  %v9314_v62 = vadd.f32 %v8183_v55, %v12157_v13 }
 0x3a9   : > { %v6935_v45 = vmul.f32 0.2, %v9252_v1  ;;  %v8439_v17 = vsel %vm8311_vm3, %v9313_v36, %v8375_v48  ;;  %vm6872_vm6 = vcmp.ge.f32.partialorder %v9253_v42, 0.0  ;;  %v6936_v22 = vmul.f32 0.2, %v9253_v42  ;;  %v8185_v34 = vpop.f32.mrb[57].mxu0 }
 0x3aa   : > { %v6752_v37 = vpop.f32.mrb[37].mxu1  ;;  %9063 = vst [vmem:[%s12153_s26 + $0x138] sm:$0xff] %v8439_v17  ;;  %v6998_v32 = vsel %vm6870_vm4, %v9251_v6, %v6934_v51  ;;  %v9315_v9 = vadd.f32 %v8185_v34, %v12160_v61  ;;  %v8187_v28 = vpop.f32.mrb[58].mxu0  ;;  %v9254_v49 = vadd.f32 %v6750_v0, %v12140_v43  ;;  %vm8312_vm7 = vcmp.ge.f32.partialorder %v9314_v62, 0.0 }
 0x3ab   : > { %v6999_v40 = vsel %vm6871_vm5, %v9252_v1, %v6935_v45  ;;  %v6754_v44 = vpop.f32.mrb[38].mxu1  ;;  %7062 = vst [vmem:[%s12153_s26 + $0x148] sm:$0xff] %v6998_v32  ;;  %v8376_v3 = vmul.f32 0.2, %v9314_v62  ;;  %v7000_v35 = vsel %vm6872_vm6, %v9253_v42, %v6936_v22  ;;  %v9316_v20 = vadd.f32 %v8187_v28, %v12157_v13  ;;  %v8189_v39 = vpop.f32.mrb[59].mxu0 }
 0x3ac   : > { %7063 = vst [vmem:[%s12153_s26 + $0x150] sm:$0xff] %v6999_v40  ;;  %v6756_v24 = vpop.f32.mrb[39].mxu1  ;;  %7064 = vst [vmem:[%s12153_s26 + $0x158] sm:$0xff] %v7000_v35  ;;  %vm8313_vm8 = vcmp.ge.f32.partialorder %v9315_v9, 0.0  ;;  %v8377_v5 = vmul.f32 0.2, %v9315_v9  ;;  %v9317_v52 = vadd.f32 %v8189_v39, %v12160_v61  ;;  %v9255_v57 = vadd.f32 %v6752_v37, %v12142_v30 }
 0x3ad   : > { %vm6873_vm10 = vcmp.ge.f32.partialorder %v9254_v49, 0.0  ;;  %v8440_v58 = vsel %vm8312_vm7, %v9314_v62, %v8376_v3  ;;  %vm8314_vm11 = vcmp.ge.f32.partialorder %v9316_v20, 0.0  ;;  %v8378_v31 = vmul.f32 0.2, %v9316_v20 }
 0x3ae   : > { %v6937_v29 = vmul.f32 0.2, %v9254_v49  ;;  %9064 = vst [vmem:[%s12153_s26 + $0x160] sm:$0xff] %v8440_v58  ;;  %v8441_v50 = vsel %vm8313_vm8, %v9315_v9, %v8377_v5  ;;  %vm8315_vm9 = vcmp.ge.f32.partialorder %v9317_v52, 0.0  ;;  %v8379_v41 = vmul.f32 0.2, %v9317_v52 }
 0x3af   : > { %9065 = vst [vmem:[%s12153_s26 + $0x168] sm:$0xff] %v8441_v50  ;;  %v8442_v27 = vsel %vm8314_vm11, %v9316_v20, %v8378_v31  ;;  %v9256_v14 = vadd.f32 %v6754_v44, %v12140_v43  ;;  %v8193_v18 = vpop.f32.mrb[60].mxu0  ;;  %v9257_v33 = vadd.f32 %v6756_v24, %v12142_v30  ;;  %v6760_v54 = vpop.f32.mrb[40].mxu1  ;;  %vm6874_vm12 = vcmp.ge.f32.partialorder %v9255_v57, 0.0 }
 0x3b0   : > { %v7001_v53 = vsel %vm6873_vm10, %v9254_v49, %v6937_v29  ;;  %9066 = vst [vmem:[%s12153_s26 + $0x170] sm:$0xff] %v8442_v27  ;;  %v8443_v38 = vsel %vm8315_vm9, %v9317_v52, %v8379_v41  ;;  %v6938_v8 = vmul.f32 0.2, %v9255_v57  ;;  %v9318_v2 = vadd.f32 %v8193_v18, %v12157_v13  ;;  %v8195_v25 = vpop.f32.mrb[61].mxu0  ;;  %v6762_v19 = vpop.f32.mrb[41].mxu1 }
 0x3b1   : > { %7065 = vst [vmem:[%s12153_s26 + $0x180] sm:$0xff] %v7001_v53  ;;  %9067 = vst [vmem:[%s12153_s26 + $0x178] sm:$0xff] %v8443_v38  ;;  %vm6875_vm13 = vcmp.ge.f32.partialorder %v9256_v14, 0.0  ;;  %v6939_v63 = vmul.f32 0.2, %v9256_v14  ;;  %vm6876_vm14 = vcmp.ge.f32.partialorder %v9257_v33, 0.0  ;;  %v9319_v47 = vadd.f32 %v8195_v25, %v12160_v61 }
 0x3b2   : > { %v6940_v59 = vmul.f32 0.2, %v9257_v33  ;;  %v7002_v23 = vsel %vm6874_vm12, %v9255_v57, %v6938_v8  ;;  %vm8316_vm15 = vcmp.ge.f32.partialorder %v9318_v2, 0.0  ;;  %v8380_v15 = vmul.f32 0.2, %v9318_v2  ;;  %v8197_v21 = vpop.f32.mrb[62].mxu0 }
 0x3b3   : > { %v6764_v10 = vpop.f32.mrb[42].mxu1  ;;  %7066 = vst [vmem:[%s12153_s26 + $0x188] sm:$0xff] %v7002_v23  ;;  %v7003_v60 = vsel %vm6875_vm13, %v9256_v14, %v6939_v63  ;;  %v9320_v7 = vadd.f32 %v8197_v21, %v12157_v13  ;;  %v8199_v46 = vpop.f32.mrb[63].mxu0  ;;  %v9258_v16 = vadd.f32 %v6760_v54, %v12140_v43  ;;  %vm8317_vm0 = vcmp.ge.f32.partialorder %v9319_v47, 0.0 }
 0x3b4   : > { %v7004_v12 = vsel %vm6876_vm14, %v9257_v33, %v6940_v59  ;;  %v6766_v36 = vpop.f32.mrb[43].mxu1  ;;  %7067 = vst [vmem:[%s12153_s26 + $0x190] sm:$0xff] %v7003_v60  ;;  %v8444_v56 = vsel %vm8316_vm15, %v9318_v2, %v8380_v15  ;;  %v8381_v26 = vmul.f32 0.2, %v9319_v47  ;;  %v9321_v4 = vadd.f32 %v8199_v46, %v12160_v61 }
 0x3b5   : > { %7068 = vst [vmem:[%s12153_s26 + $0x198] sm:$0xff] %v7004_v12  ;;  %9068 = vst [vmem:[%s12153_s26 + $0x1a0] sm:$0xff] %v8444_v56  ;;  %vm8318_vm1 = vcmp.ge.f32.partialorder %v9320_v7, 0.0  ;;  %v8382_v6 = vmul.f32 0.2, %v9320_v7  ;;  %vm6877_vm2 = vcmp.ge.f32.partialorder %v9258_v16, 0.0  ;;  %v9259_v55 = vadd.f32 %v6762_v19, %v12142_v30 }
 0x3b6   : > { %v6941_v1 = vmul.f32 0.2, %v9258_v16  ;;  %v8445_v48 = vsel %vm8317_vm0, %v9319_v47, %v8381_v26  ;;  %vm8319_vm3 = vcmp.ge.f32.partialorder %v9321_v4, 0.0  ;;  %v8383_v11 = vmul.f32 0.2, %v9321_v4 }
 0x3b7   : > { %9069 = vst [vmem:[%s12153_s26 + $0x1a8] sm:$0xff] %v8445_v48  ;;  %v8446_v42 = vsel %vm8318_vm1, %v9320_v7, %v8382_v6  ;;  %v9260_v51 = vadd.f32 %v6764_v10, %v12140_v43  ;;  %v8203_v45 = vpop.f32.mrb[64].mxu0  ;;  %v9261_v17 = vadd.f32 %v6766_v36, %v12142_v30  ;;  %v6770_v62 = vpop.f32.mrb[44].mxu1  ;;  %vm6878_vm4 = vcmp.ge.f32.partialorder %v9259_v55, 0.0 }
 0x3b8   : > { %v7005_v0 = vsel %vm6877_vm2, %v9258_v16, %v6941_v1  ;;  %9070 = vst [vmem:[%s12153_s26 + $0x1b0] sm:$0xff] %v8446_v42  ;;  %v8447_v22 = vsel %vm8319_vm3, %v9321_v4, %v8383_v11  ;;  %v6942_v34 = vmul.f32 0.2, %v9259_v55  ;;  %v9322_v37 = vadd.f32 %v8203_v45, %v12157_v13  ;;  %v8205_v32 = vpop.f32.mrb[65].mxu0  ;;  %v6772_v40 = vpop.f32.mrb[45].mxu1 }
 0x3b9   : > { %7069 = vst [vmem:[%s12153_s26 + $0x1c0] sm:$0xff] %v7005_v0  ;;  %9071 = vst [vmem:[%s12153_s26 + $0x1b8] sm:$0xff] %v8447_v22  ;;  %vm6879_vm5 = vcmp.ge.f32.partialorder %v9260_v51, 0.0  ;;  %v6943_v9 = vmul.f32 0.2, %v9260_v51  ;;  %vm6880_vm6 = vcmp.ge.f32.partialorder %v9261_v17, 0.0  ;;  %v9323_v3 = vadd.f32 %v8205_v32, %v12160_v61 }
 0x3ba   : > { %v6944_v28 = vmul.f32 0.2, %v9261_v17  ;;  %v7006_v49 = vsel %vm6878_vm4, %v9259_v55, %v6942_v34  ;;  %vm8320_vm7 = vcmp.ge.f32.partialorder %v9322_v37, 0.0  ;;  %v8384_v44 = vmul.f32 0.2, %v9322_v37  ;;  %v8207_v35 = vpop.f32.mrb[66].mxu0 }
 0x3bb   : > { %v6774_v20 = vpop.f32.mrb[46].mxu1  ;;  %7070 = vst [vmem:[%s12153_s26 + $0x1c8] sm:$0xff] %v7006_v49  ;;  %v7007_v39 = vsel %vm6879_vm5, %v9260_v51, %v6943_v9  ;;  %v9324_v5 = vadd.f32 %v8207_v35, %v12157_v13  ;;  %v8209_v52 = vpop.f32.mrb[67].mxu0  ;;  %v9262_v58 = vadd.f32 %v6770_v62, %v12140_v43  ;;  %vm8321_vm8 = vcmp.ge.f32.partialorder %v9323_v3, 0.0 }
 0x3bc   : > { %v7008_v24 = vsel %vm6880_vm6, %v9261_v17, %v6944_v28  ;;  %v6776_v31 = vpop.f32.mrb[47].mxu1  ;;  %7071 = vst [vmem:[%s12153_s26 + $0x1d0] sm:$0xff] %v7007_v39  ;;  %v8448_v29 = vsel %vm8320_vm7, %v9322_v37, %v8384_v44  ;;  %v8385_v50 = vmul.f32 0.2, %v9323_v3  ;;  %v9325_v41 = vadd.f32 %v8209_v52, %v12160_v61 }
 0x3bd   : > { %7072 = vst [vmem:[%s12153_s26 + $0x1d8] sm:$0xff] %v7008_v24  ;;  %9072 = vst [vmem:[%s12153_s26 + $0x1e0] sm:$0xff] %v8448_v29  ;;  %vm8322_vm10 = vcmp.ge.f32.partialorder %v9324_v5, 0.0  ;;  %v8386_v57 = vmul.f32 0.2, %v9324_v5  ;;  %vm6881_vm11 = vcmp.ge.f32.partialorder %v9262_v58, 0.0  ;;  %v9263_v18 = vadd.f32 %v6772_v40, %v12142_v30 }
 0x3be   : > { %v6945_v27 = vmul.f32 0.2, %v9262_v58  ;;  %v8449_v53 = vsel %vm8321_vm8, %v9323_v3, %v8385_v50  ;;  %vm8323_vm9 = vcmp.ge.f32.partialorder %v9325_v41, 0.0  ;;  %v8387_v14 = vmul.f32 0.2, %v9325_v41 }
 0x3bf   : > { %9073 = vst [vmem:[%s12153_s26 + $0x1e8] sm:$0xff] %v8449_v53  ;;  %v8450_v33 = vsel %vm8322_vm10, %v9324_v5, %v8386_v57  ;;  %v9264_v38 = vadd.f32 %v6774_v20, %v12140_v43  ;;  %v8213_v8 = vpop.f32.mrb[68].mxu0  ;;  %v9265_v2 = vadd.f32 %v6776_v31, %v12142_v30  ;;  %v6780_v25 = vpop.f32.mrb[48].mxu1  ;;  %vm6882_vm12 = vcmp.ge.f32.partialorder %v9263_v18, 0.0 }
 0x3c0   : > { %v7009_v54 = vsel %vm6881_vm11, %v9262_v58, %v6945_v27  ;;  %9074 = vst [vmem:[%s12153_s26 + $0x1f0] sm:$0xff] %v8450_v33  ;;  %v8451_v19 = vsel %vm8323_vm9, %v9325_v41, %v8387_v14  ;;  %v6946_v63 = vmul.f32 0.2, %v9263_v18  ;;  %v9326_v59 = vadd.f32 %v8213_v8, %v12157_v13  ;;  %v8215_v23 = vpop.f32.mrb[69].mxu0  ;;  %v6782_v15 = vpop.f32.mrb[49].mxu1 }
 0x3c1   : > { %7073 = vst [vmem:[%s12153_s26 + $0x200] sm:$0xff] %v7009_v54  ;;  %9075 = vst [vmem:[%s12153_s26 + $0x1f8] sm:$0xff] %v8451_v19  ;;  %vm6883_vm13 = vcmp.ge.f32.partialorder %v9264_v38, 0.0  ;;  %v6947_v47 = vmul.f32 0.2, %v9264_v38  ;;  %vm6884_vm14 = vcmp.ge.f32.partialorder %v9265_v2, 0.0  ;;  %v9327_v12 = vadd.f32 %v8215_v23, %v12160_v61 }
 0x3c2   : > { %v6948_v21 = vmul.f32 0.2, %v9265_v2  ;;  %v7010_v10 = vsel %vm6882_vm12, %v9263_v18, %v6946_v63  ;;  %vm8324_vm15 = vcmp.ge.f32.partialorder %v9326_v59, 0.0  ;;  %v8388_v60 = vmul.f32 0.2, %v9326_v59  ;;  %v8217_v7 = vpop.f32.mrb[70].mxu0 }
 0x3c3   : > { %v6784_v46 = vpop.f32.mrb[50].mxu1  ;;  %7074 = vst [vmem:[%s12153_s26 + $0x208] sm:$0xff] %v7010_v10  ;;  %v7011_v16 = vsel %vm6883_vm13, %v9264_v38, %v6947_v47  ;;  %v9328_v56 = vadd.f32 %v8217_v7, %v12157_v13  ;;  %v8219_v26 = vpop.f32.mrb[71].mxu0  ;;  %v9266_v4 = vadd.f32 %v6780_v25, %v12140_v43  ;;  %vm8325_vm0 = vcmp.ge.f32.partialorder %v9327_v12, 0.0 }
 0x3c4   : > { %v7012_v36 = vsel %vm6884_vm14, %v9265_v2, %v6948_v21  ;;  %v6786_v6 = vpop.f32.mrb[51].mxu1  ;;  %7075 = vst [vmem:[%s12153_s26 + $0x210] sm:$0xff] %v7011_v16  ;;  %v8452_v1 = vsel %vm8324_vm15, %v9326_v59, %v8388_v60  ;;  %v8389_v48 = vmul.f32 0.2, %v9327_v12  ;;  %v9329_v11 = vadd.f32 %v8219_v26, %v12160_v61 }
 0x3c5   : > { %7076 = vst [vmem:[%s12153_s26 + $0x218] sm:$0xff] %v7012_v36  ;;  %9076 = vst [vmem:[%s12153_s26 + $0x220] sm:$0xff] %v8452_v1  ;;  %vm8326_vm1 = vcmp.ge.f32.partialorder %v9328_v56, 0.0  ;;  %v8390_v55 = vmul.f32 0.2, %v9328_v56  ;;  %vm6885_vm2 = vcmp.ge.f32.partialorder %v9266_v4, 0.0  ;;  %v9267_v45 = vadd.f32 %v6782_v15, %v12142_v30 }
 0x3c6   : > { %v6949_v42 = vmul.f32 0.2, %v9266_v4  ;;  %v8453_v0 = vsel %vm8325_vm0, %v9327_v12, %v8389_v48  ;;  %vm8327_vm3 = vcmp.ge.f32.partialorder %v9329_v11, 0.0  ;;  %v8391_v51 = vmul.f32 0.2, %v9329_v11 }
 0x3c7   : > { %9077 = vst [vmem:[%s12153_s26 + $0x228] sm:$0xff] %v8453_v0  ;;  %v8454_v17 = vsel %vm8326_vm1, %v9328_v56, %v8390_v55  ;;  %v9268_v22 = vadd.f32 %v6784_v46, %v12140_v43  ;;  %v8223_v34 = vpop.f32.mrb[72].mxu0  ;;  %v9269_v37 = vadd.f32 %v6786_v6, %v12142_v30  ;;  %v6790_v32 = vpop.f32.mrb[52].mxu1  ;;  %vm6886_vm4 = vcmp.ge.f32.partialorder %v9267_v45, 0.0 }
 0x3c8   : > { %v7013_v62 = vsel %vm6885_vm2, %v9266_v4, %v6949_v42  ;;  %9078 = vst [vmem:[%s12153_s26 + $0x230] sm:$0xff] %v8454_v17  ;;  %v8455_v40 = vsel %vm8327_vm3, %v9329_v11, %v8391_v51  ;;  %v6950_v9 = vmul.f32 0.2, %v9267_v45  ;;  %v9330_v28 = vadd.f32 %v8223_v34, %v12157_v13  ;;  %v8225_v49 = vpop.f32.mrb[73].mxu0  ;;  %v6792_v44 = vpop.f32.mrb[53].mxu1 }
 0x3c9   : > { %7077 = vst [vmem:[%s12153_s26 + $0x240] sm:$0xff] %v7013_v62  ;;  %9079 = vst [vmem:[%s12153_s26 + $0x238] sm:$0xff] %v8455_v40  ;;  %vm6887_vm5 = vcmp.ge.f32.partialorder %v9268_v22, 0.0  ;;  %v6951_v3 = vmul.f32 0.2, %v9268_v22  ;;  %vm6888_vm6 = vcmp.ge.f32.partialorder %v9269_v37, 0.0  ;;  %v9331_v24 = vadd.f32 %v8225_v49, %v12160_v61 }
 0x3ca   : > { %v6952_v35 = vmul.f32 0.2, %v9269_v37  ;;  %v7014_v20 = vsel %vm6886_vm4, %v9267_v45, %v6950_v9  ;;  %vm8328_vm7 = vcmp.ge.f32.partialorder %v9330_v28, 0.0  ;;  %v8392_v39 = vmul.f32 0.2, %v9330_v28  ;;  %v8227_v5 = vpop.f32.mrb[74].mxu0 }
 0x3cb   : > { %v6794_v52 = vpop.f32.mrb[54].mxu1  ;;  %7078 = vst [vmem:[%s12153_s26 + $0x248] sm:$0xff] %v7014_v20  ;;  %v7015_v58 = vsel %vm6887_vm5, %v9268_v22, %v6951_v3  ;;  %v9332_v29 = vadd.f32 %v8227_v5, %v12157_v13  ;;  %v8229_v50 = vpop.f32.mrb[75].mxu0  ;;  %v9270_v41 = vadd.f32 %v6790_v32, %v12140_v43  ;;  %vm8329_vm8 = vcmp.ge.f32.partialorder %v9331_v24, 0.0 }
 0x3cc   : > { %v7016_v31 = vsel %vm6888_vm6, %v9269_v37, %v6952_v35  ;;  %v6796_v57 = vpop.f32.mrb[55].mxu1  ;;  %7079 = vst [vmem:[%s12153_s26 + $0x250] sm:$0xff] %v7015_v58  ;;  %v8456_v27 = vsel %vm8328_vm7, %v9330_v28, %v8392_v39  ;;  %v8393_v53 = vmul.f32 0.2, %v9331_v24  ;;  %v9333_v14 = vadd.f32 %v8229_v50, %v12160_v61 }
 0x3cd   : > { %7080 = vst [vmem:[%s12153_s26 + $0x258] sm:$0xff] %v7016_v31  ;;  %9080 = vst [vmem:[%s12153_s26 + $0x260] sm:$0xff] %v8456_v27  ;;  %vm8330_vm10 = vcmp.ge.f32.partialorder %v9332_v29, 0.0  ;;  %v8394_v18 = vmul.f32 0.2, %v9332_v29  ;;  %vm6889_vm11 = vcmp.ge.f32.partialorder %v9270_v41, 0.0  ;;  %v9271_v8 = vadd.f32 %v6792_v44, %v12142_v30 }
 0x3ce   : > { %v6953_v33 = vmul.f32 0.2, %v9270_v41  ;;  %v8457_v54 = vsel %vm8329_vm8, %v9331_v24, %v8393_v53  ;;  %vm8331_vm9 = vcmp.ge.f32.partialorder %v9333_v14, 0.0  ;;  %v8395_v38 = vmul.f32 0.2, %v9333_v14 }
 0x3cf   : > { %9081 = vst [vmem:[%s12153_s26 + $0x268] sm:$0xff] %v8457_v54  ;;  %v8458_v2 = vsel %vm8330_vm10, %v9332_v29, %v8394_v18  ;;  %v9272_v19 = vadd.f32 %v6794_v52, %v12140_v43  ;;  %v8233_v63 = vpop.f32.mrb[76].mxu0  ;;  %v9273_v59 = vadd.f32 %v6796_v57, %v12142_v30  ;;  %v6800_v23 = vpop.f32.mrb[56].mxu1  ;;  %vm6890_vm12 = vcmp.ge.f32.partialorder %v9271_v8, 0.0 }
 0x3d0   : > { %v7017_v25 = vsel %vm6889_vm11, %v9270_v41, %v6953_v33  ;;  %9082 = vst [vmem:[%s12153_s26 + $0x270] sm:$0xff] %v8458_v2  ;;  %v8459_v15 = vsel %vm8331_vm9, %v9333_v14, %v8395_v38  ;;  %v6954_v47 = vmul.f32 0.2, %v9271_v8  ;;  %v9334_v21 = vadd.f32 %v8233_v63, %v12157_v13  ;;  %v8235_v10 = vpop.f32.mrb[77].mxu0  ;;  %v6802_v60 = vpop.f32.mrb[57].mxu1 }
 0x3d1   : > { %7081 = vst [vmem:[%s12153_s26 + $0x280] sm:$0xff] %v7017_v25  ;;  %9083 = vst [vmem:[%s12153_s26 + $0x278] sm:$0xff] %v8459_v15  ;;  %vm6891_vm13 = vcmp.ge.f32.partialorder %v9272_v19, 0.0  ;;  %v6955_v12 = vmul.f32 0.2, %v9272_v19  ;;  %vm6892_vm14 = vcmp.ge.f32.partialorder %v9273_v59, 0.0  ;;  %v9335_v36 = vadd.f32 %v8235_v10, %v12160_v61 }
 0x3d2   : > { %v6956_v7 = vmul.f32 0.2, %v9273_v59  ;;  %v7018_v46 = vsel %vm6890_vm12, %v9271_v8, %v6954_v47  ;;  %vm8332_vm15 = vcmp.ge.f32.partialorder %v9334_v21, 0.0  ;;  %v8396_v16 = vmul.f32 0.2, %v9334_v21  ;;  %v8237_v56 = vpop.f32.mrb[78].mxu0 }
 0x3d3   : > { %v6804_v26 = vpop.f32.mrb[58].mxu1  ;;  %7082 = vst [vmem:[%s12153_s26 + $0x288] sm:$0xff] %v7018_v46  ;;  %v7019_v4 = vsel %vm6891_vm13, %v9272_v19, %v6955_v12  ;;  %v9336_v1 = vadd.f32 %v8237_v56, %v12157_v13  ;;  %v8239_v48 = vpop.f32.mrb[79].mxu0  ;;  %v9274_v11 = vadd.f32 %v6800_v23, %v12140_v43  ;;  %vm8333_vm0 = vcmp.ge.f32.partialorder %v9335_v36, 0.0 }
 0x3d4   : > { %v7020_v6 = vsel %vm6892_vm14, %v9273_v59, %v6956_v7  ;;  %v6806_v55 = vpop.f32.mrb[59].mxu1  ;;  %7083 = vst [vmem:[%s12153_s26 + $0x290] sm:$0xff] %v7019_v4  ;;  %v8460_v42 = vsel %vm8332_vm15, %v9334_v21, %v8396_v16  ;;  %v8397_v0 = vmul.f32 0.2, %v9335_v36  ;;  %v9337_v51 = vadd.f32 %v8239_v48, %v12160_v61 }
 0x3d5   : > { %7084 = vst [vmem:[%s12153_s26 + $0x298] sm:$0xff] %v7020_v6  ;;  %9084 = vst [vmem:[%s12153_s26 + $0x2a0] sm:$0xff] %v8460_v42  ;;  %vm8334_vm1 = vcmp.ge.f32.partialorder %v9336_v1, 0.0  ;;  %v8398_v45 = vmul.f32 0.2, %v9336_v1  ;;  %vm6893_vm2 = vcmp.ge.f32.partialorder %v9274_v11, 0.0  ;;  %v9275_v34 = vadd.f32 %v6802_v60, %v12142_v30 }
 0x3d6   : > { %v6957_v17 = vmul.f32 0.2, %v9274_v11  ;;  %v8461_v62 = vsel %vm8333_vm0, %v9335_v36, %v8397_v0  ;;  %vm8335_vm3 = vcmp.ge.f32.partialorder %v9337_v51, 0.0  ;;  %v8399_v22 = vmul.f32 0.2, %v9337_v51 }
 0x3d7   : > { %9085 = vst [vmem:[%s12153_s26 + $0x2a8] sm:$0xff] %v8461_v62  ;;  %v8462_v37 = vsel %vm8334_vm1, %v9336_v1, %v8398_v45  ;;  %v9276_v40 = vadd.f32 %v6804_v26, %v12140_v43  ;;  %v8243_v9 = vpop.f32.mrb[80].mxu0  ;;  %v9277_v28 = vadd.f32 %v6806_v55, %v12142_v30  ;;  %v6810_v49 = vpop.f32.mrb[60].mxu1  ;;  %vm6894_vm4 = vcmp.ge.f32.partialorder %v9275_v34, 0.0 }
 0x3d8   : > { %v7021_v32 = vsel %vm6893_vm2, %v9274_v11, %v6957_v17  ;;  %9086 = vst [vmem:[%s12153_s26 + $0x2b0] sm:$0xff] %v8462_v37  ;;  %v8463_v44 = vsel %vm8335_vm3, %v9337_v51, %v8399_v22  ;;  %v6958_v3 = vmul.f32 0.2, %v9275_v34  ;;  %v9338_v35 = vadd.f32 %v8243_v9, %v12157_v13  ;;  %v8245_v20 = vpop.f32.mrb[81].mxu0  ;;  %v6812_v39 = vpop.f32.mrb[61].mxu1 }
 0x3d9   : > { %7085 = vst [vmem:[%s12153_s26 + $0x2c0] sm:$0xff] %v7021_v32  ;;  %9087 = vst [vmem:[%s12153_s26 + $0x2b8] sm:$0xff] %v8463_v44  ;;  %vm6895_vm5 = vcmp.ge.f32.partialorder %v9276_v40, 0.0  ;;  %v6959_v24 = vmul.f32 0.2, %v9276_v40  ;;  %vm6896_vm6 = vcmp.ge.f32.partialorder %v9277_v28, 0.0  ;;  %v9339_v31 = vadd.f32 %v8245_v20, %v12160_v61 }
 0x3da   : > { %v6960_v5 = vmul.f32 0.2, %v9277_v28  ;;  %v7022_v52 = vsel %vm6894_vm4, %v9275_v34, %v6958_v3  ;;  %vm8336_vm7 = vcmp.ge.f32.partialorder %v9338_v35, 0.0  ;;  %v8400_v58 = vmul.f32 0.2, %v9338_v35  ;;  %v8247_v29 = vpop.f32.mrb[82].mxu0 }
 0x3db   : > { %v6814_v50 = vpop.f32.mrb[62].mxu1  ;;  %7086 = vst [vmem:[%s12153_s26 + $0x2c8] sm:$0xff] %v7022_v52  ;;  %v7023_v41 = vsel %vm6895_vm5, %v9276_v40, %v6959_v24  ;;  %v9340_v27 = vadd.f32 %v8247_v29, %v12157_v13  ;;  %v8249_v53 = vpop.f32.mrb[83].mxu0  ;;  %v9278_v14 = vadd.f32 %v6810_v49, %v12140_v43  ;;  %vm8337_vm8 = vcmp.ge.f32.partialorder %v9339_v31, 0.0 }
 0x3dc   : > { %v7024_v57 = vsel %vm6896_vm6, %v9277_v28, %v6960_v5  ;;  %v6816_v18 = vpop.f32.mrb[63].mxu1  ;;  %7087 = vst [vmem:[%s12153_s26 + $0x2d0] sm:$0xff] %v7023_v41  ;;  %v8464_v33 = vsel %vm8336_vm7, %v9338_v35, %v8400_v58  ;;  %v8401_v54 = vmul.f32 0.2, %v9339_v31  ;;  %v9341_v38 = vadd.f32 %v8249_v53, %v12160_v61 }
 0x3dd   : > { %7088 = vst [vmem:[%s12153_s26 + $0x2d8] sm:$0xff] %v7024_v57  ;;  %9088 = vst [vmem:[%s12153_s26 + $0x2e0] sm:$0xff] %v8464_v33  ;;  %vm8338_vm10 = vcmp.ge.f32.partialorder %v9340_v27, 0.0  ;;  %v8402_v8 = vmul.f32 0.2, %v9340_v27  ;;  %vm6897_vm11 = vcmp.ge.f32.partialorder %v9278_v14, 0.0  ;;  %v9279_v63 = vadd.f32 %v6812_v39, %v12142_v30 }
 0x3de   : > { %v6961_v2 = vmul.f32 0.2, %v9278_v14  ;;  %v8465_v25 = vsel %vm8337_vm8, %v9339_v31, %v8401_v54  ;;  %vm8339_vm9 = vcmp.ge.f32.partialorder %v9341_v38, 0.0  ;;  %v8403_v19 = vmul.f32 0.2, %v9341_v38 }
 0x3df   : > { %9089 = vst [vmem:[%s12153_s26 + $0x2e8] sm:$0xff] %v8465_v25  ;;  %v8466_v59 = vsel %vm8338_vm10, %v9340_v27, %v8402_v8  ;;  %v9280_v15 = vadd.f32 %v6814_v50, %v12140_v43  ;;  %v8253_v47 = vpop.f32.mrb[84].mxu0  ;;  %v9281_v21 = vadd.f32 %v6816_v18, %v12142_v30  ;;  %v6820_v10 = vpop.f32.mrb[64].mxu1  ;;  %vm6898_vm12 = vcmp.ge.f32.partialorder %v9279_v63, 0.0 }
 0x3e0   : > { %v7025_v23 = vsel %vm6897_vm11, %v9278_v14, %v6961_v2  ;;  %9090 = vst [vmem:[%s12153_s26 + $0x2f0] sm:$0xff] %v8466_v59  ;;  %v8467_v60 = vsel %vm8339_vm9, %v9341_v38, %v8403_v19  ;;  %v6962_v12 = vmul.f32 0.2, %v9279_v63  ;;  %v9342_v7 = vadd.f32 %v8253_v47, %v12157_v13  ;;  %v8255_v46 = vpop.f32.mrb[85].mxu0  ;;  %v6822_v16 = vpop.f32.mrb[65].mxu1 }
 0x3e1   : > { %7089 = vst [vmem:[%s12153_s26 + $0x300] sm:$0xff] %v7025_v23  ;;  %9091 = vst [vmem:[%s12153_s26 + $0x2f8] sm:$0xff] %v8467_v60  ;;  %vm6899_vm13 = vcmp.ge.f32.partialorder %v9280_v15, 0.0  ;;  %v6963_v36 = vmul.f32 0.2, %v9280_v15  ;;  %vm6900_vm14 = vcmp.ge.f32.partialorder %v9281_v21, 0.0  ;;  %v9343_v6 = vadd.f32 %v8255_v46, %v12160_v61 }
 0x3e2   : > { %v6964_v56 = vmul.f32 0.2, %v9281_v21  ;;  %v7026_v26 = vsel %vm6898_vm12, %v9279_v63, %v6962_v12  ;;  %vm8340_vm15 = vcmp.ge.f32.partialorder %v9342_v7, 0.0  ;;  %v8404_v4 = vmul.f32 0.2, %v9342_v7  ;;  %v8257_v1 = vpop.f32.mrb[86].mxu0 }
 0x3e3   : > { %v6824_v48 = vpop.f32.mrb[66].mxu1  ;;  %7090 = vst [vmem:[%s12153_s26 + $0x308] sm:$0xff] %v7026_v26  ;;  %v7027_v11 = vsel %vm6899_vm13, %v9280_v15, %v6963_v36  ;;  %v9344_v42 = vadd.f32 %v8257_v1, %v12157_v13  ;;  %v8259_v0 = vpop.f32.mrb[87].mxu0  ;;  %v9282_v51 = vadd.f32 %v6820_v10, %v12140_v43  ;;  %vm8341_vm0 = vcmp.ge.f32.partialorder %v9343_v6, 0.0 }
 0x3e4   : > { %v7028_v55 = vsel %vm6900_vm14, %v9281_v21, %v6964_v56  ;;  %v6826_v45 = vpop.f32.mrb[67].mxu1  ;;  %7091 = vst [vmem:[%s12153_s26 + $0x310] sm:$0xff] %v7027_v11  ;;  %v8468_v17 = vsel %vm8340_vm15, %v9342_v7, %v8404_v4  ;;  %v8405_v62 = vmul.f32 0.2, %v9343_v6  ;;  %v9345_v22 = vadd.f32 %v8259_v0, %v12160_v61 }
 0x3e5   : > { %7092 = vst [vmem:[%s12153_s26 + $0x318] sm:$0xff] %v7028_v55  ;;  %9092 = vst [vmem:[%s12153_s26 + $0x320] sm:$0xff] %v8468_v17  ;;  %vm8342_vm1 = vcmp.ge.f32.partialorder %v9344_v42, 0.0  ;;  %v8406_v34 = vmul.f32 0.2, %v9344_v42  ;;  %vm6901_vm2 = vcmp.ge.f32.partialorder %v9282_v51, 0.0  ;;  %v9283_v9 = vadd.f32 %v6822_v16, %v12142_v30 }
 0x3e6   : > { %v6965_v37 = vmul.f32 0.2, %v9282_v51  ;;  %v8469_v32 = vsel %vm8341_vm0, %v9343_v6, %v8405_v62  ;;  %vm8343_vm3 = vcmp.ge.f32.partialorder %v9345_v22, 0.0  ;;  %v8407_v40 = vmul.f32 0.2, %v9345_v22 }
 0x3e7   : > { %9093 = vst [vmem:[%s12153_s26 + $0x328] sm:$0xff] %v8469_v32  ;;  %v8470_v28 = vsel %vm8342_vm1, %v9344_v42, %v8406_v34  ;;  %v9284_v44 = vadd.f32 %v6824_v48, %v12140_v43  ;;  %v8263_v3 = vpop.f32.mrb[88].mxu0  ;;  %v9285_v35 = vadd.f32 %v6826_v45, %v12142_v30  ;;  %v6830_v20 = vpop.f32.mrb[68].mxu1  ;;  %vm6902_vm4 = vcmp.ge.f32.partialorder %v9283_v9, 0.0 }
 0x3e8   : > { %v7029_v49 = vsel %vm6901_vm2, %v9282_v51, %v6965_v37  ;;  %9094 = vst [vmem:[%s12153_s26 + $0x330] sm:$0xff] %v8470_v28  ;;  %v8471_v39 = vsel %vm8343_vm3, %v9345_v22, %v8407_v40  ;;  %v6966_v24 = vmul.f32 0.2, %v9283_v9  ;;  %v9346_v5 = vadd.f32 %v8263_v3, %v12157_v13  ;;  %v8265_v52 = vpop.f32.mrb[89].mxu0  ;;  %v6832_v58 = vpop.f32.mrb[69].mxu1 }
 0x3e9   : > { %7093 = vst [vmem:[%s12153_s26 + $0x340] sm:$0xff] %v7029_v49  ;;  %9095 = vst [vmem:[%s12153_s26 + $0x338] sm:$0xff] %v8471_v39  ;;  %vm6903_vm5 = vcmp.ge.f32.partialorder %v9284_v44, 0.0  ;;  %v6967_v31 = vmul.f32 0.2, %v9284_v44  ;;  %vm6904_vm6 = vcmp.ge.f32.partialorder %v9285_v35, 0.0  ;;  %v9347_v57 = vadd.f32 %v8265_v52, %v12160_v61 }
 0x3ea   : > { %v6968_v29 = vmul.f32 0.2, %v9285_v35  ;;  %v7030_v50 = vsel %vm6902_vm4, %v9283_v9, %v6966_v24  ;;  %vm8344_vm7 = vcmp.ge.f32.partialorder %v9346_v5, 0.0  ;;  %v8408_v41 = vmul.f32 0.2, %v9346_v5  ;;  %v8267_v27 = vpop.f32.mrb[90].mxu0 }
 0x3eb   : > { %v6834_v53 = vpop.f32.mrb[70].mxu1  ;;  %7094 = vst [vmem:[%s12153_s26 + $0x348] sm:$0xff] %v7030_v50  ;;  %v7031_v14 = vsel %vm6903_vm5, %v9284_v44, %v6967_v31  ;;  %v9348_v33 = vadd.f32 %v8267_v27, %v12157_v13  ;;  %v8269_v54 = vpop.f32.mrb[91].mxu0  ;;  %v9286_v38 = vadd.f32 %v6830_v20, %v12140_v43  ;;  %vm8345_vm8 = vcmp.ge.f32.partialorder %v9347_v57, 0.0 }
 0x3ec   : > { %v7032_v18 = vsel %vm6904_vm6, %v9285_v35, %v6968_v29  ;;  %v6836_v8 = vpop.f32.mrb[71].mxu1  ;;  %7095 = vst [vmem:[%s12153_s26 + $0x350] sm:$0xff] %v7031_v14  ;;  %v8472_v2 = vsel %vm8344_vm7, %v9346_v5, %v8408_v41  ;;  %v8409_v25 = vmul.f32 0.2, %v9347_v57  ;;  %v9349_v19 = vadd.f32 %v8269_v54, %v12160_v61 }
 0x3ed   : > { %7096 = vst [vmem:[%s12153_s26 + $0x358] sm:$0xff] %v7032_v18  ;;  %9096 = vst [vmem:[%s12153_s26 + $0x360] sm:$0xff] %v8472_v2  ;;  %vm8346_vm10 = vcmp.ge.f32.partialorder %v9348_v33, 0.0  ;;  %v8410_v63 = vmul.f32 0.2, %v9348_v33  ;;  %vm6905_vm11 = vcmp.ge.f32.partialorder %v9286_v38, 0.0  ;;  %v9287_v47 = vadd.f32 %v6832_v58, %v12142_v30 }
 0x3ee   : > { %v6969_v59 = vmul.f32 0.2, %v9286_v38  ;;  %v8473_v23 = vsel %vm8345_vm8, %v9347_v57, %v8409_v25  ;;  %vm8347_vm9 = vcmp.ge.f32.partialorder %v9349_v19, 0.0  ;;  %v8411_v15 = vmul.f32 0.2, %v9349_v19 }
 0x3ef   : > { %9097 = vst [vmem:[%s12153_s26 + $0x368] sm:$0xff] %v8473_v23  ;;  %v8474_v21 = vsel %vm8346_vm10, %v9348_v33, %v8410_v63  ;;  %v9288_v60 = vadd.f32 %v6834_v53, %v12140_v43  ;;  %v8273_v12 = vpop.f32.mrb[92].mxu0  ;;  %v9289_v7 = vadd.f32 %v6836_v8, %v12142_v30  ;;  %v6840_v46 = vpop.f32.mrb[72].mxu1  ;;  %vm6906_vm12 = vcmp.ge.f32.partialorder %v9287_v47, 0.0 }
 0x3f0   : > { %v7033_v10 = vsel %vm6905_vm11, %v9286_v38, %v6969_v59  ;;  %9098 = vst [vmem:[%s12153_s26 + $0x370] sm:$0xff] %v8474_v21  ;;  %v8475_v16 = vsel %vm8347_vm9, %v9349_v19, %v8411_v15  ;;  %v6970_v36 = vmul.f32 0.2, %v9287_v47  ;;  %v9350_v56 = vadd.f32 %v8273_v12, %v12157_v13  ;;  %v8275_v26 = vpop.f32.mrb[93].mxu0  ;;  %v6842_v4 = vpop.f32.mrb[73].mxu1 }
 0x3f1   : > { %7097 = vst [vmem:[%s12153_s26 + $0x380] sm:$0xff] %v7033_v10  ;;  %9099 = vst [vmem:[%s12153_s26 + $0x378] sm:$0xff] %v8475_v16  ;;  %vm6907_vm13 = vcmp.ge.f32.partialorder %v9288_v60, 0.0  ;;  %v6971_v6 = vmul.f32 0.2, %v9288_v60  ;;  %vm6908_vm14 = vcmp.ge.f32.partialorder %v9289_v7, 0.0  ;;  %v9351_v55 = vadd.f32 %v8275_v26, %v12160_v61 }
 0x3f2   : > { %v6972_v1 = vmul.f32 0.2, %v9289_v7  ;;  %v7034_v48 = vsel %vm6906_vm12, %v9287_v47, %v6970_v36  ;;  %vm8348_vm15 = vcmp.ge.f32.partialorder %v9350_v56, 0.0  ;;  %v8412_v11 = vmul.f32 0.2, %v9350_v56  ;;  %v8277_v42 = vpop.f32.mrb[94].mxu0 }
 0x3f3   : > { %v6844_v0 = vpop.f32.mrb[74].mxu1  ;;  %7098 = vst [vmem:[%s12153_s26 + $0x388] sm:$0xff] %v7034_v48  ;;  %v7035_v51 = vsel %vm6907_vm13, %v9288_v60, %v6971_v6  ;;  %v9352_v17 = vadd.f32 %v8277_v42, %v12157_v13  ;;  %v8279_v62 = vpop.f32.mrb[95].mxu0  ;;  %v9290_v22 = vadd.f32 %v6840_v46, %v12140_v43  ;;  %vm8349_vm0 = vcmp.ge.f32.partialorder %v9351_v55, 0.0 }
 0x3f4   : > { %v7036_v45 = vsel %vm6908_vm14, %v9289_v7, %v6972_v1  ;;  %v6846_v34 = vpop.f32.mrb[75].mxu1  ;;  %7099 = vst [vmem:[%s12153_s26 + $0x390] sm:$0xff] %v7035_v51  ;;  %v8476_v37 = vsel %vm8348_vm15, %v9350_v56, %v8412_v11  ;;  %v8413_v32 = vmul.f32 0.2, %v9351_v55  ;;  %v9353_v40 = vadd.f32 %v8279_v62, %v12160_v61 }
 0x3f5   : > { %7100 = vst [vmem:[%s12153_s26 + $0x398] sm:$0xff] %v7036_v45  ;;  %9100 = vst [vmem:[%s12153_s26 + $0x3a0] sm:$0xff] %v8476_v37  ;;  %vm8350_vm1 = vcmp.ge.f32.partialorder %v9352_v17, 0.0  ;;  %v8414_v9 = vmul.f32 0.2, %v9352_v17  ;;  %vm6909_vm2 = vcmp.ge.f32.partialorder %v9290_v22, 0.0  ;;  %v9291_v3 = vadd.f32 %v6842_v4, %v12142_v30 }
 0x3f6   : > { %v6973_v28 = vmul.f32 0.2, %v9290_v22  ;;  %v8477_v49 = vsel %vm8349_vm0, %v9351_v55, %v8413_v32  ;;  %vm8351_vm3 = vcmp.ge.f32.partialorder %v9353_v40, 0.0  ;;  %v8415_v44 = vmul.f32 0.2, %v9353_v40 }
 0x3f7   : > { %9101 = vst [vmem:[%s12153_s26 + $0x3a8] sm:$0xff] %v8477_v49  ;;  %v8478_v35 = vsel %vm8350_vm1, %v9352_v17, %v8414_v9  ;;  %v9292_v39 = vadd.f32 %v6844_v0, %v12140_v43  ;;  %v8283_v24 = vpop.f32.mrb[96].mxu0  ;;  %v9293_v5 = vadd.f32 %v6846_v34, %v12142_v30  ;;  %vm6910_vm4 = vcmp.ge.f32.partialorder %v9291_v3, 0.0 }
 0x3f8   : > { %v7037_v20 = vsel %vm6909_vm2, %v9290_v22, %v6973_v28  ;;  %9102 = vst [vmem:[%s12153_s26 + $0x3b0] sm:$0xff] %v8478_v35  ;;  %v8479_v52 = vsel %vm8351_vm3, %v9353_v40, %v8415_v44  ;;  %v6974_v58 = vmul.f32 0.2, %v9291_v3  ;;  %v9354_v31 = vadd.f32 %v8283_v24, %v12157_v13  ;;  %v8285_v29 = vpop.f32.mrb[97].mxu0 }
 0x3f9   : > { %7101 = vst [vmem:[%s12153_s26 + $0x3c0] sm:$0xff] %v7037_v20  ;;  %9103 = vst [vmem:[%s12153_s26 + $0x3b8] sm:$0xff] %v8479_v52  ;;  %vm6911_vm5 = vcmp.ge.f32.partialorder %v9292_v39, 0.0  ;;  %v6975_v50 = vmul.f32 0.2, %v9292_v39  ;;  %vm6912_vm6 = vcmp.ge.f32.partialorder %v9293_v5, 0.0  ;;  %v9355_v57 = vadd.f32 %v8285_v29, %v12160_v61 }
 0x3fa   : > { %v6976_v41 = vmul.f32 0.2, %v9293_v5  ;;  %v7038_v43 = vsel %vm6910_vm4, %v9291_v3, %v6974_v58  ;;  %vm8352_vm7 = vcmp.ge.f32.partialorder %v9354_v31, 0.0  ;;  %v8416_v30 = vmul.f32 0.2, %v9354_v31  ;;  %v8287_v27 = vpop.f32.mrb[98].mxu0 }
 0x3fb   : > { %7102 = vst [vmem:[%s12153_s26 + $0x3c8] sm:$0xff] %v7038_v43  ;;  %v7039_v53 = vsel %vm6911_vm5, %v9292_v39, %v6975_v50  ;;  %v9356_v18 = vadd.f32 %v8287_v27, %v12157_v13  ;;  %v8289_v33 = vpop.f32.mrb[99].mxu0  ;;  %vm8353_vm8 = vcmp.ge.f32.partialorder %v9355_v57, 0.0  ;;  %v8417_v38 = vmul.f32 0.2, %v9355_v57 }
 0x3fc   : > { %v7040_v14 = vsel %vm6912_vm6, %v9293_v5, %v6976_v41  ;;  %7103 = vst [vmem:[%s12153_s26 + $0x3d0] sm:$0xff] %v7039_v53  ;;  %v8480_v54 = vsel %vm8352_vm7, %v9354_v31, %v8416_v30  ;;  %v9357_v8 = vadd.f32 %v8289_v33, %v12160_v61 }
 0x3fd   : > { %7104 = vst [vmem:[%s12153_s26 + $0x3d8] sm:$0xff] %v7040_v14  ;;  %9104 = vst [vmem:[%s12153_s26 + $0x3e0] sm:$0xff] %v8480_v54  ;;  %vm8354_vm10 = vcmp.ge.f32.partialorder %v9356_v18, 0.0  ;;  %v8418_v2 = vmul.f32 0.2, %v9356_v18  ;;  %v8481_v25 = vsel %vm8353_vm8, %v9355_v57, %v8417_v38 }
 0x3fe   : > { %vm8355_vm11 = vcmp.ge.f32.partialorder %v9357_v8, 0.0  ;;  %v8419_v19 = vmul.f32 0.2, %v9357_v8  ;;  %9105 = vst [vmem:[%s12153_s26 + $0x3e8] sm:$0xff] %v8481_v25 }
 0x3ff   : > { %v8482_v63 = vsel %vm8354_vm10, %v9356_v18, %v8418_v2 }
 0x400   : > { %9106 = vst [vmem:[%s12153_s26 + $0x3f0] sm:$0xff] %v8482_v63  ;;  %v8483_v13 = vsel %vm8355_vm11, %v9357_v8, %v8419_v19 }
 0x401   : > { %9107 = vst [vmem:[%s12153_s26 + $0x3f8] sm:$0xff] %v8483_v13 }
 0x402 PF: > { %s16_s23 = sadd.s32 1, %s9963_s23   ;;  %s12499_s21 = smov %s9959_s22 }
 0x403   : > { %p13_p5 = scmp.ge.s32.totalorder %s16_s23, 4   ;;  %s12500_s22 = smov %s12502_s24 }
 0x405   :  { %15 = sbr.rel (!%p13_p5) target bundleno = 2 (0x2), region = 79 }

</bundles_post_ra>
